<compile_context>
chip_gen: v5e
topology: v5e:2x2
jax: 0.10.0
libtpu: 0.0.40
codegen_flags: <defaults>
</compile_context>

<pallas_src>
import numpy as np
import jax
import jax.numpy as jnp
from jax import lax
from jax.experimental import pallas as pl
from jax.experimental.pallas import tpu as pltpu  # noqa: F401  (TPU backend)


# ----------------------------------------------------------------------------
# Synthetic darknet cfg (what parse_cfg("...cfg") would return), no file I/O.
# ----------------------------------------------------------------------------
CFG_BLOCKS = [
    {'type': 'net', 'height': '16', 'width': '16', 'channels': '3'},
    {'type': 'convolutional', 'batch_normalize': '1', 'filters': '8',  'size': '3', 'stride': '1', 'pad': '1', 'activation': 'leaky'},   # 0: 16x16x8
    {'type': 'convolutional', 'batch_normalize': '1', 'filters': '16', 'size': '3', 'stride': '2', 'pad': '1', 'activation': 'leaky'},   # 1: 8x8x16
    {'type': 'convolutional', 'batch_normalize': '1', 'filters': '16', 'size': '1', 'stride': '1', 'pad': '1', 'activation': 'leaky'},   # 2: 8x8x16
    {'type': 'shortcut', 'from': '-2', 'activation': 'linear'},                                                                          # 3: 8x8x16
    {'type': 'convolutional', 'batch_normalize': '1', 'filters': '16', 'size': '3', 'stride': '2', 'pad': '1', 'activation': 'leaky'},   # 4: 4x4x16
    {'type': 'convolutional', 'filters': '21', 'size': '1', 'stride': '1', 'pad': '1', 'activation': 'linear'},                          # 5: 4x4x21
    {'type': 'yolo', 'mask': '0,1,2', 'anchors': '2,3, 4,5, 6,7', 'classes': '2', 'num': '3'},                                           # 6: (B,48,7)
    {'type': 'route', 'layers': '-4'},                                                                                                   # 7: 8x8x16
    {'type': 'convolutional', 'batch_normalize': '1', 'filters': '8',  'size': '1', 'stride': '1', 'pad': '1', 'activation': 'leaky'},   # 8: 8x8x8
    {'type': 'upsample', 'stride': '2'},                                                                                                 # 9: 16x16x8
    {'type': 'route', 'layers': '-1, 0'},                                                                                                # 10: 16x16x16
    {'type': 'convolutional', 'batch_normalize': '1', 'filters': '16', 'size': '3', 'stride': '1', 'pad': '1', 'activation': 'leaky'},   # 11: 16x16x16
    {'type': 'convolutional', 'filters': '21', 'size': '1', 'stride': '1', 'pad': '1', 'activation': 'linear'},                          # 12: 16x16x21
    {'type': 'yolo', 'mask': '0,1,2', 'anchors': '2,3, 4,5, 6,7', 'classes': '2', 'num': '3'},                                           # 13: (B,768,7)
]

INP_DIM = int(CFG_BLOCKS[0]['height'])


def _parse_yolo(block):
    mask = [int(v) for v in block['mask'].split(',')]
    anc = [int(a) for a in block['anchors'].split(',')]
    anc = [(anc[j], anc[j + 1]) for j in range(0, len(anc), 2)]
    return [anc[j] for j in mask], int(block['classes'])


_YOLO_HEAD1 = _parse_yolo(CFG_BLOCKS[7])    # feeds layer-6 detections
_YOLO_HEAD2 = _parse_yolo(CFG_BLOCKS[14])   # feeds layer-13 detections


# ----------------------------------------------------------------------------
# Pallas call helpers (whole-array blocks, grid=(1,); full-extent dims are
# exempt from the (8,128) divisibility rule and everything fits VMEM easily).
# ----------------------------------------------------------------------------
def _full_spec(shape):
    nd = len(shape)
    return pl.BlockSpec(shape, lambda i, _nd=nd: (0,) * _nd)


def _pcall(kernel, args, out_shape, out_dtype):
    return pl.pallas_call(
        kernel,
        grid=(1,),
        in_specs=[_full_spec(a.shape) for a in args],
        out_specs=_full_spec(out_shape),
        out_shape=jax.ShapeDtypeStruct(out_shape, out_dtype),
    )(*args)


# ----------------------------------------------------------------------------
# In-kernel building blocks
# ----------------------------------------------------------------------------
def _mxu(a, b):
    return jnp.dot(a, b, preferred_element_type=jnp.float32)


def _bn_leaky_f32(acc, gamma, beta, eps=1e-5):
    # Training-mode BatchNorm2d (batch stats over M = N*H*W), applied as a
    # single FMA per element, followed by LeakyReLU(0.1).
    # acc: (F, M) f32; gamma/beta: (F, 1) f32.
    m = acc.shape[1]
    inv_m = 1.0 / m
    mean = jnp.sum(acc, axis=1, keepdims=True) * inv_m
    var = jnp.maximum(jnp.sum(acc * acc, axis=1, keepdims=True) * inv_m
                      - mean * mean, 0.0)
    scale = gamma * lax.rsqrt(var + eps)          # rsqrt -> EUP slot
    shift = beta - mean * scale
    y = acc * scale + shift
    return jnp.where(y > 0, y, 0.1 * y)


def _yolo_transform(y, mul1, add, mul2, isexp):
    # y: (A*bbox, B*G*G) f32 raw detection-conv output (channel-major layout).
    # attrs 2,3 -> exp*anchor ; others -> sigmoid ; 0,1 get grid offsets ;
    # attrs 0..3 scaled by stride.  Same math as predict_transform, transposed.
    t = jnp.where(isexp > 0.5, jnp.exp(y), jax.nn.sigmoid(y))
    return (t * mul1 + add) * mul2


# ----------------------------------------------------------------------------
# Fused kernels (one pallas_call per fusion group)
# ----------------------------------------------------------------------------
def _conv_bn_leaky_kernel(p_ref, w_ref, g_ref, b_ref, o_ref):
    # layer 0 : conv(3x3/1) + BN + leaky
    y = _bn_leaky_f32(_mxu(w_ref[...], p_ref[...]), g_ref[...], b_ref[...])
    o_ref[...] = y.astype(o_ref.dtype)


def _conv_conv_shortcut_kernel(p_ref, w1_ref, g1_ref, b1_ref,
                               w2_ref, g2_ref, b2_ref, o_ref):
    # layers 1-3 : conv(3x3/2)+BN+leaky -> conv(1x1)+BN+leaky -> residual add
    y1 = _bn_leaky_f32(_mxu(w1_ref[...], p_ref[...]), g1_ref[...], b1_ref[...])
    y2 = _bn_leaky_f32(_mxu(w2_ref[...], y1.astype(jnp.bfloat16)),
                       g2_ref[...], b2_ref[...])
    o_ref[...] = (y2 + y1).astype(o_ref.dtype)


def _conv_conv_yolo_kernel(p_ref, w1_ref, g1_ref, b1_ref, w2_ref, bias2_ref,
                           mul1_ref, add_ref, mul2_ref, isexp_ref, o_ref):
    # layers 4-6 / 11-13 : conv(3x3)+BN+leaky -> conv(1x1, bias, linear)
    #                      -> YOLO predict_transform (channel-major layout)
    y1 = _bn_leaky_f32(_mxu(w1_ref[...], p_ref[...]), g1_ref[...], b1_ref[...])
    y2 = _mxu(w2_ref[...], y1.astype(jnp.bfloat16)) + bias2_ref[...]
    d = _yolo_transform(y2, mul1_ref[...], add_ref[...],
                        mul2_ref[...], isexp_ref[...])
    o_ref[...] = d.astype(o_ref.dtype)


def _conv_upsample_kernel(x_ref, w_ref, g_ref, b_ref, u_ref, o_ref):
    # layers 7-9 : route(-4) -> conv(1x1)+BN+leaky -> bilinear x2 upsample
    # (upsample = one MXU matmul against a constant interpolation matrix)
    y = _bn_leaky_f32(_mxu(w_ref[...], x_ref[...]), g_ref[...], b_ref[...])
    o_ref[...] = _mxu(y.astype(jnp.bfloat16), u_ref[...]).astype(o_ref.dtype)


# ----------------------------------------------------------------------------
# Plain-JAX glue (all under jit): im2col, layout helpers, constant builders.
# ----------------------------------------------------------------------------
def _im2col(x_cbhw, k, stride, pad):
    # x: (C, B, H, W) -> patches (C*k*k, B*OH*OW); row order matches
    # weight.reshape(F, C*k*k) column order.
    C, B, H, W = x_cbhw.shape
    OH = (H + 2 * pad - k) // stride + 1
    OW = (W + 2 * pad - k) // stride + 1
    xp = jnp.pad(x_cbhw, ((0, 0), (0, 0), (pad, pad), (pad, pad)))
    taps = [xp[:, :, i:i + stride * OH:stride, j:j + stride * OW:stride]
            for i in range(k) for j in range(k)]
    cols = jnp.stack(taps, axis=1)                     # (C, k*k, B, OH, OW)
    return cols.reshape(C * k * k, B * OH * OW), OH, OW


def _pad_rows_to_multiple(p, w, mult=8):
    # Pad the contraction dim K (sublanes of patches / lanes of weight) with
    # zeros so MXU feeds are not sublane-masked (e.g. 27 -> 32 for the stem).
    k = p.shape[0]
    kp = ((k + mult - 1) // mult) * mult
    if kp != k:
        p = jnp.pad(p, ((0, kp - k), (0, 0)))
        w = jnp.pad(w, ((0, 0), (0, kp - k)))
    return p, w


def _bilinear_halfpixel_matrix(out_size, in_size):
    # nn.Upsample(scale_factor=2, mode='bilinear'), align_corners=False.
    s = (np.arange(out_size, dtype=np.float64) + 0.5) / 2.0 - 0.5
    s = np.maximum(s, 0.0)
    i0 = np.minimum(np.floor(s).astype(np.int64), in_size - 1)
    i1 = np.minimum(i0 + 1, in_size - 1)
    w = s - i0
    U = np.zeros((out_size, in_size), np.float64)
    U[np.arange(out_size), i0] += 1.0 - w
    U[np.arange(out_size), i1] += w
    return U


def _upsample_x2_matrix(batch, h, w):
    # Constant (B*h*w, B*2h*2w) matrix so that (C, B*h*w) @ U == bilinear x2
    # upsample in the channel-major flattened layout.  Block-diagonal in batch.
    uy = _bilinear_halfpixel_matrix(2 * h, h)
    ux = _bilinear_halfpixel_matrix(2 * w, w)
    us = np.kron(uy, ux)                               # (4hw, hw)
    m_in, m_out = h * w, 4 * h * w
    U = np.zeros((batch * m_in, batch * m_out), np.float32)
    for b in range(batch):
        U[b * m_in:(b + 1) * m_in, b * m_out:(b + 1) * m_out] = us.T
    return U


def _yolo_constants(anchors, num_classes, grid_size, inp_dim, batch):
    # Constants for predict_transform in the channel-major (A*bbox, B*G*G)
    # layout: (t*mul1 + add) * mul2 with t = exp on attrs 2,3 else sigmoid.
    A = len(anchors)
    bbox = 5 + num_classes
    F = A * bbox
    GG = grid_size * grid_size
    stride = inp_dim // grid_size
    attr = np.arange(F) % bbox
    aidx = np.arange(F) // bbox
    anc = np.asarray(anchors, np.float32) / float(stride)     # (A, 2)

    mul1 = np.ones((F, 1), np.float32)
    mul1[attr == 2, 0] = anc[aidx[attr == 2], 0]
    mul1[attr == 3, 0] = anc[aidx[attr == 3], 1]
    mul2 = np.ones((F, 1), np.float32)
    mul2[attr < 4, 0] = float(stride)
    isexp = ((attr == 2) | (attr == 3)).astype(np.float32).reshape(F, 1)

    g = np.arange(GG)
    add_g = np.zeros((F, GG), np.float32)
    add_g[attr == 0, :] = (g % grid_size).astype(np.float32)[None, :]
    add_g[attr == 1, :] = (g // grid_size).astype(np.float32)[None, :]
    add = np.tile(add_g, (1, batch))                   # column index = b*GG + g
    return mul1, add, mul2, isexp


def _to_detections(d, num_anchors, bbox, batch, gg):
    # (A*bbox, B*G*G) -> (B, G*G*A, bbox), matching predict_transform's output.
    return (d.reshape(num_anchors, bbox, batch, gg)
             .transpose(2, 3, 0, 1)
             .reshape(batch, gg * num_anchors, bbox))


# ----------------------------------------------------------------------------
# Parameter init (deterministic, mirrors create_modules shapes)
# ----------------------------------------------------------------------------
def init_params(blocks, key):
    net_info = blocks[0]
    prev_filters = int(net_info.get('channels', 3))
    output_filters = []
    params_list = []
    for idx, block in enumerate(blocks[1:]):
        typ = block['type']
        p = None
        filters = prev_filters
        if typ == 'convolutional':
            filters = int(block['filters'])
            k = int(block['size'])
            kw, kb, kg, kbt = (jax.random.fold_in(key, 10 * idx + j) for j in range(4))
            p = {'weight': 0.1 * jax.random.normal(kw, (filters, prev_filters, k, k), jnp.float32)}
            if 'batch_normalize' in block and int(block['batch_normalize']):
                gamma = 1.0 + 0.1 * jax.random.normal(kg, (filters,), jnp.float32)
                beta = 0.1 * jax.random.normal(kbt, (filters,), jnp.float32)
                p['bn'] = (gamma, beta)
            else:
                p['bias'] = 0.1 * jax.random.normal(kb, (filters,), jnp.float32)
        elif typ == 'route':
            l = [int(v) for v in block['layers'].split(',')]
            s = l[0]
            if len(l) > 1:
                filters = output_filters[s + idx] + output_filters[l[1]]
            else:
                filters = output_filters[s + idx]
        elif typ == 'yolo':
            anchors, _ = _parse_yolo(block)
            p = {'anchors': anchors}
        params_list.append(p)
        prev_filters = filters
        output_filters.append(filters)
    return params_list


def prepare_params(params_list):
    """Pack per-layer params into kernel-ready arrays: W as (F, K) bf16,
    BN gamma/beta and conv biases as (F, 1) f32 columns."""
    def wmat(i):
        w = params_list[i]['weight']
        return w.reshape(w.shape[0], -1).astype(jnp.bfloat16)

    def bn_cols(i):
        g, b = params_list[i]['bn']
        return (g.reshape(-1, 1).astype(jnp.float32),
                b.reshape(-1, 1).astype(jnp.float32))

    pp = {}
    for i in (0, 1, 2, 4, 8, 11):                      # conv + BN + leaky layers
        pp[f'w{i}'] = wmat(i)
        pp[f'g{i}'], pp[f'b{i}'] = bn_cols(i)
    for i in (5, 12):                                  # detection convs (bias, linear)
        pp[f'w{i}'] = wmat(i)
        pp[f'bias{i}'] = params_list[i]['bias'].reshape(-1, 1).astype(jnp.float32)
    return pp


# ----------------------------------------------------------------------------
# Darknet.forward equivalent (fused; hard-wired to CFG_BLOCKS above)
# ----------------------------------------------------------------------------
def darknet_forward(pp, x):
    """x: (B, 3, 16, 16) NCHW f32 -> detections (B, 816, 7) f32."""
    B = x.shape[0]
    x_cb = jnp.transpose(x, (1, 0, 2, 3)).astype(jnp.bfloat16)   # (C, B, H, W)

    # --- layer 0: conv 3x3/1 + BN + leaky ------------------------------------
    f0 = pp['w0'].shape[0]
    p0, oh0, ow0 = _im2col(x_cb, 3, 1, 1)
    p0, w0 = _pad_rows_to_multiple(p0, pp['w0'])
    out0 = _pcall(_conv_bn_leaky_kernel, [p0, w0, pp['g0'], pp['b0']],
                  (f0, B * oh0 * ow0), jnp.bfloat16)

    # --- layers 1-3: conv 3x3/2 + conv 1x1 + shortcut ------------------------
    f3 = pp['w2'].shape[0]
    p1, oh1, ow1 = _im2col(out0.reshape(f0, B, oh0, ow0), 3, 2, 1)
    p1, w1 = _pad_rows_to_multiple(p1, pp['w1'])
    out3 = _pcall(_conv_conv_shortcut_kernel,
                  [p1, w1, pp['g1'], pp['b1'], pp['w2'], pp['g2'], pp['b2']],
                  (f3, B * oh1 * ow1), jnp.bfloat16)

    # --- layers 4-6: conv 3x3/2 + conv 1x1(bias) + yolo head 1 ---------------
    anchors1, classes1 = _YOLO_HEAD1
    fdet1 = pp['w5'].shape[0]
    p4, oh4, _ = _im2col(out3.reshape(f3, B, oh1, ow1), 3, 2, 1)
    p4, w4 = _pad_rows_to_multiple(p4, pp['w4'])
    g1 = oh4
    m1, a1, s1, e1 = _yolo_constants(anchors1, classes1, g1, INP_DIM, B)
    d1 = _pcall(_conv_conv_yolo_kernel,
                [p4, w4, pp['g4'], pp['b4'], pp['w5'], pp['bias5'],
                 jnp.asarray(m1), jnp.asarray(a1), jnp.asarray(s1), jnp.asarray(e1)],
                (fdet1, B * g1 * g1), jnp.float32)

    # --- layers 7-9: route(-4) + conv 1x1 + bilinear x2 upsample -------------
    f8 = pp['w8'].shape[0]
    U = jnp.asarray(_upsample_x2_matrix(B, oh1, ow1), jnp.bfloat16)
    up = _pcall(_conv_upsample_kernel, [out3, pp['w8'], pp['g8'], pp['b8'], U],
                (f8, B * (2 * oh1) * (2 * ow1)), jnp.bfloat16)

    # --- layers 10-13: route(-1,0) + conv 3x3/1 + conv 1x1(bias) + yolo head 2
    anchors2, classes2 = _YOLO_HEAD2
    fdet2 = pp['w12'].shape[0]
    cat = jnp.concatenate([up.reshape(f8, B, 2 * oh1, 2 * ow1),
                           out0.reshape(f0, B, oh0, ow0)], axis=0)
    p11, oh11, _ = _im2col(cat, 3, 1, 1)
    p11, w11 = _pad_rows_to_multiple(p11, pp['w11'])
    g2 = oh11
    m2, a2, s2, e2 = _yolo_constants(anchors2, classes2, g2, INP_DIM, B)
    d2 = _pcall(_conv_conv_yolo_kernel,
                [p11, w11, pp['g11'], pp['b11'], pp['w12'], pp['bias12'],
                 jnp.asarray(m2), jnp.asarray(a2), jnp.asarray(s2), jnp.asarray(e2)],
                (fdet2, B * g2 * g2), jnp.float32)

    # --- detections: reshape to PyTorch predict_transform layout and concat --
    det1 = _to_detections(d1, len(anchors1), 5 + classes1, B, g1 * g1)
    det2 = _to_detections(d2, len(anchors2), 5 + classes2, B, g2 * g2)
    return jnp.concatenate([det1, det2], axis=1)


if __name__ == "__main__":
    key = jax.random.PRNGKey(0)
    params = init_params(CFG_BLOCKS, jax.random.fold_in(key, 1))
    pp = prepare_params(params)
    x = jax.random.normal(jax.random.fold_in(key, 2), (2, 3, 16, 16), jnp.float32)

    fwd = jax.jit(darknet_forward)
    det = jax.block_until_ready(fwd(pp, x))

    assert det.shape == (2, 816, 7), det.shape
    assert bool(jnp.all(jnp.isfinite(det)))
    print("KERNEL_OK")
</pallas_src>

<mosaic_0001>
module attributes {stable_mosaic.version = 11 : i64} {
  func.func @_conv_bn_leaky_kernel(%arg0: i32, %arg1: memref<32x512xbf16, #tpu.memory_space<vmem>>, %arg2: memref<8x32xbf16, #tpu.memory_space<vmem>>, %arg3: memref<8x1xf32, #tpu.memory_space<vmem>>, %arg4: memref<8x1xf32, #tpu.memory_space<vmem>>, %arg5: memref<8x512xbf16, #tpu.memory_space<vmem>>) attributes {dimension_semantics = [#tpu.dimension_semantics<arbitrary>], iteration_bounds = array<i64: 1>, scalar_prefetch = 0 : i64, scratch_operands = 0 : i64, tpu.core_type = #tpu.core_type<tc>, window_params = [{pipeline_mode = #tpu.pipeline_mode<synchronous>, transform_indices = @transform_0, window_bounds = array<i64: 32, 512>}, {pipeline_mode = #tpu.pipeline_mode<synchronous>, transform_indices = @transform_1, window_bounds = array<i64: 8, 32>}, {pipeline_mode = #tpu.pipeline_mode<synchronous>, transform_indices = @transform_2, window_bounds = array<i64: 8, 1>}, {pipeline_mode = #tpu.pipeline_mode<synchronous>, transform_indices = @transform_3, window_bounds = array<i64: 8, 1>}, {pipeline_mode = #tpu.pipeline_mode<synchronous>, transform_indices = @transform_4, window_bounds = array<i64: 8, 512>}]} {
    %c0 = arith.constant 0 : index
    %c0_0 = arith.constant 0 : index
    %0 = vector.load %arg2[%c0, %c0_0] : memref<8x32xbf16, #tpu.memory_space<vmem>>, vector<8x32xbf16>
    %c0_1 = arith.constant 0 : index
    %c0_2 = arith.constant 0 : index
    %1 = vector.load %arg1[%c0_1, %c0_2] : memref<32x512xbf16, #tpu.memory_space<vmem>>, vector<32x512xbf16>
    %cst = arith.constant dense<0.000000e+00> : vector<8x512xf32>
    %2 = tpu.matmul %0, %1, %cst {dimension_numbers = #tpu.dot_dimension_numbers<[1], [0], [0], [1], [0, 0, 1, 1], [], []>} : vector<8x32xbf16>, vector<32x512xbf16>, vector<8x512xf32> -> vector<8x512xf32>
    %c0_3 = arith.constant 0 : index
    %c0_4 = arith.constant 0 : index
    %3 = vector.load %arg3[%c0_3, %c0_4] : memref<8x1xf32, #tpu.memory_space<vmem>>, vector<8x1xf32>
    %c0_5 = arith.constant 0 : index
    %c0_6 = arith.constant 0 : index
    %4 = vector.load %arg4[%c0_5, %c0_6] : memref<8x1xf32, #tpu.memory_space<vmem>>, vector<8x1xf32>
    %cst_7 = arith.constant dense<0.000000e+00> : vector<8xf32>
    %5 = vector.multi_reduction <add>, %2, %cst_7 [1] : vector<8x512xf32> to vector<8xf32>
    %6 = vector.shape_cast %5 : vector<8xf32> to vector<8x1xf32>
    %cst_8 = arith.constant 0.001953125 : f32
    %7 = vector.broadcast %cst_8 : f32 to vector<8x1xf32>
    %8 = arith.mulf %6, %7 : vector<8x1xf32>
    %9 = arith.mulf %2, %2 : vector<8x512xf32>
    %cst_9 = arith.constant dense<0.000000e+00> : vector<8xf32>
    %10 = vector.multi_reduction <add>, %9, %cst_9 [1] : vector<8x512xf32> to vector<8xf32>
    %11 = vector.shape_cast %10 : vector<8xf32> to vector<8x1xf32>
    %cst_10 = arith.constant 0.001953125 : f32
    %12 = vector.broadcast %cst_10 : f32 to vector<8x1xf32>
    %13 = arith.mulf %11, %12 : vector<8x1xf32>
    %14 = arith.mulf %8, %8 : vector<8x1xf32>
    %15 = arith.subf %13, %14 : vector<8x1xf32>
    %cst_11 = arith.constant 0.000000e+00 : f32
    %16 = vector.broadcast %cst_11 : f32 to vector<8x1xf32>
    %17 = arith.maximumf %15, %16 : vector<8x1xf32>
    %cst_12 = arith.constant 9.99999974E-6 : f32
    %18 = vector.broadcast %cst_12 : f32 to vector<8x1xf32>
    %19 = arith.addf %17, %18 : vector<8x1xf32>
    %20 = math.rsqrt %19 : vector<8x1xf32>
    %21 = arith.mulf %3, %20 : vector<8x1xf32>
    %22 = arith.mulf %8, %21 : vector<8x1xf32>
    %23 = arith.subf %4, %22 : vector<8x1xf32>
    %24 = vector.broadcast %21 : vector<8x1xf32> to vector<8x512xf32>
    %25 = arith.mulf %2, %24 : vector<8x512xf32>
    %26 = vector.broadcast %23 : vector<8x1xf32> to vector<8x512xf32>
    %27 = arith.addf %25, %26 : vector<8x512xf32>
    %cst_13 = arith.constant 0.000000e+00 : f32
    %28 = vector.broadcast %cst_13 : f32 to vector<8x512xf32>
    %29 = arith.cmpf ogt, %27, %28 : vector<8x512xf32>
    %cst_14 = arith.constant 1.000000e-01 : f32
    %30 = vector.broadcast %cst_14 : f32 to vector<8x512xf32>
    %31 = arith.mulf %30, %27 : vector<8x512xf32>
    %32 = arith.select %29, %27, %31 : vector<8x512xi1>, vector<8x512xf32>
    %33 = arith.truncf %32 : vector<8x512xf32> to vector<8x512xbf16>
    %c0_15 = arith.constant 0 : index
    %c0_16 = arith.constant 0 : index
    %34 = vector.load %arg5[%c0_15, %c0_16] : memref<8x512xbf16, #tpu.memory_space<vmem>>, vector<8x512xbf16>
    tpu.vector_store %arg5[%c0_15, %c0_16], %33 {strides = array<i32>} : memref<8x512xbf16, #tpu.memory_space<vmem>>, vector<8x512xbf16>,
    return
  }
  func.func @transform_0(%arg0: i32) -> (i32, i32) {
    %c0_i32 = arith.constant 0 : i32
    %c0_i32_0 = arith.constant 0 : i32
    %c0_i32_1 = arith.constant 0 : i32
    return %c0_i32, %c0_i32_0 : i32, i32
  }
  func.func @transform_1(%arg0: i32) -> (i32, i32) {
    %c0_i32 = arith.constant 0 : i32
    %c0_i32_0 = arith.constant 0 : i32
    %c0_i32_1 = arith.constant 0 : i32
    return %c0_i32, %c0_i32_0 : i32, i32
  }
  func.func @transform_2(%arg0: i32) -> (i32, i32) {
    %c0_i32 = arith.constant 0 : i32
    %c0_i32_0 = arith.constant 0 : i32
    %c0_i32_1 = arith.constant 0 : i32
    return %c0_i32, %c0_i32_0 : i32, i32
  }
  func.func @transform_3(%arg0: i32) -> (i32, i32) {
    %c0_i32 = arith.constant 0 : i32
    %c0_i32_0 = arith.constant 0 : i32
    %c0_i32_1 = arith.constant 0 : i32
    return %c0_i32, %c0_i32_0 : i32, i32
  }
  func.func @transform_4(%arg0: i32) -> (i32, i32) {
    %c0_i32 = arith.constant 0 : i32
    %c0_i32_0 = arith.constant 0 : i32
    %c0_i32_1 = arith.constant 0 : i32
    return %c0_i32, %c0_i32_0 : i32, i32
  }
}

module attributes {stable_mosaic.version = 11 : i64} {
  func.func @_conv_conv_shortcut_kernel(%arg0: i32, %arg1: memref<72x128xbf16, #tpu.memory_space<vmem>>, %arg2: memref<16x72xbf16, #tpu.memory_space<vmem>>, %arg3: memref<16x1xf32, #tpu.memory_space<vmem>>, %arg4: memref<16x1xf32, #tpu.memory_space<vmem>>, %arg5: memref<16x16xbf16, #tpu.memory_space<vmem>>, %arg6: memref<16x1xf32, #tpu.memory_space<vmem>>, %arg7: memref<16x1xf32, #tpu.memory_space<vmem>>, %arg8: memref<16x128xbf16, #tpu.memory_space<vmem>>) attributes {dimension_semantics = [#tpu.dimension_semantics<arbitrary>], iteration_bounds = array<i64: 1>, scalar_prefetch = 0 : i64, scratch_operands = 0 : i64, tpu.core_type = #tpu.core_type<tc>, window_params = [{pipeline_mode = #tpu.pipeline_mode<synchronous>, transform_indices = @transform_0, window_bounds = array<i64: 72, 128>}, {pipeline_mode = #tpu.pipeline_mode<synchronous>, transform_indices = @transform_1, window_bounds = array<i64: 16, 72>}, {pipeline_mode = #tpu.pipeline_mode<synchronous>, transform_indices = @transform_2, window_bounds = array<i64: 16, 1>}, {pipeline_mode = #tpu.pipeline_mode<synchronous>, transform_indices = @transform_3, window_bounds = array<i64: 16, 1>}, {pipeline_mode = #tpu.pipeline_mode<synchronous>, transform_indices = @transform_4, window_bounds = array<i64: 16, 16>}, {pipeline_mode = #tpu.pipeline_mode<synchronous>, transform_indices = @transform_5, window_bounds = array<i64: 16, 1>}, {pipeline_mode = #tpu.pipeline_mode<synchronous>, transform_indices = @transform_6, window_bounds = array<i64: 16, 1>}, {pipeline_mode = #tpu.pipeline_mode<synchronous>, transform_indices = @transform_7, window_bounds = array<i64: 16, 128>}]} {
    %c0 = arith.constant 0 : index
    %c0_0 = arith.constant 0 : index
    %0 = vector.load %arg2[%c0, %c0_0] : memref<16x72xbf16, #tpu.memory_space<vmem>>, vector<16x72xbf16>
    %c0_1 = arith.constant 0 : index
    %c0_2 = arith.constant 0 : index
    %1 = vector.load %arg1[%c0_1, %c0_2] : memref<72x128xbf16, #tpu.memory_space<vmem>>, vector<72x128xbf16>
    %cst = arith.constant dense<0.000000e+00> : vector<16x128xf32>
    %2 = tpu.matmul %0, %1, %cst {dimension_numbers = #tpu.dot_dimension_numbers<[1], [0], [0], [1], [0, 0, 1, 1], [], []>} : vector<16x72xbf16>, vector<72x128xbf16>, vector<16x128xf32> -> vector<16x128xf32>
    %c0_3 = arith.constant 0 : index
    %c0_4 = arith.constant 0 : index
    %3 = vector.load %arg3[%c0_3, %c0_4] : memref<16x1xf32, #tpu.memory_space<vmem>>, vector<16x1xf32>
    %c0_5 = arith.constant 0 : index
    %c0_6 = arith.constant 0 : index
    %4 = vector.load %arg4[%c0_5, %c0_6] : memref<16x1xf32, #tpu.memory_space<vmem>>, vector<16x1xf32>
    %cst_7 = arith.constant dense<0.000000e+00> : vector<16xf32>
    %5 = vector.multi_reduction <add>, %2, %cst_7 [1] : vector<16x128xf32> to vector<16xf32>
    %6 = vector.shape_cast %5 : vector<16xf32> to vector<16x1xf32>
    %cst_8 = arith.constant 7.812500e-03 : f32
    %7 = vector.broadcast %cst_8 : f32 to vector<16x1xf32>
    %8 = arith.mulf %6, %7 : vector<16x1xf32>
    %9 = arith.mulf %2, %2 : vector<16x128xf32>
    %cst_9 = arith.constant dense<0.000000e+00> : vector<16xf32>
    %10 = vector.multi_reduction <add>, %9, %cst_9 [1] : vector<16x128xf32> to vector<16xf32>
    %11 = vector.shape_cast %10 : vector<16xf32> to vector<16x1xf32>
    %cst_10 = arith.constant 7.812500e-03 : f32
    %12 = vector.broadcast %cst_10 : f32 to vector<16x1xf32>
    %13 = arith.mulf %11, %12 : vector<16x1xf32>
    %14 = arith.mulf %8, %8 : vector<16x1xf32>
    %15 = arith.subf %13, %14 : vector<16x1xf32>
    %cst_11 = arith.constant 0.000000e+00 : f32
    %16 = vector.broadcast %cst_11 : f32 to vector<16x1xf32>
    %17 = arith.maximumf %15, %16 : vector<16x1xf32>
    %cst_12 = arith.constant 9.99999974E-6 : f32
    %18 = vector.broadcast %cst_12 : f32 to vector<16x1xf32>
    %19 = arith.addf %17, %18 : vector<16x1xf32>
    %20 = math.rsqrt %19 : vector<16x1xf32>
    %21 = arith.mulf %3, %20 : vector<16x1xf32>
    %22 = arith.mulf %8, %21 : vector<16x1xf32>
    %23 = arith.subf %4, %22 : vector<16x1xf32>
    %24 = vector.broadcast %21 : vector<16x1xf32> to vector<16x128xf32>
    %25 = arith.mulf %2, %24 : vector<16x128xf32>
    %26 = vector.broadcast %23 : vector<16x1xf32> to vector<16x128xf32>
    %27 = arith.addf %25, %26 : vector<16x128xf32>
    %cst_13 = arith.constant 0.000000e+00 : f32
    %28 = vector.broadcast %cst_13 : f32 to vector<16x128xf32>
    %29 = arith.cmpf ogt, %27, %28 : vector<16x128xf32>
    %cst_14 = arith.constant 1.000000e-01 : f32
    %30 = vector.broadcast %cst_14 : f32 to vector<16x128xf32>
    %31 = arith.mulf %30, %27 : vector<16x128xf32>
    %32 = arith.select %29, %27, %31 : vector<16x128xi1>, vector<16x128xf32>
    %c0_15 = arith.constant 0 : index
    %c0_16 = arith.constant 0 : index
    %33 = vector.load %arg5[%c0_15, %c0_16] : memref<16x16xbf16, #tpu.memory_space<vmem>>, vector<16x16xbf16>
    %34 = arith.truncf %32 : vector<16x128xf32> to vector<16x128xbf16>
    %cst_17 = arith.constant dense<0.000000e+00> : vector<16x128xf32>
    %35 = tpu.matmul %33, %34, %cst_17 {dimension_numbers = #tpu.dot_dimension_numbers<[1], [0], [0], [1], [0, 0, 1, 1], [], []>} : vector<16x16xbf16>, vector<16x128xbf16>, vector<16x128xf32> -> vector<16x128xf32>
    %c0_18 = arith.constant 0 : index
    %c0_19 = arith.constant 0 : index
    %36 = vector.load %arg6[%c0_18, %c0_19] : memref<16x1xf32, #tpu.memory_space<vmem>>, vector<16x1xf32>
    %c0_20 = arith.constant 0 : index
    %c0_21 = arith.constant 0 : index
    %37 = vector.load %arg7[%c0_20, %c0_21] : memref<16x1xf32, #tpu.memory_space<vmem>>, vector<16x1xf32>
    %cst_22 = arith.constant dense<0.000000e+00> : vector<16xf32>
    %38 = vector.multi_reduction <add>, %35, %cst_22 [1] : vector<16x128xf32> to vector<16xf32>
    %39 = vector.shape_cast %38 : vector<16xf32> to vector<16x1xf32>
    %cst_23 = arith.constant 7.812500e-03 : f32
    %40 = vector.broadcast %cst_23 : f32 to vector<16x1xf32>
    %41 = arith.mulf %39, %40 : vector<16x1xf32>
    %42 = arith.mulf %35, %35 : vector<16x128xf32>
    %cst_24 = arith.constant dense<0.000000e+00> : vector<16xf32>
    %43 = vector.multi_reduction <add>, %42, %cst_24 [1] : vector<16x128xf32> to vector<16xf32>
    %44 = vector.shape_cast %43 : vector<16xf32> to vector<16x1xf32>
    %cst_25 = arith.constant 7.812500e-03 : f32
    %45 = vector.broadcast %cst_25 : f32 to vector<16x1xf32>
    %46 = arith.mulf %44, %45 : vector<16x1xf32>
    %47 = arith.mulf %41, %41 : vector<16x1xf32>
    %48 = arith.subf %46, %47 : vector<16x1xf32>
    %cst_26 = arith.constant 0.000000e+00 : f32
    %49 = vector.broadcast %cst_26 : f32 to vector<16x1xf32>
    %50 = arith.maximumf %48, %49 : vector<16x1xf32>
    %cst_27 = arith.constant 9.99999974E-6 : f32
    %51 = vector.broadcast %cst_27 : f32 to vector<16x1xf32>
    %52 = arith.addf %50, %51 : vector<16x1xf32>
    %53 = math.rsqrt %52 : vector<16x1xf32>
    %54 = arith.mulf %36, %53 : vector<16x1xf32>
    %55 = arith.mulf %41, %54 : vector<16x1xf32>
    %56 = arith.subf %37, %55 : vector<16x1xf32>
    %57 = vector.broadcast %54 : vector<16x1xf32> to vector<16x128xf32>
    %58 = arith.mulf %35, %57 : vector<16x128xf32>
    %59 = vector.broadcast %56 : vector<16x1xf32> to vector<16x128xf32>
    %60 = arith.addf %58, %59 : vector<16x128xf32>
    %cst_28 = arith.constant 0.000000e+00 : f32
    %61 = vector.broadcast %cst_28 : f32 to vector<16x128xf32>
    %62 = arith.cmpf ogt, %60, %61 : vector<16x128xf32>
    %cst_29 = arith.constant 1.000000e-01 : f32
    %63 = vector.broadcast %cst_29 : f32 to vector<16x128xf32>
    %64 = arith.mulf %63, %60 : vector<16x128xf32>
    %65 = arith.select %62, %60, %64 : vector<16x128xi1>, vector<16x128xf32>
    %66 = arith.addf %65, %32 : vector<16x128xf32>
    %67 = arith.truncf %66 : vector<16x128xf32> to vector<16x128xbf16>
    %c0_30 = arith.constant 0 : index
    %c0_31 = arith.constant 0 : index
    %68 = vector.load %arg8[%c0_30, %c0_31] : memref<16x128xbf16, #tpu.memory_space<vmem>>, vector<16x128xbf16>
    tpu.vector_store %arg8[%c0_30, %c0_31], %67 {strides = array<i32>} : memref<16x128xbf16, #tpu.memory_space<vmem>>, vector<16x128xbf16>,
    return
  }
  func.func @transform_0(%arg0: i32) -> (i32, i32) {
    %c0_i32 = arith.constant 0 : i32
    %c0_i32_0 = arith.constant 0 : i32
    %c0_i32_1 = arith.constant 0 : i32
    return %c0_i32, %c0_i32_0 : i32, i32
  }
  func.func @transform_1(%arg0: i32) -> (i32, i32) {
    %c0_i32 = arith.constant 0 : i32
    %c0_i32_0 = arith.constant 0 : i32
    %c0_i32_1 = arith.constant 0 : i32
    return %c0_i32, %c0_i32_0 : i32, i32
  }
  func.func @transform_2(%arg0: i32) -> (i32, i32) {
    %c0_i32 = arith.constant 0 : i32
    %c0_i32_0 = arith.constant 0 : i32
    %c0_i32_1 = arith.constant 0 : i32
    return %c0_i32, %c0_i32_0 : i32, i32
  }
  func.func @transform_3(%arg0: i32) -> (i32, i32) {
    %c0_i32 = arith.constant 0 : i32
    %c0_i32_0 = arith.constant 0 : i32
    %c0_i32_1 = arith.constant 0 : i32
    return %c0_i32, %c0_i32_0 : i32, i32
  }
  func.func @transform_4(%arg0: i32) -> (i32, i32) {
    %c0_i32 = arith.constant 0 : i32
    %c0_i32_0 = arith.constant 0 : i32
    %c0_i32_1 = arith.constant 0 : i32
    return %c0_i32, %c0_i32_0 : i32, i32
  }
  func.func @transform_5(%arg0: i32) -> (i32, i32) {
    %c0_i32 = arith.constant 0 : i32
    %c0_i32_0 = arith.constant 0 : i32
    %c0_i32_1 = arith.constant 0 : i32
    return %c0_i32, %c0_i32_0 : i32, i32
  }
  func.func @transform_6(%arg0: i32) -> (i32, i32) {
    %c0_i32 = arith.constant 0 : i32
    %c0_i32_0 = arith.constant 0 : i32
    %c0_i32_1 = arith.constant 0 : i32
    return %c0_i32, %c0_i32_0 : i32, i32
  }
  func.func @transform_7(%arg0: i32) -> (i32, i32) {
    %c0_i32 = arith.constant 0 : i32
    %c0_i32_0 = arith.constant 0 : i32
    %c0_i32_1 = arith.constant 0 : i32
    return %c0_i32, %c0_i32_0 : i32, i32
  }
}

module attributes {stable_mosaic.version = 11 : i64} {
  func.func @_conv_upsample_kernel(%arg0: i32, %arg1: memref<16x128xbf16, #tpu.memory_space<vmem>>, %arg2: memref<8x16xbf16, #tpu.memory_space<vmem>>, %arg3: memref<8x1xf32, #tpu.memory_space<vmem>>, %arg4: memref<8x1xf32, #tpu.memory_space<vmem>>, %arg5: memref<128x512xbf16, #tpu.memory_space<vmem>>, %arg6: memref<8x512xbf16, #tpu.memory_space<vmem>>) attributes {dimension_semantics = [#tpu.dimension_semantics<arbitrary>], iteration_bounds = array<i64: 1>, scalar_prefetch = 0 : i64, scratch_operands = 0 : i64, tpu.core_type = #tpu.core_type<tc>, window_params = [{pipeline_mode = #tpu.pipeline_mode<synchronous>, transform_indices = @transform_0, window_bounds = array<i64: 16, 128>}, {pipeline_mode = #tpu.pipeline_mode<synchronous>, transform_indices = @transform_1, window_bounds = array<i64: 8, 16>}, {pipeline_mode = #tpu.pipeline_mode<synchronous>, transform_indices = @transform_2, window_bounds = array<i64: 8, 1>}, {pipeline_mode = #tpu.pipeline_mode<synchronous>, transform_indices = @transform_3, window_bounds = array<i64: 8, 1>}, {pipeline_mode = #tpu.pipeline_mode<synchronous>, transform_indices = @transform_4, window_bounds = array<i64: 128, 512>}, {pipeline_mode = #tpu.pipeline_mode<synchronous>, transform_indices = @transform_5, window_bounds = array<i64: 8, 512>}]} {
    %c0 = arith.constant 0 : index
    %c0_0 = arith.constant 0 : index
    %0 = vector.load %arg2[%c0, %c0_0] : memref<8x16xbf16, #tpu.memory_space<vmem>>, vector<8x16xbf16>
    %c0_1 = arith.constant 0 : index
    %c0_2 = arith.constant 0 : index
    %1 = vector.load %arg1[%c0_1, %c0_2] : memref<16x128xbf16, #tpu.memory_space<vmem>>, vector<16x128xbf16>
    %cst = arith.constant dense<0.000000e+00> : vector<8x128xf32>
    %2 = tpu.matmul %0, %1, %cst {dimension_numbers = #tpu.dot_dimension_numbers<[1], [0], [0], [1], [0, 0, 1, 1], [], []>} : vector<8x16xbf16>, vector<16x128xbf16>, vector<8x128xf32> -> vector<8x128xf32>
    %c0_3 = arith.constant 0 : index
    %c0_4 = arith.constant 0 : index
    %3 = vector.load %arg3[%c0_3, %c0_4] : memref<8x1xf32, #tpu.memory_space<vmem>>, vector<8x1xf32>
    %c0_5 = arith.constant 0 : index
    %c0_6 = arith.constant 0 : index
    %4 = vector.load %arg4[%c0_5, %c0_6] : memref<8x1xf32, #tpu.memory_space<vmem>>, vector<8x1xf32>
    %cst_7 = arith.constant dense<0.000000e+00> : vector<8xf32>
    %5 = vector.multi_reduction <add>, %2, %cst_7 [1] : vector<8x128xf32> to vector<8xf32>
    %6 = vector.shape_cast %5 : vector<8xf32> to vector<8x1xf32>
    %cst_8 = arith.constant 7.812500e-03 : f32
    %7 = vector.broadcast %cst_8 : f32 to vector<8x1xf32>
    %8 = arith.mulf %6, %7 : vector<8x1xf32>
    %9 = arith.mulf %2, %2 : vector<8x128xf32>
    %cst_9 = arith.constant dense<0.000000e+00> : vector<8xf32>
    %10 = vector.multi_reduction <add>, %9, %cst_9 [1] : vector<8x128xf32> to vector<8xf32>
    %11 = vector.shape_cast %10 : vector<8xf32> to vector<8x1xf32>
    %cst_10 = arith.constant 7.812500e-03 : f32
    %12 = vector.broadcast %cst_10 : f32 to vector<8x1xf32>
    %13 = arith.mulf %11, %12 : vector<8x1xf32>
    %14 = arith.mulf %8, %8 : vector<8x1xf32>
    %15 = arith.subf %13, %14 : vector<8x1xf32>
    %cst_11 = arith.constant 0.000000e+00 : f32
    %16 = vector.broadcast %cst_11 : f32 to vector<8x1xf32>
    %17 = arith.maximumf %15, %16 : vector<8x1xf32>
    %cst_12 = arith.constant 9.99999974E-6 : f32
    %18 = vector.broadcast %cst_12 : f32 to vector<8x1xf32>
    %19 = arith.addf %17, %18 : vector<8x1xf32>
    %20 = math.rsqrt %19 : vector<8x1xf32>
    %21 = arith.mulf %3, %20 : vector<8x1xf32>
    %22 = arith.mulf %8, %21 : vector<8x1xf32>
    %23 = arith.subf %4, %22 : vector<8x1xf32>
    %24 = vector.broadcast %21 : vector<8x1xf32> to vector<8x128xf32>
    %25 = arith.mulf %2, %24 : vector<8x128xf32>
    %26 = vector.broadcast %23 : vector<8x1xf32> to vector<8x128xf32>
    %27 = arith.addf %25, %26 : vector<8x128xf32>
    %cst_13 = arith.constant 0.000000e+00 : f32
    %28 = vector.broadcast %cst_13 : f32 to vector<8x128xf32>
    %29 = arith.cmpf ogt, %27, %28 : vector<8x128xf32>
    %cst_14 = arith.constant 1.000000e-01 : f32
    %30 = vector.broadcast %cst_14 : f32 to vector<8x128xf32>
    %31 = arith.mulf %30, %27 : vector<8x128xf32>
    %32 = arith.select %29, %27, %31 : vector<8x128xi1>, vector<8x128xf32>
    %33 = arith.truncf %32 : vector<8x128xf32> to vector<8x128xbf16>
    %c0_15 = arith.constant 0 : index
    %c0_16 = arith.constant 0 : index
    %34 = vector.load %arg5[%c0_15, %c0_16] : memref<128x512xbf16, #tpu.memory_space<vmem>>, vector<128x512xbf16>
    %cst_17 = arith.constant dense<0.000000e+00> : vector<8x512xf32>
    %35 = tpu.matmul %33, %34, %cst_17 {dimension_numbers = #tpu.dot_dimension_numbers<[1], [0], [0], [1], [0, 0, 1, 1], [], []>} : vector<8x128xbf16>, vector<128x512xbf16>, vector<8x512xf32> -> vector<8x512xf32>
    %36 = arith.truncf %35 : vector<8x512xf32> to vector<8x512xbf16>
    %c0_18 = arith.constant 0 : index
    %c0_19 = arith.constant 0 : index
    %37 = vector.load %arg6[%c0_18, %c0_19] : memref<8x512xbf16, #tpu.memory_space<vmem>>, vector<8x512xbf16>
    tpu.vector_store %arg6[%c0_18, %c0_19], %36 {strides = array<i32>} : memref<8x512xbf16, #tpu.memory_space<vmem>>, vector<8x512xbf16>,
    return
  }
  func.func @transform_0(%arg0: i32) -> (i32, i32) {
    %c0_i32 = arith.constant 0 : i32
    %c0_i32_0 = arith.constant 0 : i32
    %c0_i32_1 = arith.constant 0 : i32
    return %c0_i32, %c0_i32_0 : i32, i32
  }
  func.func @transform_1(%arg0: i32) -> (i32, i32) {
    %c0_i32 = arith.constant 0 : i32
    %c0_i32_0 = arith.constant 0 : i32
    %c0_i32_1 = arith.constant 0 : i32
    return %c0_i32, %c0_i32_0 : i32, i32
  }
  func.func @transform_2(%arg0: i32) -> (i32, i32) {
    %c0_i32 = arith.constant 0 : i32
    %c0_i32_0 = arith.constant 0 : i32
    %c0_i32_1 = arith.constant 0 : i32
    return %c0_i32, %c0_i32_0 : i32, i32
  }
  func.func @transform_3(%arg0: i32) -> (i32, i32) {
    %c0_i32 = arith.constant 0 : i32
    %c0_i32_0 = arith.constant 0 : i32
    %c0_i32_1 = arith.constant 0 : i32
    return %c0_i32, %c0_i32_0 : i32, i32
  }
  func.func @transform_4(%arg0: i32) -> (i32, i32) {
    %c0_i32 = arith.constant 0 : i32
    %c0_i32_0 = arith.constant 0 : i32
    %c0_i32_1 = arith.constant 0 : i32
    return %c0_i32, %c0_i32_0 : i32, i32
  }
  func.func @transform_5(%arg0: i32) -> (i32, i32) {
    %c0_i32 = arith.constant 0 : i32
    %c0_i32_0 = arith.constant 0 : i32
    %c0_i32_1 = arith.constant 0 : i32
    return %c0_i32, %c0_i32_0 : i32, i32
  }
}

module attributes {stable_mosaic.version = 11 : i64} {
  func.func @_conv_conv_yolo_kernel(%arg0: i32, %arg1: memref<144x512xbf16, #tpu.memory_space<vmem>>, %arg2: memref<16x144xbf16, #tpu.memory_space<vmem>>, %arg3: memref<16x1xf32, #tpu.memory_space<vmem>>, %arg4: memref<16x1xf32, #tpu.memory_space<vmem>>, %arg5: memref<21x16xbf16, #tpu.memory_space<vmem>>, %arg6: memref<21x1xf32, #tpu.memory_space<vmem>>, %arg7: memref<21x1xf32, #tpu.memory_space<vmem>>, %arg8: memref<21x512xf32, #tpu.memory_space<vmem>>, %arg9: memref<21x1xf32, #tpu.memory_space<vmem>>, %arg10: memref<21x1xf32, #tpu.memory_space<vmem>>, %arg11: memref<21x512xf32, #tpu.memory_space<vmem>>) attributes {dimension_semantics = [#tpu.dimension_semantics<arbitrary>], iteration_bounds = array<i64: 1>, scalar_prefetch = 0 : i64, scratch_operands = 0 : i64, tpu.core_type = #tpu.core_type<tc>, window_params = [{pipeline_mode = #tpu.pipeline_mode<synchronous>, transform_indices = @transform_0, window_bounds = array<i64: 144, 512>}, {pipeline_mode = #tpu.pipeline_mode<synchronous>, transform_indices = @transform_1, window_bounds = array<i64: 16, 144>}, {pipeline_mode = #tpu.pipeline_mode<synchronous>, transform_indices = @transform_2, window_bounds = array<i64: 16, 1>}, {pipeline_mode = #tpu.pipeline_mode<synchronous>, transform_indices = @transform_3, window_bounds = array<i64: 16, 1>}, {pipeline_mode = #tpu.pipeline_mode<synchronous>, transform_indices = @transform_4, window_bounds = array<i64: 21, 16>}, {pipeline_mode = #tpu.pipeline_mode<synchronous>, transform_indices = @transform_5, window_bounds = array<i64: 21, 1>}, {pipeline_mode = #tpu.pipeline_mode<synchronous>, transform_indices = @transform_6, window_bounds = array<i64: 21, 1>}, {pipeline_mode = #tpu.pipeline_mode<synchronous>, transform_indices = @transform_7, window_bounds = array<i64: 21, 512>}, {pipeline_mode = #tpu.pipeline_mode<synchronous>, transform_indices = @transform_8, window_bounds = array<i64: 21, 1>}, {pipeline_mode = #tpu.pipeline_mode<synchronous>, transform_indices = @transform_9, window_bounds = array<i64: 21, 1>}, {pipeline_mode = #tpu.pipeline_mode<synchronous>, transform_indices = @transform_10, window_bounds = array<i64: 21, 512>}]} {
    %c0 = arith.constant 0 : index
    %c0_0 = arith.constant 0 : index
    %0 = vector.load %arg2[%c0, %c0_0] : memref<16x144xbf16, #tpu.memory_space<vmem>>, vector<16x144xbf16>
    %c0_1 = arith.constant 0 : index
    %c0_2 = arith.constant 0 : index
    %1 = vector.load %arg1[%c0_1, %c0_2] : memref<144x512xbf16, #tpu.memory_space<vmem>>, vector<144x512xbf16>
    %cst = arith.constant dense<0.000000e+00> : vector<16x512xf32>
    %2 = tpu.matmul %0, %1, %cst {dimension_numbers = #tpu.dot_dimension_numbers<[1], [0], [0], [1], [0, 0, 1, 1], [], []>} : vector<16x144xbf16>, vector<144x512xbf16>, vector<16x512xf32> -> vector<16x512xf32>
    %c0_3 = arith.constant 0 : index
    %c0_4 = arith.constant 0 : index
    %3 = vector.load %arg3[%c0_3, %c0_4] : memref<16x1xf32, #tpu.memory_space<vmem>>, vector<16x1xf32>
    %c0_5 = arith.constant 0 : index
    %c0_6 = arith.constant 0 : index
    %4 = vector.load %arg4[%c0_5, %c0_6] : memref<16x1xf32, #tpu.memory_space<vmem>>, vector<16x1xf32>
    %cst_7 = arith.constant dense<0.000000e+00> : vector<16xf32>
    %5 = vector.multi_reduction <add>, %2, %cst_7 [1] : vector<16x512xf32> to vector<16xf32>
    %6 = vector.shape_cast %5 : vector<16xf32> to vector<16x1xf32>
    %cst_8 = arith.constant 0.001953125 : f32
    %7 = vector.broadcast %cst_8 : f32 to vector<16x1xf32>
    %8 = arith.mulf %6, %7 : vector<16x1xf32>
    %9 = arith.mulf %2, %2 : vector<16x512xf32>
    %cst_9 = arith.constant dense<0.000000e+00> : vector<16xf32>
    %10 = vector.multi_reduction <add>, %9, %cst_9 [1] : vector<16x512xf32> to vector<16xf32>
    %11 = vector.shape_cast %10 : vector<16xf32> to vector<16x1xf32>
    %cst_10 = arith.constant 0.001953125 : f32
    %12 = vector.broadcast %cst_10 : f32 to vector<16x1xf32>
    %13 = arith.mulf %11, %12 : vector<16x1xf32>
    %14 = arith.mulf %8, %8 : vector<16x1xf32>
    %15 = arith.subf %13, %14 : vector<16x1xf32>
    %cst_11 = arith.constant 0.000000e+00 : f32
    %16 = vector.broadcast %cst_11 : f32 to vector<16x1xf32>
    %17 = arith.maximumf %15, %16 : vector<16x1xf32>
    %cst_12 = arith.constant 9.99999974E-6 : f32
    %18 = vector.broadcast %cst_12 : f32 to vector<16x1xf32>
    %19 = arith.addf %17, %18 : vector<16x1xf32>
    %20 = math.rsqrt %19 : vector<16x1xf32>
    %21 = arith.mulf %3, %20 : vector<16x1xf32>
    %22 = arith.mulf %8, %21 : vector<16x1xf32>
    %23 = arith.subf %4, %22 : vector<16x1xf32>
    %24 = vector.broadcast %21 : vector<16x1xf32> to vector<16x512xf32>
    %25 = arith.mulf %2, %24 : vector<16x512xf32>
    %26 = vector.broadcast %23 : vector<16x1xf32> to vector<16x512xf32>
    %27 = arith.addf %25, %26 : vector<16x512xf32>
    %cst_13 = arith.constant 0.000000e+00 : f32
    %28 = vector.broadcast %cst_13 : f32 to vector<16x512xf32>
    %29 = arith.cmpf ogt, %27, %28 : vector<16x512xf32>
    %cst_14 = arith.constant 1.000000e-01 : f32
    %30 = vector.broadcast %cst_14 : f32 to vector<16x512xf32>
    %31 = arith.mulf %30, %27 : vector<16x512xf32>
    %32 = arith.select %29, %27, %31 : vector<16x512xi1>, vector<16x512xf32>
    %c0_15 = arith.constant 0 : index
    %c0_16 = arith.constant 0 : index
    %33 = vector.load %arg5[%c0_15, %c0_16] : memref<21x16xbf16, #tpu.memory_space<vmem>>, vector<21x16xbf16>
    %34 = arith.truncf %32 : vector<16x512xf32> to vector<16x512xbf16>
    %cst_17 = arith.constant dense<0.000000e+00> : vector<21x512xf32>
    %35 = tpu.matmul %33, %34, %cst_17 {dimension_numbers = #tpu.dot_dimension_numbers<[1], [0], [0], [1], [0, 0, 1, 1], [], []>} : vector<21x16xbf16>, vector<16x512xbf16>, vector<21x512xf32> -> vector<21x512xf32>
    %c0_18 = arith.constant 0 : index
    %c0_19 = arith.constant 0 : index
    %36 = vector.load %arg6[%c0_18, %c0_19] : memref<21x1xf32, #tpu.memory_space<vmem>>, vector<21x1xf32>
    %37 = vector.broadcast %36 : vector<21x1xf32> to vector<21x512xf32>
    %38 = arith.addf %35, %37 : vector<21x512xf32>
    %c0_20 = arith.constant 0 : index
    %c0_21 = arith.constant 0 : index
    %39 = vector.load %arg7[%c0_20, %c0_21] : memref<21x1xf32, #tpu.memory_space<vmem>>, vector<21x1xf32>
    %c0_22 = arith.constant 0 : index
    %c0_23 = arith.constant 0 : index
    %40 = vector.load %arg8[%c0_22, %c0_23] : memref<21x512xf32, #tpu.memory_space<vmem>>, vector<21x512xf32>
    %c0_24 = arith.constant 0 : index
    %c0_25 = arith.constant 0 : index
    %41 = vector.load %arg9[%c0_24, %c0_25] : memref<21x1xf32, #tpu.memory_space<vmem>>, vector<21x1xf32>
    %c0_26 = arith.constant 0 : index
    %c0_27 = arith.constant 0 : index
    %42 = vector.load %arg10[%c0_26, %c0_27] : memref<21x1xf32, #tpu.memory_space<vmem>>, vector<21x1xf32>
    %cst_28 = arith.constant 5.000000e-01 : f32
    %43 = vector.broadcast %cst_28 : f32 to vector<21x1xf32>
    %44 = arith.cmpf ogt, %42, %43 : vector<21x1xf32>
    %45 = math.exp %38 : vector<21x512xf32>
    %46 = arith.negf %38 : vector<21x512xf32>
    %47 = math.exp %46 : vector<21x512xf32>
    %cst_29 = arith.constant 1.000000e+00 : f32
    %48 = vector.broadcast %cst_29 : f32 to vector<21x512xf32>
    %49 = arith.addf %48, %47 : vector<21x512xf32>
    %50 = arith.divf %48, %49 : vector<21x512xf32>
    %51 = vector.shape_cast %44 : vector<21x1xi1> to vector<21x1xi1>
    %52 = vector.broadcast %51 : vector<21x1xi1> to vector<21x512xi1>
    %53 = arith.select %52, %45, %50 : vector<21x512xi1>, vector<21x512xf32>
    %54 = vector.broadcast %39 : vector<21x1xf32> to vector<21x512xf32>
    %55 = arith.mulf %53, %54 : vector<21x512xf32>
    %56 = arith.addf %55, %40 : vector<21x512xf32>
    %57 = vector.broadcast %41 : vector<21x1xf32> to vector<21x512xf32>
    %58 = arith.mulf %56, %57 : vector<21x512xf32>
    %c0_30 = arith.constant 0 : index
    %c0_31 = arith.constant 0 : index
    %59 = vector.load %arg11[%c0_30, %c0_31] : memref<21x512xf32, #tpu.memory_space<vmem>>, vector<21x512xf32>
    tpu.vector_store %arg11[%c0_30, %c0_31], %58 {strides = array<i32>} : memref<21x512xf32, #tpu.memory_space<vmem>>, vector<21x512xf32>,
    return
  }
  func.func @transform_0(%arg0: i32) -> (i32, i32) {
    %c0_i32 = arith.constant 0 : i32
    %c0_i32_0 = arith.constant 0 : i32
    %c0_i32_1 = arith.constant 0 : i32
    return %c0_i32, %c0_i32_0 : i32, i32
  }
  func.func @transform_1(%arg0: i32) -> (i32, i32) {
    %c0_i32 = arith.constant 0 : i32
    %c0_i32_0 = arith.constant 0 : i32
    %c0_i32_1 = arith.constant 0 : i32
    return %c0_i32, %c0_i32_0 : i32, i32
  }
  func.func @transform_2(%arg0: i32) -> (i32, i32) {
    %c0_i32 = arith.constant 0 : i32
    %c0_i32_0 = arith.constant 0 : i32
    %c0_i32_1 = arith.constant 0 : i32
    return %c0_i32, %c0_i32_0 : i32, i32
  }
  func.func @transform_3(%arg0: i32) -> (i32, i32) {
    %c0_i32 = arith.constant 0 : i32
    %c0_i32_0 = arith.constant 0 : i32
    %c0_i32_1 = arith.constant 0 : i32
    return %c0_i32, %c0_i32_0 : i32, i32
  }
  func.func @transform_4(%arg0: i32) -> (i32, i32) {
    %c0_i32 = arith.constant 0 : i32
    %c0_i32_0 = arith.constant 0 : i32
    %c0_i32_1 = arith.constant 0 : i32
    return %c0_i32, %c0_i32_0 : i32, i32
  }
  func.func @transform_5(%arg0: i32) -> (i32, i32) {
    %c0_i32 = arith.constant 0 : i32
    %c0_i32_0 = arith.constant 0 : i32
    %c0_i32_1 = arith.constant 0 : i32
    return %c0_i32, %c0_i32_0 : i32, i32
  }
  func.func @transform_6(%arg0: i32) -> (i32, i32) {
    %c0_i32 = arith.constant 0 : i32
    %c0_i32_0 = arith.constant 0 : i32
    %c0_i32_1 = arith.constant 0 : i32
    return %c0_i32, %c0_i32_0 : i32, i32
  }
  func.func @transform_7(%arg0: i32) -> (i32, i32) {
    %c0_i32 = arith.constant 0 : i32
    %c0_i32_0 = arith.constant 0 : i32
    %c0_i32_1 = arith.constant 0 : i32
    return %c0_i32, %c0_i32_0 : i32, i32
  }
  func.func @transform_8(%arg0: i32) -> (i32, i32) {
    %c0_i32 = arith.constant 0 : i32
    %c0_i32_0 = arith.constant 0 : i32
    %c0_i32_1 = arith.constant 0 : i32
    return %c0_i32, %c0_i32_0 : i32, i32
  }
  func.func @transform_9(%arg0: i32) -> (i32, i32) {
    %c0_i32 = arith.constant 0 : i32
    %c0_i32_0 = arith.constant 0 : i32
    %c0_i32_1 = arith.constant 0 : i32
    return %c0_i32, %c0_i32_0 : i32, i32
  }
  func.func @transform_10(%arg0: i32) -> (i32, i32) {
    %c0_i32 = arith.constant 0 : i32
    %c0_i32_0 = arith.constant 0 : i32
    %c0_i32_1 = arith.constant 0 : i32
    return %c0_i32, %c0_i32_0 : i32, i32
  }
}

module attributes {stable_mosaic.version = 11 : i64} {
  func.func @_conv_conv_yolo_kernel(%arg0: i32, %arg1: memref<144x32xbf16, #tpu.memory_space<vmem>>, %arg2: memref<16x144xbf16, #tpu.memory_space<vmem>>, %arg3: memref<16x1xf32, #tpu.memory_space<vmem>>, %arg4: memref<16x1xf32, #tpu.memory_space<vmem>>, %arg5: memref<21x16xbf16, #tpu.memory_space<vmem>>, %arg6: memref<21x1xf32, #tpu.memory_space<vmem>>, %arg7: memref<21x1xf32, #tpu.memory_space<vmem>>, %arg8: memref<21x32xf32, #tpu.memory_space<vmem>>, %arg9: memref<21x1xf32, #tpu.memory_space<vmem>>, %arg10: memref<21x1xf32, #tpu.memory_space<vmem>>, %arg11: memref<21x32xf32, #tpu.memory_space<vmem>>) attributes {dimension_semantics = [#tpu.dimension_semantics<arbitrary>], iteration_bounds = array<i64: 1>, scalar_prefetch = 0 : i64, scratch_operands = 0 : i64, tpu.core_type = #tpu.core_type<tc>, window_params = [{pipeline_mode = #tpu.pipeline_mode<synchronous>, transform_indices = @transform_0, window_bounds = array<i64: 144, 32>}, {pipeline_mode = #tpu.pipeline_mode<synchronous>, transform_indices = @transform_1, window_bounds = array<i64: 16, 144>}, {pipeline_mode = #tpu.pipeline_mode<synchronous>, transform_indices = @transform_2, window_bounds = array<i64: 16, 1>}, {pipeline_mode = #tpu.pipeline_mode<synchronous>, transform_indices = @transform_3, window_bounds = array<i64: 16, 1>}, {pipeline_mode = #tpu.pipeline_mode<synchronous>, transform_indices = @transform_4, window_bounds = array<i64: 21, 16>}, {pipeline_mode = #tpu.pipeline_mode<synchronous>, transform_indices = @transform_5, window_bounds = array<i64: 21, 1>}, {pipeline_mode = #tpu.pipeline_mode<synchronous>, transform_indices = @transform_6, window_bounds = array<i64: 21, 1>}, {pipeline_mode = #tpu.pipeline_mode<synchronous>, transform_indices = @transform_7, window_bounds = array<i64: 21, 32>}, {pipeline_mode = #tpu.pipeline_mode<synchronous>, transform_indices = @transform_8, window_bounds = array<i64: 21, 1>}, {pipeline_mode = #tpu.pipeline_mode<synchronous>, transform_indices = @transform_9, window_bounds = array<i64: 21, 1>}, {pipeline_mode = #tpu.pipeline_mode<synchronous>, transform_indices = @transform_10, window_bounds = array<i64: 21, 32>}]} {
    %c0 = arith.constant 0 : index
    %c0_0 = arith.constant 0 : index
    %0 = vector.load %arg2[%c0, %c0_0] : memref<16x144xbf16, #tpu.memory_space<vmem>>, vector<16x144xbf16>
    %c0_1 = arith.constant 0 : index
    %c0_2 = arith.constant 0 : index
    %1 = vector.load %arg1[%c0_1, %c0_2] : memref<144x32xbf16, #tpu.memory_space<vmem>>, vector<144x32xbf16>
    %cst = arith.constant dense<0.000000e+00> : vector<16x32xf32>
    %2 = tpu.matmul %0, %1, %cst {dimension_numbers = #tpu.dot_dimension_numbers<[1], [0], [0], [1], [0, 0, 1, 1], [], []>} : vector<16x144xbf16>, vector<144x32xbf16>, vector<16x32xf32> -> vector<16x32xf32>
    %c0_3 = arith.constant 0 : index
    %c0_4 = arith.constant 0 : index
    %3 = vector.load %arg3[%c0_3, %c0_4] : memref<16x1xf32, #tpu.memory_space<vmem>>, vector<16x1xf32>
    %c0_5 = arith.constant 0 : index
    %c0_6 = arith.constant 0 : index
    %4 = vector.load %arg4[%c0_5, %c0_6] : memref<16x1xf32, #tpu.memory_space<vmem>>, vector<16x1xf32>
    %cst_7 = arith.constant dense<0.000000e+00> : vector<16xf32>
    %5 = vector.multi_reduction <add>, %2, %cst_7 [1] : vector<16x32xf32> to vector<16xf32>
    %6 = vector.shape_cast %5 : vector<16xf32> to vector<16x1xf32>
    %cst_8 = arith.constant 3.125000e-02 : f32
    %7 = vector.broadcast %cst_8 : f32 to vector<16x1xf32>
    %8 = arith.mulf %6, %7 : vector<16x1xf32>
    %9 = arith.mulf %2, %2 : vector<16x32xf32>
    %cst_9 = arith.constant dense<0.000000e+00> : vector<16xf32>
    %10 = vector.multi_reduction <add>, %9, %cst_9 [1] : vector<16x32xf32> to vector<16xf32>
    %11 = vector.shape_cast %10 : vector<16xf32> to vector<16x1xf32>
    %cst_10 = arith.constant 3.125000e-02 : f32
    %12 = vector.broadcast %cst_10 : f32 to vector<16x1xf32>
    %13 = arith.mulf %11, %12 : vector<16x1xf32>
    %14 = arith.mulf %8, %8 : vector<16x1xf32>
    %15 = arith.subf %13, %14 : vector<16x1xf32>
    %cst_11 = arith.constant 0.000000e+00 : f32
    %16 = vector.broadcast %cst_11 : f32 to vector<16x1xf32>
    %17 = arith.maximumf %15, %16 : vector<16x1xf32>
    %cst_12 = arith.constant 9.99999974E-6 : f32
    %18 = vector.broadcast %cst_12 : f32 to vector<16x1xf32>
    %19 = arith.addf %17, %18 : vector<16x1xf32>
    %20 = math.rsqrt %19 : vector<16x1xf32>
    %21 = arith.mulf %3, %20 : vector<16x1xf32>
    %22 = arith.mulf %8, %21 : vector<16x1xf32>
    %23 = arith.subf %4, %22 : vector<16x1xf32>
    %24 = vector.broadcast %21 : vector<16x1xf32> to vector<16x32xf32>
    %25 = arith.mulf %2, %24 : vector<16x32xf32>
    %26 = vector.broadcast %23 : vector<16x1xf32> to vector<16x32xf32>
    %27 = arith.addf %25, %26 : vector<16x32xf32>
    %cst_13 = arith.constant 0.000000e+00 : f32
    %28 = vector.broadcast %cst_13 : f32 to vector<16x32xf32>
    %29 = arith.cmpf ogt, %27, %28 : vector<16x32xf32>
    %cst_14 = arith.constant 1.000000e-01 : f32
    %30 = vector.broadcast %cst_14 : f32 to vector<16x32xf32>
    %31 = arith.mulf %30, %27 : vector<16x32xf32>
    %32 = arith.select %29, %27, %31 : vector<16x32xi1>, vector<16x32xf32>
    %c0_15 = arith.constant 0 : index
    %c0_16 = arith.constant 0 : index
    %33 = vector.load %arg5[%c0_15, %c0_16] : memref<21x16xbf16, #tpu.memory_space<vmem>>, vector<21x16xbf16>
    %34 = arith.truncf %32 : vector<16x32xf32> to vector<16x32xbf16>
    %cst_17 = arith.constant dense<0.000000e+00> : vector<21x32xf32>
    %35 = tpu.matmul %33, %34, %cst_17 {dimension_numbers = #tpu.dot_dimension_numbers<[1], [0], [0], [1], [0, 0, 1, 1], [], []>} : vector<21x16xbf16>, vector<16x32xbf16>, vector<21x32xf32> -> vector<21x32xf32>
    %c0_18 = arith.constant 0 : index
    %c0_19 = arith.constant 0 : index
    %36 = vector.load %arg6[%c0_18, %c0_19] : memref<21x1xf32, #tpu.memory_space<vmem>>, vector<21x1xf32>
    %37 = vector.broadcast %36 : vector<21x1xf32> to vector<21x32xf32>
    %38 = arith.addf %35, %37 : vector<21x32xf32>
    %c0_20 = arith.constant 0 : index
    %c0_21 = arith.constant 0 : index
    %39 = vector.load %arg7[%c0_20, %c0_21] : memref<21x1xf32, #tpu.memory_space<vmem>>, vector<21x1xf32>
    %c0_22 = arith.constant 0 : index
    %c0_23 = arith.constant 0 : index
    %40 = vector.load %arg8[%c0_22, %c0_23] : memref<21x32xf32, #tpu.memory_space<vmem>>, vector<21x32xf32>
    %c0_24 = arith.constant 0 : index
    %c0_25 = arith.constant 0 : index
    %41 = vector.load %arg9[%c0_24, %c0_25] : memref<21x1xf32, #tpu.memory_space<vmem>>, vector<21x1xf32>
    %c0_26 = arith.constant 0 : index
    %c0_27 = arith.constant 0 : index
    %42 = vector.load %arg10[%c0_26, %c0_27] : memref<21x1xf32, #tpu.memory_space<vmem>>, vector<21x1xf32>
    %cst_28 = arith.constant 5.000000e-01 : f32
    %43 = vector.broadcast %cst_28 : f32 to vector<21x1xf32>
    %44 = arith.cmpf ogt, %42, %43 : vector<21x1xf32>
    %45 = math.exp %38 : vector<21x32xf32>
    %46 = arith.negf %38 : vector<21x32xf32>
    %47 = math.exp %46 : vector<21x32xf32>
    %cst_29 = arith.constant 1.000000e+00 : f32
    %48 = vector.broadcast %cst_29 : f32 to vector<21x32xf32>
    %49 = arith.addf %48, %47 : vector<21x32xf32>
    %50 = arith.divf %48, %49 : vector<21x32xf32>
    %51 = vector.shape_cast %44 : vector<21x1xi1> to vector<21x1xi1>
    %52 = vector.broadcast %51 : vector<21x1xi1> to vector<21x32xi1>
    %53 = arith.select %52, %45, %50 : vector<21x32xi1>, vector<21x32xf32>
    %54 = vector.broadcast %39 : vector<21x1xf32> to vector<21x32xf32>
    %55 = arith.mulf %53, %54 : vector<21x32xf32>
    %56 = arith.addf %55, %40 : vector<21x32xf32>
    %57 = vector.broadcast %41 : vector<21x1xf32> to vector<21x32xf32>
    %58 = arith.mulf %56, %57 : vector<21x32xf32>
    %c0_30 = arith.constant 0 : index
    %c0_31 = arith.constant 0 : index
    %59 = vector.load %arg11[%c0_30, %c0_31] : memref<21x32xf32, #tpu.memory_space<vmem>>, vector<21x32xf32>
    tpu.vector_store %arg11[%c0_30, %c0_31], %58 {strides = array<i32>} : memref<21x32xf32, #tpu.memory_space<vmem>>, vector<21x32xf32>,
    return
  }
  func.func @transform_0(%arg0: i32) -> (i32, i32) {
    %c0_i32 = arith.constant 0 : i32
    %c0_i32_0 = arith.constant 0 : i32
    %c0_i32_1 = arith.constant 0 : i32
    return %c0_i32, %c0_i32_0 : i32, i32
  }
  func.func @transform_1(%arg0: i32) -> (i32, i32) {
    %c0_i32 = arith.constant 0 : i32
    %c0_i32_0 = arith.constant 0 : i32
    %c0_i32_1 = arith.constant 0 : i32
    return %c0_i32, %c0_i32_0 : i32, i32
  }
  func.func @transform_2(%arg0: i32) -> (i32, i32) {
    %c0_i32 = arith.constant 0 : i32
    %c0_i32_0 = arith.constant 0 : i32
    %c0_i32_1 = arith.constant 0 : i32
    return %c0_i32, %c0_i32_0 : i32, i32
  }
  func.func @transform_3(%arg0: i32) -> (i32, i32) {
    %c0_i32 = arith.constant 0 : i32
    %c0_i32_0 = arith.constant 0 : i32
    %c0_i32_1 = arith.constant 0 : i32
    return %c0_i32, %c0_i32_0 : i32, i32
  }
  func.func @transform_4(%arg0: i32) -> (i32, i32) {
    %c0_i32 = arith.constant 0 : i32
    %c0_i32_0 = arith.constant 0 : i32
    %c0_i32_1 = arith.constant 0 : i32
    return %c0_i32, %c0_i32_0 : i32, i32
  }
  func.func @transform_5(%arg0: i32) -> (i32, i32) {
    %c0_i32 = arith.constant 0 : i32
    %c0_i32_0 = arith.constant 0 : i32
    %c0_i32_1 = arith.constant 0 : i32
    return %c0_i32, %c0_i32_0 : i32, i32
  }
  func.func @transform_6(%arg0: i32) -> (i32, i32) {
    %c0_i32 = arith.constant 0 : i32
    %c0_i32_0 = arith.constant 0 : i32
    %c0_i32_1 = arith.constant 0 : i32
    return %c0_i32, %c0_i32_0 : i32, i32
  }
  func.func @transform_7(%arg0: i32) -> (i32, i32) {
    %c0_i32 = arith.constant 0 : i32
    %c0_i32_0 = arith.constant 0 : i32
    %c0_i32_1 = arith.constant 0 : i32
    return %c0_i32, %c0_i32_0 : i32, i32
  }
  func.func @transform_8(%arg0: i32) -> (i32, i32) {
    %c0_i32 = arith.constant 0 : i32
    %c0_i32_0 = arith.constant 0 : i32
    %c0_i32_1 = arith.constant 0 : i32
    return %c0_i32, %c0_i32_0 : i32, i32
  }
  func.func @transform_9(%arg0: i32) -> (i32, i32) {
    %c0_i32 = arith.constant 0 : i32
    %c0_i32_0 = arith.constant 0 : i32
    %c0_i32_1 = arith.constant 0 : i32
    return %c0_i32, %c0_i32_0 : i32, i32
  }
  func.func @transform_10(%arg0: i32) -> (i32, i32) {
    %c0_i32 = arith.constant 0 : i32
    %c0_i32_0 = arith.constant 0 : i32
    %c0_i32_1 = arith.constant 0 : i32
    return %c0_i32, %c0_i32_0 : i32, i32
  }
}

</mosaic_0001>

<bundles_post_ra>
// kernel: darknet_forward.5
= control target key start
LH: loop header
LB: loop body
LE: loop exit
PB: predicated region body
PF: predicated region fallthrough
CT: control target
= control target key end

     0   :  { %vm67_vm0 = vcmask 261120   ;;  %v245_v43 = vmov 0   ;;  %s334_s0 = inlined_call_operand.vmem [shape: bf16[32,512], index: 0, kind: input, shape index: {}]   ;;  %s335_s1 = inlined_call_operand.vmem [shape: bf16[8,32], index: 1, kind: input, shape index: {}]   ;;  %s336_s2 = inlined_call_operand.vmem [shape: f32[8,1], index: 2, kind: input, shape index: {}]   ;;  %s337_s3 = inlined_call_operand.vmem [shape: f32[8,1], index: 3, kind: input, shape index: {}]   ;;  %s338_s4 = inlined_call_operand.vmem [shape: bf16[8,512], index: 4, kind: output, shape index: {}]  }
   0x1   :  { %v214_v0 = vld [vmem:[%s334_s0 + $0x20] sm:$0xf]  ;;  %v238_v1 = vld [vmem:[%s334_s0 + $0x2c] sm:$0xf0]  ;;  %v236_v2 = vld [vmem:[%s334_s0 + $0x24] sm:$0xf]  ;;  %241 = vset.pattern.permute.xlu1 %v245_v43  ;;  %242 = vset.pattern.permute.xlu0 %v245_v43 }
   0x2   :  { %v215_v3 = vor.u32 %v238_v1, %v214_v0  ;;  %v216_v4 = vld [vmem:[%s334_s0 + $0x30] sm:$0xf0]  ;;  %v222_v5 = vld [vmem:[%s334_s0 + $0x28] sm:$0xf]  ;;  %v239_v6 = vld [vmem:[%s334_s0 + $0x34] sm:$0xf0] }
   0x3   :  { %v219_v7 = vor.u32 %v236_v2, %v216_v4  ;;  %v223_v8 = vor.u32 %v239_v6, %v222_v5  ;;  %v237_v9 = vld [vmem:[%s334_s0 + $0x2c] sm:$0xf]  ;;  %v224_v10 = vld [vmem:[%s334_s0 + $0x38] sm:$0xf0]  ;;  %v198_v11 = vld [vmem:[%s334_s0] sm:$0xf] }
   0x4   :  { %77 = vmatpush.bf16.msra.mxu0 %v215_v3  ;;  %v227_v12 = vor.u32 %v237_v9, %v224_v10  ;;  %v234_v13 = vld [vmem:[%s334_s0 + $0xc] sm:$0xf0]  ;;  %v232_v14 = vld [vmem:[%s334_s0 + $0x4] sm:$0xf]  ;;  %v200_v15 = vld [vmem:[%s334_s0 + $0x10] sm:$0xf0] }
   0x5   :  { %90 = vmatpush.bf16.msra.mxu1 %v219_v7  ;;  %103 = vmatpush.bf16.msra.mxu2 %v223_v8  ;;  %v199_v16 = vor.u32 %v234_v13, %v198_v11  ;;  %v203_v17 = vor.u32 %v232_v14, %v200_v15  ;;  %v206_v18 = vld [vmem:[%s334_s0 + $0x8] sm:$0xf]  ;;  %v235_v19 = vld [vmem:[%s334_s0 + $0x14] sm:$0xf0]  ;;  %v233_v20 = vld [vmem:[%s334_s0 + $0xc] sm:$0xf] }
   0x6   :  { %116 = vmatpush.bf16.msra.mxu3 %v227_v12  ;;  %v207_v21 = vor.u32 %v235_v19, %v206_v18  ;;  %v208_v22 = vld [vmem:[%s334_s0 + $0x18] sm:$0xf0]  ;;  %v18_v24 = vld [vmem:[%s335_s1] sm:$0xf] }
   0x7   :  { %v211_v23 = vor.u32 %v233_v20, %v208_v22  ;;  %v123_v57 = vld [vmem:[%s336_s2] sm:$0xff] }
   0x8   :  { %78 = vmatpush.bf16.msra.mxu0 %v199_v16  ;;  %v124_v62 = vld [vmem:[%s337_s3] sm:$0xff] }
   0x9   :  { %91 = vmatpush.bf16.msra.mxu1 %v203_v17  ;;  %104 = vmatpush.bf16.msra.mxu2 %v207_v21 }
   0xa   :  { %117 = vmatpush.bf16.msra.mxu3 %v211_v23 }
   0xb   :  { %228 = vmatmul.msk.bf16.vlgmr.msra.gmra.mxu0 %vm67_vm0, %v18_v24 }
   0xc   :  { %229 = vmatmul.msk.bf16.vlgmr.msra.gmra.mxu1 %vm67_vm0, %v18_v24  ;;  %230 = vmatmul.msk.bf16.vlgmr.msra.gmra.mxu2 %vm67_vm0, %v18_v24 }
   0xd   :  { %231 = vmatmul.msk.bf16.vlgmr.msra.gmra.mxu3 %vm67_vm0, %v18_v24 }
  0x88   :  { %v80_v25 = vpop.f32.mrf.mxu0 }
  0x89   :  { %v93_v26 = vpop.f32.mrf.mxu1  ;;  %v131_v28 = vmul.f32 %v80_v25, %v80_v25 }
  0x8a   :  { %v125_v27 = vadd.f32 %v93_v26, %v80_v25  ;;  %v132_v29 = vmul.f32 %v93_v26, %v93_v26 }
  0x8c   :  { %v135_v37 = vadd.f32 %v132_v29, %v131_v28 }
  0x8f   :  { %v106_v30 = vpop.f32.mrf.mxu2 }
  0x90   :  { %v119_v31 = vpop.f32.mrf.mxu3  ;;  %v82_v32 = vpop.f32.mrf.mxu0  ;;  %v126_v33 = vadd.f32 %v125_v27, %v106_v30  ;;  %v133_v35 = vmul.f32 %v106_v30, %v106_v30 }
  0x91   :  { %v95_v34 = vpop.f32.mrf.mxu1  ;;  %v134_v38 = vmul.f32 %v119_v31, %v119_v31 }
  0x92   :  { %v127_v36 = vadd.f32 %v126_v33, %v119_v31  ;;  %v136_v39 = vadd.f32 %v135_v37, %v133_v35 }
  0x94   :  { %128 = vadd.xlane.f32.xlu0 %v127_v36  ;;  %v137_v42 = vadd.f32 %v136_v39, %v134_v38 }
  0x97   :  { %v108_v40 = vpop.f32.mrf.mxu2 }
  0x98   :  { %v121_v41 = vpop.f32.mrf.mxu3 }
  0x9c   :  { %138 = vadd.xlane.f32.xlu0 %v137_v42 }
 0x107   :  { %v129_v44 = vpop.xlane.xlu0 %128 }
 0x108   :  { %v130_v45 = vmul.f32 0.001953125, %v129_v44 }
 0x10a   :  { %v141_v47 = vmul.f32 %v130_v45, %v130_v45 }
 0x10f   :  { %v139_v46 = vpop.xlane.xlu0 %138 }
 0x110   :  { %v140_v48 = vmul.f32 0.001953125, %v139_v46 }
 0x112   :  { %v142_v49 = vsub.f32 %v140_v48, %v141_v47 }
 0x114   :  { %v143_v50 = vmax.f32 %v142_v49, 0.0 }
 0x116   :  { %v144_v51 = vadd.f32 1e-05, %v143_v50 }
 0x118   :  { %243 = vrsqrt.f32 %v144_v51  ;;  %vm151_vm2 = vweird.f32 %v144_v51 }
 0x11e   :  { %v244_v52 = vpop.eup %243 }
 0x11f   :  { %v146_v53 = vmul.f32 %v244_v52, %v144_v51  ;;  %vm152_vm1 = vweird.f32 %v244_v52 }
 0x120   :  { %vm153_vm3 = vmor %vm151_vm2, %vm152_vm1 }
 0x121   :  { %v147_v54 = vmul.f32 %v244_v52, %v146_v53 }
 0x123   :  { %v148_v55 = vmul.f32 0.5, %v147_v54 }
 0x125   :  { %v149_v56 = vsub.f32 1.5, %v148_v55 }
 0x127   :  { %v150_v58 = vmul.f32 %v244_v52, %v149_v56 }
 0x129   :  { %v154_v59 = vsel %vm153_vm3, %v244_v52, %v150_v58 }
 0x12a   :  { %v155_v60 = vmul.f32 %v154_v59, %v123_v57 }
 0x12c   :  { %160 = vperm.xlu1 %241, %v155_v60   ;;  %v156_v61 = vmul.f32 %v155_v60, %v130_v45 }
 0x12e   :  { %v157_v63 = vsub.f32 %v124_v62, %v156_v61 }
 0x134   :  { %169 = vperm.xlu1 %241, %v157_v63  }
 0x19e   :  { %v161_v0 = vpop.permute.xlu1 %160 }
 0x19f   :  { %v163_v1 = vmul.f32 %v161_v0, %v80_v25  ;;  %v164_v2 = vmul.f32 %v161_v0, %v93_v26  ;;  %v165_v3 = vmul.f32 %v161_v0, %v106_v30  ;;  %v166_v4 = vmul.f32 %v161_v0, %v119_v31 }
 0x1a6   :  { %v170_v5 = vpop.permute.xlu1 %169 }
 0x1a7   :  { %v172_v6 = vadd.f32 %v170_v5, %v163_v1  ;;  %v173_v7 = vadd.f32 %v170_v5, %v164_v2  ;;  %v174_v8 = vadd.f32 %v170_v5, %v165_v3  ;;  %v175_v9 = vadd.f32 %v170_v5, %v166_v4 }
 0x1a9   :  { %vm176_vm4 = vcmp.gt.f32.partialorder %v172_v6, 0.0  ;;  %vm177_vm5 = vcmp.gt.f32.partialorder %v173_v7, 0.0  ;;  %vm178_vm6 = vcmp.gt.f32.partialorder %v174_v8, 0.0  ;;  %vm179_vm7 = vcmp.gt.f32.partialorder %v175_v9, 0.0 }
 0x1aa   :  { %v180_v10 = vmul.f32 0.1, %v172_v6  ;;  %v181_v11 = vmul.f32 0.1, %v173_v7  ;;  %v182_v12 = vmul.f32 0.1, %v174_v8 }
 0x1ab   :  { %v183_v13 = vmul.f32 0.1, %v175_v9 }
 0x1ac   :  { %v184_v14 = vsel %vm176_vm4, %v172_v6, %v180_v10  ;;  %v185_v15 = vsel %vm177_vm5, %v173_v7, %v181_v11  ;;  %v186_v16 = vsel %vm178_vm6, %v174_v8, %v182_v12 }
 0x1ad   :  { %v187_v17 = vsel %vm179_vm7, %v175_v9, %v183_v13  ;;  %v188_v18 = vpack.c.bf16 %v185_v15, %v184_v14 }
 0x1ae   :  { %v189_v19 = vpack.c.bf16 %v187_v17, %v186_v16 }
 0x1af   :  { %190 = vst [vmem:[%s338_s4] sm:$0xff] %v188_v18 }
 0x1b0   :  { %191 = vst [vmem:[%s338_s4 + $0x8] sm:$0xff] %v189_v19 }

// kernel: darknet_forward.6
= control target key start
LH: loop header
LB: loop body
LE: loop exit
PB: predicated region body
PF: predicated region fallthrough
CT: control target
= control target key end

     0   :  { %vm74_vm0 = vcmask 1043456   ;;  %vm70_vm1 = vcmask 588800   ;;  %v341_v13 = vmov 0   ;;  %vm182_vm10 = vcmask 130048   ;;  %s462_s0 = inlined_call_operand.vmem [shape: bf16[72,128], index: 0, kind: input, shape index: {}]   ;;  %s463_s1 = inlined_call_operand.vmem [shape: bf16[16,72], index: 1, kind: input, shape index: {}]   ;;  %s464_s2 = inlined_call_operand.vmem [shape: f32[16,1], index: 2, kind: input, shape index: {}]   ;;  %s465_s3 = inlined_call_operand.vmem [shape: f32[16,1], index: 3, kind: input, shape index: {}]   ;;  %s466_s4 = inlined_call_operand.vmem [shape: bf16[16,16], index: 4, kind: input, shape index: {}]   ;;  %s467_s5 = inlined_call_operand.vmem [shape: f32[16,1], index: 5, kind: input, shape index: {}]   ;;  %s468_s6 = inlined_call_operand.vmem [shape: f32[16,1], index: 6, kind: input, shape index: {}]   ;;  %s469_s7 = inlined_call_operand.vmem [shape: bf16[16,128], index: 7, kind: output, shape index: {}]  }
   0x1   :  { %v37_v0 = vld [vmem:[%s462_s0 + $0x20] sm:$0xf]  ;;  %v322_v4 = vld [vmem:[%s462_s0 + $0x18] sm:$0xff]  ;;  %v321_v5 = vld [vmem:[%s462_s0 + $0x10] sm:$0xff]  ;;  %330 = vset.pattern.permute.xlu2 %v341_v13  ;;  %331 = vset.pattern.permute.xlu0 %v341_v13 }
   0x2   :  { %v60_v1 = vunpack.c.l.b16 %v37_v0  ;;  %v320_v6 = vld [vmem:[%s462_s0 + $0x8] sm:$0xff]  ;;  %v319_v7 = vld [vmem:[%s462_s0] sm:$0xff]  ;;  %332 = vset.pattern.permute.xlu1 %v341_v13 }
   0x3   :  { %v318_v8 = vld [vmem:[%s463_s1] sm:$0xff]  ;;  %v93_v47 = vld [vmem:[%s464_s2 + $0x8] sm:$0xff] }
   0x4   :  { %v65_v2 = vpack.c.b16 %v60_v1, %v60_v1  ;;  %v92_v37 = vld [vmem:[%s464_s2] sm:$0xff]  ;;  %v95_v51 = vld [vmem:[%s465_s3 + $0x8] sm:$0xff] }
   0x5   :  { %v94_v43 = vld [vmem:[%s465_s3] sm:$0xff] }
   0x6   :  { %v76_v3 = vsel %vm74_vm0, %v65_v2, 0 }
   0x7   :  { %81 = vmatpush.bf16.msra.mxu0 %v76_v3  ;;  %v323_v3 = vld [vmem:[%s466_s4] sm:$0xff] }
   0xb   :  { %82 = vmatpush.bf16.msra.mxu0 %v322_v4 }
   0xf   :  { %83 = vmatpush.bf16.msra.mxu0 %v321_v5 }
  0x13   :  { %84 = vmatpush.bf16.msra.mxu0 %v320_v6 }
  0x17   :  { %85 = vmatpush.bf16.msra.mxu0 %v319_v7 }
  0x1a   :  { %312 = vmatmul.msk.bf16.vlgmr.msra.gmra.mxu0 %vm70_vm1, %v318_v8 }
  0x97   :  { %v400_v9 = vpop.f32.mrf.mxu0 }
  0x98   :  { %96 = vadd.xlane.f32.xlu0 %v400_v9  ;;  %v102_v10 = vmul.f32 %v400_v9, %v400_v9 }
  0x9a   :  { %104 = vadd.xlane.f32.xlu1 %v102_v10 }
  0x9f   :  { %v405_v11 = vpop.f32.mrf.mxu0 }
  0xa0   :  { %98 = vadd.xlane.f32.xlu0 %v405_v11  ;;  %v103_v12 = vmul.f32 %v405_v11, %v405_v11 }
  0xa2   :  { %106 = vadd.xlane.f32.xlu1 %v103_v12 }
 0x10b   :  { %v97_v14 = vpop.xlane.xlu0 %96 }
 0x10c   :  { %v100_v15 = vmul.f32 0.0078125, %v97_v14 }
 0x10d   :  { %v105_v16 = vpop.xlane.xlu1 %104 }
 0x10e   :  { %v110_v17 = vmul.f32 %v100_v15, %v100_v15  ;;  %v108_v18 = vmul.f32 0.0078125, %v105_v16 }
 0x110   :  { %v112_v19 = vsub.f32 %v108_v18, %v110_v17 }
 0x112   :  { %v114_v20 = vmax.f32 %v112_v19, 0.0 }
 0x113   :  { %v99_v21 = vpop.xlane.xlu0 %98 }
 0x114   :  { %v116_v22 = vadd.f32 1e-05, %v114_v20  ;;  %v101_v23 = vmul.f32 0.0078125, %v99_v21 }
 0x115   :  { %v107_v24 = vpop.xlane.xlu1 %106 }
 0x116   :  { %333 = vrsqrt.f32 %v116_v22  ;;  %v111_v25 = vmul.f32 %v101_v23, %v101_v23  ;;  %v109_v26 = vmul.f32 0.0078125, %v107_v24  ;;  %vm124_vm3 = vweird.f32 %v116_v22 }
 0x118   :  { %v113_v27 = vsub.f32 %v109_v26, %v111_v25 }
 0x11a   :  { %v115_v28 = vmax.f32 %v113_v27, 0.0 }
 0x11c   :  { %v334_v29 = vpop.eup %333  ;;  %v117_v30 = vadd.f32 1e-05, %v115_v28 }
 0x11d   :  { %v119_v31 = vmul.f32 %v334_v29, %v116_v22  ;;  %vm125_vm2 = vweird.f32 %v334_v29 }
 0x11e   :  { %335 = vrsqrt.f32 %v117_v30  ;;  %vm126_vm4 = vmor %vm124_vm3, %vm125_vm2  ;;  %vm134_vm6 = vweird.f32 %v117_v30 }
 0x11f   :  { %v120_v32 = vmul.f32 %v334_v29, %v119_v31  ;;  %v200_v31 = vld [vmem:[%s467_s5] sm:$0xff] }
 0x121   :  { %v121_v33 = vmul.f32 0.5, %v120_v32 }
 0x123   :  { %v122_v34 = vsub.f32 1.5, %v121_v33 }
 0x124   :  { %v336_v35 = vpop.eup %335 }
 0x125   :  { %v129_v36 = vmul.f32 %v336_v35, %v117_v30  ;;  %v123_v38 = vmul.f32 %v334_v29, %v122_v34  ;;  %vm135_vm5 = vweird.f32 %v336_v35 }
 0x126   :  { %vm136_vm7 = vmor %vm134_vm6, %vm135_vm5 }
 0x127   :  { %v130_v39 = vmul.f32 %v336_v35, %v129_v36  ;;  %v127_v40 = vsel %vm126_vm4, %v334_v29, %v123_v38 }
 0x128   :  { %v138_v41 = vmul.f32 %v127_v40, %v92_v37  ;;  %v201_v40 = vld [vmem:[%s467_s5 + $0x8] sm:$0xff] }
 0x129   :  { %v131_v42 = vmul.f32 0.5, %v130_v39  ;;  %v202_v39 = vld [vmem:[%s468_s6] sm:$0xff] }
 0x12a   :  { %146 = vperm.xlu2 %330, %v138_v41   ;;  %v140_v44 = vmul.f32 %v138_v41, %v100_v15 }
 0x12b   :  { %v132_v45 = vsub.f32 1.5, %v131_v42 }
 0x12c   :  { %v142_v46 = vsub.f32 %v94_v43, %v140_v44 }
 0x12d   :  { %v133_v48 = vmul.f32 %v336_v35, %v132_v45 }
 0x12e   :  { %158 = vperm.xlu0 %331, %v142_v46   ;;  %v203_v46 = vld [vmem:[%s468_s6 + $0x8] sm:$0xff] }
 0x12f   :  { %v137_v49 = vsel %vm136_vm7, %v336_v35, %v133_v48 }
 0x130   :  { %v139_v50 = vmul.f32 %v137_v49, %v93_v47 }
 0x132   :  { %151 = vperm.xlu2 %330, %v139_v50   ;;  %v141_v52 = vmul.f32 %v139_v50, %v101_v23 }
 0x134   :  { %v143_v53 = vsub.f32 %v95_v51, %v141_v52 }
 0x136   :  { %163 = vperm.xlu1 %332, %v143_v53  }
 0x184   :  { %v147_v54 = vpop.permute.xlu2 %146 }
 0x185   :  { %v154_v56 = vmul.f32 %v147_v54, %v400_v9 }
 0x18c   :  { %v152_v57 = vpop.permute.xlu2 %151 }
 0x18d   :  { %v155_v59 = vmul.f32 %v152_v57, %v405_v11 }
 0x1a0   :  { %v159_v55 = vpop.permute.xlu0 %158 }
 0x1a1   :  { %v166_v58 = vadd.f32 %v159_v55, %v154_v56 }
 0x1a3   :  { %v170_v61 = vmul.f32 0.1, %v166_v58  ;;  %vm168_vm8 = vcmp.gt.f32.partialorder %v166_v58, 0.0 }
 0x1a5   :  { %v424_v0 = vsel %vm168_vm8, %v166_v58, %v170_v61 }
 0x1a8   :  { %v164_v60 = vpop.permute.xlu1 %163 }
 0x1a9   :  { %v167_v62 = vadd.f32 %v164_v60, %v155_v59 }
 0x1ab   :  { %v171_v63 = vmul.f32 0.1, %v167_v62  ;;  %vm169_vm9 = vcmp.gt.f32.partialorder %v167_v62, 0.0 }
 0x1ad   :  { %v426_v1 = vsel %vm169_vm9, %v167_v62, %v171_v63 }
 0x1ae   :  { %v176_v2 = vpack.c.bf16 %v426_v1, %v424_v0 }
 0x1b0   :  { %193 = vmatpush.bf16.msra.mxu1 %v176_v2 }
 0x1b3   :  { %317 = vmatmul.msk.bf16.vlgmr.msra.gmra.mxu1 %vm182_vm10, %v323_v3 }
 0x230   :  { %v433_v4 = vpop.f32.mrf.mxu1 }
 0x231   :  { %204 = vadd.xlane.f32.xlu2 %v433_v4  ;;  %v210_v5 = vmul.f32 %v433_v4, %v433_v4 }
 0x233   :  { %212 = vadd.xlane.f32.xlu0 %v210_v5 }
 0x238   :  { %v438_v6 = vpop.f32.mrf.mxu1 }
 0x239   :  { %206 = vadd.xlane.f32.xlu1 %v438_v6  ;;  %v211_v7 = vmul.f32 %v438_v6, %v438_v6 }
 0x23b   :  { %214 = vadd.xlane.f32.xlu2 %v211_v7 }
 0x2a4   :  { %v205_v8 = vpop.xlane.xlu2 %204 }
 0x2a5   :  { %v208_v9 = vmul.f32 0.0078125, %v205_v8 }
 0x2a6   :  { %v213_v10 = vpop.xlane.xlu0 %212 }
 0x2a7   :  { %v218_v11 = vmul.f32 %v208_v9, %v208_v9  ;;  %v216_v12 = vmul.f32 0.0078125, %v213_v10 }
 0x2a9   :  { %v220_v13 = vsub.f32 %v216_v12, %v218_v11 }
 0x2ab   :  { %v222_v14 = vmax.f32 %v220_v13, 0.0 }
 0x2ac   :  { %v207_v15 = vpop.xlane.xlu1 %206 }
 0x2ad   :  { %v224_v16 = vadd.f32 1e-05, %v222_v14  ;;  %v209_v17 = vmul.f32 0.0078125, %v207_v15 }
 0x2ae   :  { %v215_v18 = vpop.xlane.xlu2 %214 }
 0x2af   :  { %337 = vrsqrt.f32 %v224_v16  ;;  %v219_v19 = vmul.f32 %v209_v17, %v209_v17  ;;  %v217_v20 = vmul.f32 0.0078125, %v215_v18  ;;  %vm232_vm12 = vweird.f32 %v224_v16 }
 0x2b1   :  { %v221_v21 = vsub.f32 %v217_v20, %v219_v19 }
 0x2b3   :  { %v223_v22 = vmax.f32 %v221_v21, 0.0 }
 0x2b5   :  { %v338_v23 = vpop.eup %337  ;;  %v225_v24 = vadd.f32 1e-05, %v223_v22 }
 0x2b6   :  { %v227_v25 = vmul.f32 %v338_v23, %v224_v16  ;;  %vm233_vm11 = vweird.f32 %v338_v23 }
 0x2b7   :  { %339 = vrsqrt.f32 %v225_v24  ;;  %vm234_vm13 = vmor %vm232_vm12, %vm233_vm11  ;;  %vm242_vm15 = vweird.f32 %v225_v24 }
 0x2b8   :  { %v228_v26 = vmul.f32 %v338_v23, %v227_v25 }
 0x2ba   :  { %v229_v27 = vmul.f32 0.5, %v228_v26 }
 0x2bc   :  { %v230_v28 = vsub.f32 1.5, %v229_v27 }
 0x2bd   :  { %v340_v29 = vpop.eup %339 }
 0x2be   :  { %v237_v30 = vmul.f32 %v340_v29, %v225_v24  ;;  %v231_v32 = vmul.f32 %v338_v23, %v230_v28  ;;  %vm243_vm14 = vweird.f32 %v340_v29 }
 0x2bf   :  { %vm244_vm0 = vmor %vm242_vm15, %vm243_vm14 }
 0x2c0   :  { %v238_v33 = vmul.f32 %v340_v29, %v237_v30  ;;  %v235_v34 = vsel %vm234_vm13, %v338_v23, %v231_v32 }
 0x2c1   :  { %v246_v35 = vmul.f32 %v235_v34, %v200_v31 }
 0x2c2   :  { %v239_v36 = vmul.f32 0.5, %v238_v33 }
 0x2c3   :  { %254 = vperm.xlu2 %330, %v246_v35   ;;  %v248_v38 = vmul.f32 %v246_v35, %v208_v9 }
 0x2c4   :  { %v240_v37 = vsub.f32 1.5, %v239_v36 }
 0x2c5   :  { %v250_v43 = vsub.f32 %v202_v39, %v248_v38 }
 0x2c6   :  { %v241_v41 = vmul.f32 %v340_v29, %v240_v37 }
 0x2c8   :  { %v245_v42 = vsel %vm244_vm0, %v340_v29, %v241_v41 }
 0x2c9   :  { %v247_v44 = vmul.f32 %v245_v42, %v201_v40 }
 0x2cb   :  { %266 = vperm.xlu2 %330, %v250_v43   ;;  %259 = vperm.xlu1 %332, %v247_v44   ;;  %v249_v45 = vmul.f32 %v247_v44, %v209_v17 }
 0x2cd   :  { %v251_v47 = vsub.f32 %v203_v46, %v249_v45 }
 0x2d3   :  { %271 = vperm.xlu2 %330, %v251_v47  }
 0x31d   :  { %v255_v48 = vpop.permute.xlu2 %254 }
 0x31e   :  { %v262_v50 = vmul.f32 %v255_v48, %v433_v4 }
 0x325   :  { %v267_v49 = vpop.permute.xlu2 %266 }
 0x326   :  { %v274_v51 = vadd.f32 %v267_v49, %v262_v50 }
 0x328   :  { %v278_v53 = vmul.f32 0.1, %v274_v51  ;;  %vm276_vm1 = vcmp.gt.f32.partialorder %v274_v51, 0.0 }
 0x32a   :  { %v280_v57 = vsel %vm276_vm1, %v274_v51, %v278_v53 }
 0x32b   :  { %v282_v60 = vadd.f32 %v280_v57, %v424_v0 }
 0x32d   :  { %v272_v55 = vpop.permute.xlu2 %271 }
 0x33d   :  { %v260_v52 = vpop.permute.xlu1 %259 }
 0x33e   :  { %v263_v54 = vmul.f32 %v260_v52, %v438_v6 }
 0x340   :  { %v275_v56 = vadd.f32 %v272_v55, %v263_v54 }
 0x342   :  { %vm277_vm2 = vcmp.gt.f32.partialorder %v275_v56, 0.0  ;;  %v279_v58 = vmul.f32 0.1, %v275_v56 }
 0x344   :  { %v281_v59 = vsel %vm277_vm2, %v275_v56, %v279_v58 }
 0x345   :  { %v283_v61 = vadd.f32 %v281_v59, %v426_v1 }
 0x347   :  { %v327_v62 = vpack.c.bf16 %v283_v61, %v282_v60 }
 0x349   :  { %328 = vst [vmem:[%s469_s7] sm:$0xff] %v327_v62  }

// kernel: darknet_forward.8
= control target key start
LH: loop header
LB: loop body
LE: loop exit
PB: predicated region body
PF: predicated region fallthrough
CT: control target
= control target key end

     0   :  { %vm30_vm0 = vcmask 130048   ;;  %v512_v5 = vmov 0   ;;  %s769_s0 = inlined_call_operand.vmem [shape: bf16[16,128], index: 0, kind: input, shape index: {}]   ;;  %s770_s1 = inlined_call_operand.vmem [shape: bf16[8,16], index: 1, kind: input, shape index: {}]   ;;  %s771_s4 = inlined_call_operand.vmem [shape: bf16[128,512], index: 4, kind: input, shape index: {}]   ;;  %s772_s2 = inlined_call_operand.vmem [shape: f32[8,1], index: 2, kind: input, shape index: {}]   ;;  %s773_s3 = inlined_call_operand.vmem [shape: f32[8,1], index: 3, kind: input, shape index: {}]   ;;  %s774_s5 = inlined_call_operand.vmem [shape: bf16[8,512], index: 5, kind: output, shape index: {}]  }
   0x1   :  { %v474_v0 = vld [vmem:[%s769_s0] sm:$0xff]  ;;  %508 = vset.pattern.permute.xlu1 %v512_v5  ;;  %509 = vset.pattern.permute.xlu0 %v512_v5  ;;  %v505_v14 = vld [vmem:[%s771_s4 + $0xec] sm:$0xf0]  ;;  %v462_v17 = vld [vmem:[%s771_s4 + $0xf0] sm:$0xf0] }
   0x2   :  { %41 = vmatpush.bf16.msra.mxu0 %v474_v0  ;;  %v21_v1 = vld [vmem:[%s770_s1] sm:$0xf]  ;;  %v503_v16 = vld [vmem:[%s771_s4 + $0xe4] sm:$0xf]  ;;  %v468_v18 = vld [vmem:[%s771_s4 + $0xe8] sm:$0xf] }
   0x3   :  { %v460_v13 = vld [vmem:[%s771_s4 + $0xe0] sm:$0xf]  ;;  %v465_v20 = vor.u32 %v503_v16, %v462_v17  ;;  %v506_v21 = vld [vmem:[%s771_s4 + $0xf4] sm:$0xf0]  ;;  %v504_v22 = vld [vmem:[%s771_s4 + $0xec] sm:$0xf] }
   0x4   :  { %v461_v15 = vor.u32 %v505_v14, %v460_v13  ;;  %v469_v23 = vor.u32 %v506_v21, %v468_v18  ;;  %v470_v24 = vld [vmem:[%s771_s4 + $0xf8] sm:$0xf0]  ;;  %v444_v25 = vld [vmem:[%s771_s4 + $0xc0] sm:$0xf]  ;;  %v501_v26 = vld [vmem:[%s771_s4 + $0xcc] sm:$0xf0] }
   0x5   :  { %345 = vmatmul.msk.bf16.vlgmr.msra.gmra.mxu0 %vm30_vm0, %v21_v1  ;;  %294 = vmatpush.bf16.msra.mxu2 %v465_v20  ;;  %v473_v27 = vor.u32 %v504_v22, %v470_v24  ;;  %v445_v28 = vor.u32 %v501_v26, %v444_v25  ;;  %v499_v29 = vld [vmem:[%s771_s4 + $0xc4] sm:$0xf]  ;;  %v446_v30 = vld [vmem:[%s771_s4 + $0xd0] sm:$0xf0]  ;;  %v452_v31 = vld [vmem:[%s771_s4 + $0xc8] sm:$0xf] }
   0x6   :  { %281 = vmatpush.bf16.msra.mxu1 %v461_v15  ;;  %307 = vmatpush.bf16.msra.mxu3 %v469_v23  ;;  %v449_v32 = vor.u32 %v499_v29, %v446_v30  ;;  %v502_v33 = vld [vmem:[%s771_s4 + $0xd4] sm:$0xf0]  ;;  %v500_v34 = vld [vmem:[%s771_s4 + $0xcc] sm:$0xf]  ;;  %v454_v35 = vld [vmem:[%s771_s4 + $0xd8] sm:$0xf0] }
   0x7   :  { %320 = vmatpush.bf16.msrb.mxu0 %v473_v27  ;;  %v453_v36 = vor.u32 %v502_v33, %v452_v31  ;;  %v457_v37 = vor.u32 %v500_v34, %v454_v35  ;;  %v428_v38 = vld [vmem:[%s771_s4 + $0xa0] sm:$0xf]  ;;  %v497_v39 = vld [vmem:[%s771_s4 + $0xac] sm:$0xf0]  ;;  %v495_v40 = vld [vmem:[%s771_s4 + $0xa4] sm:$0xf] }
   0x8   :  { %v429_v41 = vor.u32 %v497_v39, %v428_v38  ;;  %v430_v42 = vld [vmem:[%s771_s4 + $0xb0] sm:$0xf0]  ;;  %v436_v43 = vld [vmem:[%s771_s4 + $0xa8] sm:$0xf]  ;;  %v498_v44 = vld [vmem:[%s771_s4 + $0xb4] sm:$0xf0] }
   0x9   :  { %295 = vmatpush.bf16.msra.mxu2 %v449_v32  ;;  %v433_v45 = vor.u32 %v495_v40, %v430_v42  ;;  %v496_v46 = vld [vmem:[%s771_s4 + $0xac] sm:$0xf]  ;;  %v438_v47 = vld [vmem:[%s771_s4 + $0xb8] sm:$0xf0]  ;;  %v412_v48 = vld [vmem:[%s771_s4 + $0x80] sm:$0xf]  ;;  %v437_v49 = vor.u32 %v498_v44, %v436_v43 }
   0xa   :  { %282 = vmatpush.bf16.msra.mxu1 %v445_v28  ;;  %308 = vmatpush.bf16.msra.mxu3 %v453_v36  ;;  %v493_v50 = vld [vmem:[%s771_s4 + $0x8c] sm:$0xf0]  ;;  %v491_v51 = vld [vmem:[%s771_s4 + $0x84] sm:$0xf]  ;;  %v414_v52 = vld [vmem:[%s771_s4 + $0x90] sm:$0xf0]  ;;  %v441_v54 = vor.u32 %v496_v46, %v438_v47 }
   0xb   :  { %321 = vmatpush.bf16.msrb.mxu0 %v457_v37  ;;  %v420_v55 = vld [vmem:[%s771_s4 + $0x88] sm:$0xf]  ;;  %v494_v56 = vld [vmem:[%s771_s4 + $0x94] sm:$0xf0]  ;;  %v413_v58 = vor.u32 %v493_v50, %v412_v48  ;;  %v492_v59 = vld [vmem:[%s771_s4 + $0x8c] sm:$0xf]  ;;  %v417_v61 = vor.u32 %v491_v51, %v414_v52 }
   0xc   :  { %v422_v60 = vld [vmem:[%s771_s4 + $0x98] sm:$0xf0]  ;;  %v421_v63 = vor.u32 %v494_v56, %v420_v55  ;;  %v489_v13 = vld [vmem:[%s771_s4 + $0x6c] sm:$0xf0]  ;;  %v487_v14 = vld [vmem:[%s771_s4 + $0x64] sm:$0xf] }
   0xd   :  { %296 = vmatpush.bf16.msra.mxu2 %v433_v45  ;;  %v425_v0 = vor.u32 %v492_v59, %v422_v60  ;;  %v404_v16 = vld [vmem:[%s771_s4 + $0x68] sm:$0xf]  ;;  %v490_v17 = vld [vmem:[%s771_s4 + $0x74] sm:$0xf0]  ;;  %v488_v20 = vld [vmem:[%s771_s4 + $0x6c] sm:$0xf] }
   0xe   :  { %283 = vmatpush.bf16.msra.mxu1 %v429_v41  ;;  %309 = vmatpush.bf16.msra.mxu3 %v437_v49  ;;  %v406_v21 = vld [vmem:[%s771_s4 + $0x78] sm:$0xf0]  ;;  %v380_v23 = vld [vmem:[%s771_s4 + $0x40] sm:$0xf]  ;;  %v485_v24 = vld [vmem:[%s771_s4 + $0x4c] sm:$0xf0] }
   0xf   :  { %322 = vmatpush.bf16.msrb.mxu0 %v441_v54  ;;  %v409_v22 = vor.u32 %v488_v20, %v406_v21  ;;  %v483_v25 = vld [vmem:[%s771_s4 + $0x44] sm:$0xf]  ;;  %v381_v26 = vor.u32 %v485_v24, %v380_v23  ;;  %v382_v27 = vld [vmem:[%s771_s4 + $0x50] sm:$0xf0]  ;;  %v388_v28 = vld [vmem:[%s771_s4 + $0x48] sm:$0xf] }
  0x10   :  { %v486_v29 = vld [vmem:[%s771_s4 + $0x54] sm:$0xf0]  ;;  %v385_v30 = vor.u32 %v483_v25, %v382_v27  ;;  %v484_v32 = vld [vmem:[%s771_s4 + $0x4c] sm:$0xf]  ;;  %v390_v33 = vld [vmem:[%s771_s4 + $0x58] sm:$0xf0] }
  0x11   :  { %297 = vmatpush.bf16.msra.mxu2 %v417_v61  ;;  %v389_v31 = vor.u32 %v486_v29, %v388_v28  ;;  %v393_v34 = vor.u32 %v484_v32, %v390_v33  ;;  %v364_v35 = vld [vmem:[%s771_s4 + $0x20] sm:$0xf]  ;;  %v481_v36 = vld [vmem:[%s771_s4 + $0x2c] sm:$0xf0]  ;;  %v479_v37 = vld [vmem:[%s771_s4 + $0x24] sm:$0xf] }
  0x12   :  { %284 = vmatpush.bf16.msra.mxu1 %v413_v58  ;;  %310 = vmatpush.bf16.msra.mxu3 %v421_v63  ;;  %v365_v38 = vor.u32 %v481_v36, %v364_v35  ;;  %v366_v39 = vld [vmem:[%s771_s4 + $0x30] sm:$0xf0]  ;;  %v372_v40 = vld [vmem:[%s771_s4 + $0x28] sm:$0xf]  ;;  %v482_v41 = vld [vmem:[%s771_s4 + $0x34] sm:$0xf0] }
  0x13   :  { %323 = vmatpush.bf16.msrb.mxu0 %v425_v0  ;;  %v369_v42 = vor.u32 %v479_v37, %v366_v39  ;;  %v373_v43 = vor.u32 %v482_v41, %v372_v40  ;;  %v480_v44 = vld [vmem:[%s771_s4 + $0x2c] sm:$0xf]  ;;  %v374_v45 = vld [vmem:[%s771_s4 + $0x38] sm:$0xf0]  ;;  %v348_v47 = vld [vmem:[%s771_s4] sm:$0xf] }
  0x14   :  { %v377_v46 = vor.u32 %v480_v44, %v374_v45  ;;  %v477_v48 = vld [vmem:[%s771_s4 + $0xc] sm:$0xf0]  ;;  %v475_v49 = vld [vmem:[%s771_s4 + $0x4] sm:$0xf]  ;;  %v350_v51 = vld [vmem:[%s771_s4 + $0x10] sm:$0xf0] }
  0x15   :  { %v349_v50 = vor.u32 %v477_v48, %v348_v47  ;;  %v356_v52 = vld [vmem:[%s771_s4 + $0x8] sm:$0xf]  ;;  %v353_v54 = vor.u32 %v475_v49, %v350_v51  ;;  %v476_v56 = vld [vmem:[%s771_s4 + $0xc] sm:$0xf] }
  0x17   :  { %324 = vmatpush.bf16.msrb.mxu0 %v409_v22 }
  0x1b   :  { %325 = vmatpush.bf16.msrb.mxu0 %v393_v34 }
  0x1f   :  { %326 = vmatpush.bf16.msrb.mxu0 %v377_v46 }
  0x82   :  { %v549_v2 = vpop.f32.mrf.mxu0 }
  0x83   :  { %49 = vadd.xlane.f32.xlu0 %v549_v2  ;;  %v52_v3 = vmul.f32 %v549_v2, %v549_v2 }
  0x8a   :  { %v45_v4 = vpop.f32.mrf.mxu0 }
  0x8b   :  { %53 = vadd.xlane.f32.xlu0 %v52_v3  ;;  %v47_v4 = vld [vmem:[%s772_s2] sm:$0xff] }
  0xf6   :  { %v50_v6 = vpop.xlane.xlu0 %49 }
  0xf7   :  { %v554_v7 = vmul.f32 0.0078125, %v50_v6 }
  0xf9   :  { %v56_v9 = vmul.f32 %v554_v7, %v554_v7 }
  0xfe   :  { %v54_v8 = vpop.xlane.xlu0 %53 }
  0xff   :  { %v55_v10 = vmul.f32 0.0078125, %v54_v8 }
 0x101   :  { %v57_v11 = vsub.f32 %v55_v10, %v56_v9  ;;  %v48_v10 = vld [vmem:[%s773_s3] sm:$0xff] }
 0x103   :  { %v58_v12 = vmax.f32 %v57_v11, 0.0 }
 0x105   :  { %v573_v19 = vadd.f32 1e-05, %v58_v12  ;;  %v396_v12 = vld [vmem:[%s771_s4 + $0x60] sm:$0xf] }
 0x106   :  { %v397_v15 = vor.u32 %v489_v13, %v396_v12 }
 0x107   :  { %510 = vrsqrt.f32 %v573_v19  ;;  %vm66_vm2 = vweird.f32 %v573_v19 }
 0x108   :  { %285 = vmatpush.bf16.msra.mxu1 %v397_v15 }
 0x10c   :  { %286 = vmatpush.bf16.msra.mxu1 %v381_v26 }
 0x10d   :  { %v511_v53 = vpop.eup %510 }
 0x10e   :  { %v61_v57 = vmul.f32 %v511_v53, %v573_v19  ;;  %vm67_vm1 = vweird.f32 %v511_v53  ;;  %v405_v19 = vor.u32 %v490_v17, %v404_v16 }
 0x10f   :  { %vm68_vm3 = vmor %vm66_vm2, %vm67_vm1 }
 0x110   :  { %v62_v62 = vmul.f32 %v511_v53, %v61_v57  ;;  %311 = vmatpush.bf16.msra.mxu3 %v405_v19  ;;  %287 = vmatpush.bf16.msra.mxu1 %v365_v38  ;;  %v358_v57 = vld [vmem:[%s771_s4 + $0x18] sm:$0xf0] }
 0x111   :  { %v361_v58 = vor.u32 %v476_v56, %v358_v57 }
 0x112   :  { %v63_v1 = vmul.f32 0.5, %v62_v62 }
 0x113   :  { %327 = vmatpush.bf16.msrb.mxu0 %v361_v58 }
 0x114   :  { %v64_v3 = vsub.f32 1.5, %v63_v1  ;;  %312 = vmatpush.bf16.msra.mxu3 %v389_v31  ;;  %288 = vmatpush.bf16.msra.mxu1 %v349_v50 }
 0x116   :  { %v65_v5 = vmul.f32 %v511_v53, %v64_v3 }
 0x118   :  { %v69_v6 = vsel %vm68_vm3, %v511_v53, %v65_v5  ;;  %313 = vmatpush.bf16.msra.mxu3 %v373_v43  ;;  %v478_v53 = vld [vmem:[%s771_s4 + $0x14] sm:$0xf0] }
 0x119   :  { %v70_v8 = vmul.f32 %v69_v6, %v47_v4  ;;  %v357_v55 = vor.u32 %v478_v53, %v356_v52 }
 0x11b   :  { %75 = vperm.xlu1 %508, %v70_v8   ;;  %v71_v9 = vmul.f32 %v70_v8, %v554_v7  ;;  %v398_v7 = vld [vmem:[%s771_s4 + $0x70] sm:$0xf0] }
 0x11c   :  { %v401_v18 = vor.u32 %v487_v14, %v398_v7  ;;  %314 = vmatpush.bf16.msra.mxu3 %v357_v55 }
 0x11d   :  { %v72_v11 = vsub.f32 %v48_v10, %v71_v9 }
 0x11e   :  { %298 = vmatpush.bf16.msra.mxu2 %v401_v18 }
 0x122   :  { %299 = vmatpush.bf16.msra.mxu2 %v385_v30 }
 0x123   :  { %81 = vperm.xlu1 %508, %v72_v11  }
 0x126   :  { %300 = vmatpush.bf16.msra.mxu2 %v369_v42 }
 0x12a   :  { %301 = vmatpush.bf16.msra.mxu2 %v353_v54 }
 0x18d   :  { %v76_v59 = vpop.permute.xlu1 %75 }
 0x18e   :  { %v78_v60 = vmul.f32 %v76_v59, %v549_v2 }
 0x195   :  { %v82_v61 = vpop.permute.xlu1 %81 }
 0x196   :  { %v84_v62 = vadd.f32 %v82_v61, %v78_v60 }
 0x198   :  { %vm85_vm4 = vcmp.gt.f32.partialorder %v84_v62, 0.0  ;;  %v86_v63 = vmul.f32 0.1, %v84_v62 }
 0x19a   :  { %v87_v0 = vsel %vm85_vm4, %v84_v62, %v86_v63 }
 0x19b   :  { %v88_v1 = vpack.c.bf16 %v87_v0, %v87_v0 }
 0x19d   :  { %289 = vmatmul.bf16.vlgmr.msra.gmra.mxu1 %v88_v1  ;;  %302 = vmatmul.bf16.vlgmr.msra.gmra.mxu2 %v88_v1 }
 0x19e   :  { %315 = vmatmul.bf16.vlgmr.msra.gmra.mxu3 %v88_v1  ;;  %328 = vmatmul.bf16.vlgmr.msrb.gmra.mxu0 %v88_v1 }
 0x21a   :  { %v290_v3 = vpop.f32.mrf.mxu1 }
 0x21b   :  { %v329_v4 = vpop.f32.mrf.mxu0 }
 0x220   :  { %v303_v5 = vpop.f32.mrf.mxu2 }
 0x221   :  { %v333_v6 = vpack.c.bf16 %v303_v5, %v290_v3  ;;  %v316_v8 = vpop.f32.mrf.mxu3 }
 0x222   :  { %v334_v9 = vpack.c.bf16 %v329_v4, %v316_v8  ;;  %v292_v10 = vpop.f32.mrf.mxu1 }
 0x223   :  { %335 = vst [vmem:[%s774_s5] sm:$0xff] %v333_v6  ;;  %v331_v2 = vpop.f32.mrf.mxu0 }
 0x224   :  { %336 = vst [vmem:[%s774_s5 + $0x8] sm:$0xff] %v334_v9 }
 0x228   :  { %v305_v11 = vpop.f32.mrf.mxu2 }
 0x229   :  { %v318_v12 = vpop.f32.mrf.mxu3 }

// kernel: darknet_forward.9
= control target key start
LH: loop header
LB: loop body
LE: loop exit
PB: predicated region body
PF: predicated region fallthrough
CT: control target
= control target key end

     0   :  { %vm263_vm0 = vcmask 130048   ;;  %s2052_s0 = inlined_call_operand.vmem [shape: bf16[144,512], index: 0, kind: input, shape index: {}]   ;;  %s2053_s1 = inlined_call_operand.vmem [shape: bf16[16,144], index: 1, kind: input, shape index: {}]   ;;  %s2054_s2 = inlined_call_operand.vmem [shape: f32[16,1], index: 2, kind: input, shape index: {}]   ;;  %s2055_s3 = inlined_call_operand.vmem [shape: f32[16,1], index: 3, kind: input, shape index: {}]   ;;  %s2056_s6 = inlined_call_operand.vmem [shape: f32[21,1], index: 6, kind: input, shape index: {}]   ;;  %s2057_s9 = inlined_call_operand.vmem [shape: f32[21,1], index: 9, kind: input, shape index: {}]   ;;  %s2058_s5 = inlined_call_operand.vmem [shape: f32[21,1], index: 5, kind: input, shape index: {}]   ;;  %s2059_s8 = inlined_call_operand.vmem [shape: f32[21,1], index: 8, kind: input, shape index: {}]   ;;  %s2060_s4 = inlined_call_operand.vmem [shape: bf16[21,16], index: 4, kind: input, shape index: {}]   ;;  %s2061_s7 = inlined_call_operand.vmem [shape: f32[21,512], index: 7, kind: input, shape index: {}]   ;;  %s2062_s10 = inlined_call_operand.vmem [shape: f32[21,512], index: 10, kind: output, shape index: {}]  }
   0x1   :  { %v1127_v0 = vld [vmem:[%s2052_s0 + $0xe0] sm:$0xf]  ;;  %v1217_v1 = vld [vmem:[%s2052_s0 + $0xec] sm:$0xf0]  ;;  %v1215_v2 = vld [vmem:[%s2052_s0 + $0xe4] sm:$0xf] }
   0x2   :  { %v1128_v3 = vor.u32 %v1217_v1, %v1127_v0  ;;  %v1129_v4 = vld [vmem:[%s2052_s0 + $0xf0] sm:$0xf0]  ;;  %v1143_v5 = vld [vmem:[%s2052_s0 + $0x100] sm:$0xf]  ;;  %v1221_v6 = vld [vmem:[%s2052_s0 + $0x10c] sm:$0xf0] }
   0x3   :  { %v1132_v7 = vor.u32 %v1215_v2, %v1129_v4  ;;  %v1144_v8 = vor.u32 %v1221_v6, %v1143_v5  ;;  %v1135_v9 = vld [vmem:[%s2052_s0 + $0xe8] sm:$0xf]  ;;  %v1218_v10 = vld [vmem:[%s2052_s0 + $0xf4] sm:$0xf0]  ;;  %v1111_v11 = vld [vmem:[%s2052_s0 + $0xc0] sm:$0xf] }
   0x4   :  { %267 = vmatpush.bf16.msra.mxu0 %v1128_v3  ;;  %v1136_v12 = vor.u32 %v1218_v10, %v1135_v9  ;;  %v1213_v13 = vld [vmem:[%s2052_s0 + $0xcc] sm:$0xf0]  ;;  %v1211_v14 = vld [vmem:[%s2052_s0 + $0xc4] sm:$0xf]  ;;  %v1113_v15 = vld [vmem:[%s2052_s0 + $0xd0] sm:$0xf0] }
   0x5   :  { %295 = vmatpush.bf16.msra.mxu2 %v1132_v7  ;;  %288 = vmatpush.bf16.msra.mxu1 %v1144_v8  ;;  %v1112_v16 = vor.u32 %v1213_v13, %v1111_v11  ;;  %v1116_v17 = vor.u32 %v1211_v14, %v1113_v15  ;;  %v1119_v18 = vld [vmem:[%s2052_s0 + $0xc8] sm:$0xf]  ;;  %v1214_v19 = vld [vmem:[%s2052_s0 + $0xd4] sm:$0xf0]  ;;  %v1095_v20 = vld [vmem:[%s2052_s0 + $0xa0] sm:$0xf] }
   0x6   :  { %v1120_v21 = vor.u32 %v1214_v19, %v1119_v18  ;;  %v1209_v22 = vld [vmem:[%s2052_s0 + $0xac] sm:$0xf0]  ;;  %v1207_v23 = vld [vmem:[%s2052_s0 + $0xa4] sm:$0xf]  ;;  %v1097_v24 = vld [vmem:[%s2052_s0 + $0xb0] sm:$0xf0] }
   0x7   :  { %v1103_v25 = vld [vmem:[%s2052_s0 + $0xa8] sm:$0xf]  ;;  %v1210_v26 = vld [vmem:[%s2052_s0 + $0xb4] sm:$0xf0]  ;;  %v1096_v28 = vor.u32 %v1209_v22, %v1095_v20  ;;  %v1100_v30 = vor.u32 %v1207_v23, %v1097_v24  ;;  %v1079_v32 = vld [vmem:[%s2052_s0 + $0x80] sm:$0xf] }
   0x8   :  { %v1151_v27 = vld [vmem:[%s2052_s0 + $0x108] sm:$0xf]  ;;  %268 = vmatpush.bf16.msra.mxu0 %v1112_v16  ;;  %v1222_v29 = vld [vmem:[%s2052_s0 + $0x114] sm:$0xf0]  ;;  %v1205_v33 = vld [vmem:[%s2052_s0 + $0x8c] sm:$0xf0]  ;;  %v1104_v35 = vor.u32 %v1210_v26, %v1103_v25 }
   0x9   :  { %323 = vmatpush.bf16.msrb.mxu1 %v1136_v12  ;;  %296 = vmatpush.bf16.msra.mxu2 %v1116_v17  ;;  %v1152_v31 = vor.u32 %v1222_v29, %v1151_v27  ;;  %v1216_v34 = vld [vmem:[%s2052_s0 + $0xec] sm:$0xf]  ;;  %v1203_v36 = vld [vmem:[%s2052_s0 + $0x84] sm:$0xf]  ;;  %v1081_v37 = vld [vmem:[%s2052_s0 + $0x90] sm:$0xf0]  ;;  %v1080_v42 = vor.u32 %v1205_v33, %v1079_v32 }
   0xa   :  { %v1137_v38 = vld [vmem:[%s2052_s0 + $0xf8] sm:$0xf0]  ;;  %v1087_v40 = vld [vmem:[%s2052_s0 + $0x88] sm:$0xf]  ;;  %v1206_v41 = vld [vmem:[%s2052_s0 + $0x94] sm:$0xf0]  ;;  %v1084_v46 = vor.u32 %v1203_v36, %v1081_v37 }
   0xb   :  { %344 = vmatpush.bf16.msra.mxu3 %v1152_v31  ;;  %v1140_v39 = vor.u32 %v1216_v34, %v1137_v38  ;;  %v1063_v43 = vld [vmem:[%s2052_s0 + $0x60] sm:$0xf]  ;;  %v1212_v44 = vld [vmem:[%s2052_s0 + $0xcc] sm:$0xf]  ;;  %v1121_v45 = vld [vmem:[%s2052_s0 + $0xd8] sm:$0xf0]  ;;  %v1088_v51 = vor.u32 %v1206_v41, %v1087_v40 }
   0xc   :  { %269 = vmatpush.bf16.msra.mxu0 %v1096_v28  ;;  %v1201_v47 = vld [vmem:[%s2052_s0 + $0x6c] sm:$0xf0]  ;;  %v1124_v48 = vor.u32 %v1212_v44, %v1121_v45  ;;  %v1185_v49 = vld [vmem:[%s2053_s1 + $0x4] sm:$0xf]  ;;  %v1009_v50 = vld [vmem:[%s2053_s1 + $0x8] sm:$0xf0] }
   0xd   :  { %324 = vmatpush.bf16.msrb.mxu1 %v1120_v21  ;;  %297 = vmatpush.bf16.msra.mxu2 %v1100_v30  ;;  %v1199_v52 = vld [vmem:[%s2052_s0 + $0x64] sm:$0xf]  ;;  %v1065_v53 = vld [vmem:[%s2052_s0 + $0x70] sm:$0xf0]  ;;  %v1474_v54 = vor.u32 %v1185_v49, %v1009_v50  ;;  %v1071_v55 = vld [vmem:[%s2052_s0 + $0x68] sm:$0xf]  ;;  %v1064_v58 = vor.u32 %v1201_v47, %v1063_v43 }
   0xe   :  { %v1202_v56 = vld [vmem:[%s2052_s0 + $0x74] sm:$0xf0]  ;;  %v1208_v57 = vld [vmem:[%s2052_s0 + $0xac] sm:$0xf]  ;;  %v1105_v59 = vld [vmem:[%s2052_s0 + $0xb8] sm:$0xf0]  ;;  %v1068_v60 = vor.u32 %v1199_v52, %v1065_v53 }
   0xf   :  { %351 = vmatpush.bf16.msrb.mxu3 %v1140_v39  ;;  %1157 = vmatmul.msk.bf16.vlgmr.msra.gmra.mxu1 %vm263_vm0, %v1474_v54  ;;  %v1047_v61 = vld [vmem:[%s2052_s0 + $0x40] sm:$0xf]  ;;  %v1197_v62 = vld [vmem:[%s2052_s0 + $0x4c] sm:$0xf0]  ;;  %v1195_v63 = vld [vmem:[%s2052_s0 + $0x44] sm:$0xf]  ;;  %v1108_v0 = vor.u32 %v1208_v57, %v1105_v59  ;;  %v1072_v1 = vor.u32 %v1202_v56, %v1071_v55 }
  0x10   :  { %270 = vmatpush.bf16.msra.mxu0 %v1080_v42  ;;  %v1049_v2 = vld [vmem:[%s2052_s0 + $0x50] sm:$0xf0]  ;;  %v1204_v3 = vld [vmem:[%s2052_s0 + $0x8c] sm:$0xf]  ;;  %v1089_v4 = vld [vmem:[%s2052_s0 + $0x98] sm:$0xf0]  ;;  %1159 = vmatmul.msk.bf16.vlgmr.msra.gmra.mxu3 %vm263_vm0, %v1474_v54  ;;  %v1048_v7 = vor.u32 %v1197_v62, %v1047_v61 }
  0x11   :  { %325 = vmatpush.bf16.msrb.mxu1 %v1104_v35  ;;  %298 = vmatpush.bf16.msra.mxu2 %v1084_v46  ;;  %v1055_v5 = vld [vmem:[%s2052_s0 + $0x48] sm:$0xf]  ;;  %v1198_v6 = vld [vmem:[%s2052_s0 + $0x54] sm:$0xf0]  ;;  %v1052_v8 = vor.u32 %v1195_v63, %v1049_v2  ;;  %v1031_v9 = vld [vmem:[%s2052_s0 + $0x20] sm:$0xf]  ;;  %v1092_v12 = vor.u32 %v1204_v3, %v1089_v4 }
  0x12   :  { %v1193_v10 = vld [vmem:[%s2052_s0 + $0x2c] sm:$0xf0]  ;;  %v1191_v11 = vld [vmem:[%s2052_s0 + $0x24] sm:$0xf]  ;;  %v1056_v13 = vor.u32 %v1198_v6, %v1055_v5  ;;  %v1033_v14 = vld [vmem:[%s2052_s0 + $0x30] sm:$0xf0] }
  0x13   :  { %352 = vmatpush.bf16.msrb.mxu3 %v1124_v48  ;;  %v1200_v15 = vld [vmem:[%s2052_s0 + $0x6c] sm:$0xf]  ;;  %v1073_v16 = vld [vmem:[%s2052_s0 + $0x78] sm:$0xf0]  ;;  %v1039_v17 = vld [vmem:[%s2052_s0 + $0x28] sm:$0xf]  ;;  %v1032_v19 = vor.u32 %v1193_v10, %v1031_v9  ;;  %v1036_v21 = vor.u32 %v1191_v11, %v1033_v14 }
  0x14   :  { %271 = vmatpush.bf16.msra.mxu0 %v1064_v58  ;;  %v1194_v18 = vld [vmem:[%s2052_s0 + $0x34] sm:$0xf0]  ;;  %v1015_v20 = vld [vmem:[%s2052_s0] sm:$0xf]  ;;  %v1189_v22 = vld [vmem:[%s2052_s0 + $0xc] sm:$0xf0]  ;;  %v1076_v25 = vor.u32 %v1200_v15, %v1073_v16 }
  0x15   :  { %326 = vmatpush.bf16.msrb.mxu1 %v1088_v51  ;;  %299 = vmatpush.bf16.msra.mxu2 %v1068_v60  ;;  %v1187_v23 = vld [vmem:[%s2052_s0 + $0x4] sm:$0xf]  ;;  %v1017_v24 = vld [vmem:[%s2052_s0 + $0x10] sm:$0xf0]  ;;  %v1040_v26 = vor.u32 %v1194_v18, %v1039_v17  ;;  %v1023_v27 = vld [vmem:[%s2052_s0 + $0x8] sm:$0xf]  ;;  %v1016_v33 = vor.u32 %v1189_v22, %v1015_v20 }
  0x16   :  { %v1196_v28 = vld [vmem:[%s2052_s0 + $0x4c] sm:$0xf]  ;;  %v1057_v29 = vld [vmem:[%s2052_s0 + $0x58] sm:$0xf0]  ;;  %v1190_v30 = vld [vmem:[%s2052_s0 + $0x14] sm:$0xf0]  ;;  %v1020_v36 = vor.u32 %v1187_v23, %v1017_v24 }
  0x17   :  { %353 = vmatpush.bf16.msrb.mxu3 %v1108_v0  ;;  %v1219_v31 = vld [vmem:[%s2052_s0 + $0x104] sm:$0xf]  ;;  %v1145_v32 = vld [vmem:[%s2052_s0 + $0x110] sm:$0xf0]  ;;  %v1007_v34 = vld [vmem:[%s2053_s1] sm:$0xf]  ;;  %v1060_v37 = vor.u32 %v1196_v28, %v1057_v29  ;;  %v1024_v40 = vor.u32 %v1190_v30, %v1023_v27 }
  0x18   :  { %272 = vmatpush.bf16.msra.mxu0 %v1048_v7  ;;  %v1186_v35 = vld [vmem:[%s2053_s1 + $0x4] sm:$0xf0]  ;;  %v1220_v38 = vld [vmem:[%s2052_s0 + $0x10c] sm:$0xf]  ;;  %v1153_v39 = vld [vmem:[%s2052_s0 + $0x118] sm:$0xf0]  ;;  %v1148_v43 = vor.u32 %v1219_v31, %v1145_v32 }
  0x19   :  { %327 = vmatpush.bf16.msrb.mxu1 %v1072_v1  ;;  %300 = vmatpush.bf16.msra.mxu2 %v1052_v8  ;;  %v1192_v41 = vld [vmem:[%s2052_s0 + $0x2c] sm:$0xf]  ;;  %v1041_v42 = vld [vmem:[%s2052_s0 + $0x38] sm:$0xf0]  ;;  %v1008_v44 = vor.u32 %v1186_v35, %v1007_v34  ;;  %v1156_v45 = vor.u32 %v1220_v38, %v1153_v39  ;;  %v1304_v30 = vmov 0  }
  0x1a   :  { %v1044_v46 = vor.u32 %v1192_v41, %v1041_v42  ;;  %v1188_v47 = vld [vmem:[%s2052_s0 + $0xc] sm:$0xf]  ;;  %v1025_v48 = vld [vmem:[%s2052_s0 + $0x18] sm:$0xf0]  ;;  %1225 = vset.pattern.permute.xlu2 %v1304_v30  ;;  %1226 = vset.pattern.permute.xlu0 %v1304_v30 }
  0x1b   :  { %354 = vmatpush.bf16.msrb.mxu3 %v1092_v12  ;;  %v1028_v49 = vor.u32 %v1188_v47, %v1025_v48  ;;  %1227 = vset.pattern.permute.xlu1 %v1304_v30 }
  0x1c   :  { %273 = vmatpush.bf16.msra.mxu0 %v1032_v19 }
  0x1d   :  { %328 = vmatpush.bf16.msrb.mxu1 %v1056_v13  ;;  %301 = vmatpush.bf16.msra.mxu2 %v1036_v21 }
  0x1f   :  { %355 = vmatpush.bf16.msrb.mxu3 %v1076_v25 }
  0x20   :  { %274 = vmatpush.bf16.msra.mxu0 %v1016_v33 }
  0x21   :  { %329 = vmatpush.bf16.msrb.mxu1 %v1040_v26  ;;  %302 = vmatpush.bf16.msra.mxu2 %v1020_v36 }
  0x23   :  { %356 = vmatpush.bf16.msrb.mxu3 %v1060_v37  ;;  %275 = vmatmul.bf16.vlgmr.msra.gmra.mxu0 %v1008_v44 }
  0x24   :  { %303 = vmatmul.bf16.vlgmr.msra.gmra.mxu2 %v1008_v44  ;;  %372 = vmatpush.bf16.msrb.mxu0 %v1156_v45 }
  0x25   :  { %330 = vmatpush.bf16.msrb.mxu1 %v1024_v40  ;;  %316 = vmatpush.bf16.msrb.mxu2 %v1148_v43 }
  0x27   :  { %357 = vmatpush.bf16.msrb.mxu3 %v1044_v46 }
  0x28   :  { %331 = vmatmul.bf16.vlgmr.msrb.gmra.mxu1 %v1008_v44 }
  0x2b   :  { %358 = vmatpush.bf16.msrb.mxu3 %v1028_v49 }
  0x2e   :  { %359 = vmatmul.bf16.vlgmr.msrb.gmra.mxu3 %v1008_v44 }
  0x33   :  { %1160 = vmatmul.msk.bf16.vlgmr.msrb.gmra.mxu0 %vm263_vm0, %v1474_v54 }
  0x34   :  { %1158 = vmatmul.msk.bf16.vlgmr.msrb.gmra.mxu2 %vm263_vm0, %v1474_v54 }
  0x8c   :  { %v290_v50 = vpop.f32.mrf.mxu1 }
  0x93   :  { %v346_v51 = vpop.f32.mrf.mxu3 }
  0x94   :  { %v292_v55 = vpop.f32.mrf.mxu1 }
  0x9b   :  { %v348_v56 = vpop.f32.mrf.mxu3 }
  0xa0   :  { %v276_v52 = vpop.f32.mrf.mxu0 }
  0xa1   :  { %v1598_v62 = vadd.f32 %v290_v50, %v276_v52 }
  0xa3   :  { %v395_v54 = vmul.f32 %v1598_v62, %v1598_v62 }
  0xa5   :  { %v332_v59 = vpop.f32.mrf.mxu1 }
  0xa6   :  { %v1600_v0 = vadd.f32 %v346_v51, %v332_v59 }
  0xa7   :  { %v304_v53 = vpop.f32.mrf.mxu2 }
  0xa8   :  { %v278_v57 = vpop.f32.mrf.mxu0  ;;  %v397_v6 = vmul.f32 %v1600_v0, %v1600_v0 }
  0xa9   :  { %v1617_v10 = vadd.f32 %v292_v55, %v278_v57  ;;  %v379_v55 = vld [vmem:[%s2054_s2] sm:$0xff] }
  0xab   :  { %v399_v19 = vmul.f32 %v1617_v10, %v1617_v10 }
  0xad   :  { %v334_v9 = vpop.f32.mrf.mxu1 }
  0xae   :  { %v1620_v16 = vadd.f32 %v348_v56, %v334_v9 }
  0xaf   :  { %v306_v58 = vpop.f32.mrf.mxu2 }
  0xb0   :  { %v374_v61 = vpop.f32.mrf.mxu0  ;;  %v401_v23 = vmul.f32 %v1620_v16, %v1620_v16 }
  0xb1   :  { %v360_v60 = vpop.f32.mrf.mxu3 }
  0xb2   :  { %v1602_v1 = vadd.f32 %v374_v61, %v360_v60  ;;  %v381_v61 = vld [vmem:[%s2055_s3] sm:$0xff] }
  0xb4   :  { %v398_v7 = vmul.f32 %v1602_v1, %v1602_v1 }
  0xb7   :  { %v318_v63 = vpop.f32.mrf.mxu2 }
  0xb8   :  { %v1604_v2 = vadd.f32 %v318_v63, %v304_v53  ;;  %v376_v14 = vpop.f32.mrf.mxu0 }
  0xb9   :  { %v362_v11 = vpop.f32.mrf.mxu3 }
  0xba   :  { %v396_v3 = vmul.f32 %v1604_v2, %v1604_v2  ;;  %v383_v4 = vadd.f32 %v1604_v2, %v1598_v62  ;;  %v1626_v20 = vadd.f32 %v376_v14, %v362_v11  ;;  %v621_v11 = vld [vmem:[%s2056_s6 + $0x8] sm:$0xff]  ;;  %v516_v14 = vld [vmem:[%s2058_s5] sm:$0xff] }
  0xbc   :  { %v384_v5 = vadd.f32 %v383_v4, %v1600_v0  ;;  %v403_v8 = vadd.f32 %v396_v3, %v395_v54  ;;  %v402_v27 = vmul.f32 %v1626_v20, %v1626_v20  ;;  %v380_v4 = vld [vmem:[%s2054_s2 + $0x8] sm:$0xff] }
  0xbe   :  { %v385_v12 = vadd.f32 %v384_v5, %v1602_v1  ;;  %v404_v13 = vadd.f32 %v403_v8, %v397_v6  ;;  %v382_v8 = vld [vmem:[%s2055_s3 + $0x8] sm:$0xff] }
  0xbf   :  { %v320_v15 = vpop.f32.mrf.mxu2 }
  0xc0   :  { %v1622_v17 = vadd.f32 %v320_v15, %v306_v58  ;;  %386 = vadd.xlane.f32.xlu0 %v385_v12  ;;  %v405_v18 = vadd.f32 %v404_v13, %v398_v7  ;;  %v639_v13 = vld [vmem:[%s2057_s9 + $0x8] sm:$0xff] }
  0xc1   :  { %vm642_vm7 = vcmp.gt.f32.partialorder %v639_v13, 0.5  ;;  %v636_v15 = vld [vmem:[%s2059_s8 + $0x8] sm:$0xff] }
  0xc2   :  { %v388_v21 = vadd.f32 %v1622_v17, %v1617_v10  ;;  %v400_v22 = vmul.f32 %v1622_v17, %v1622_v17  ;;  %406 = vadd.xlane.f32.xlu1 %v405_v18  ;;  %v897_v18 = vsel %vm642_vm7, 1, %v1304_v30 }
  0xc4   :  { %v389_v24 = vadd.f32 %v388_v21, %v1620_v16  ;;  %v408_v25 = vadd.f32 %v400_v22, %v399_v19  ;;  %v517_v19 = vld [vmem:[%s2058_s5 + $0x8] sm:$0xff]  ;;  %v620_v21 = vld [vmem:[%s2056_s6] sm:$0xff]  ;;  %v518_v22 = vld [vmem:[%s2058_s5 + $0x10] sm:$0x1f] }
  0xc6   :  { %v390_v26 = vadd.f32 %v389_v24, %v1626_v20  ;;  %v409_v28 = vadd.f32 %v408_v25, %v401_v23  ;;  %v638_v23 = vld [vmem:[%s2057_s9] sm:$0xff] }
  0xc7   :  { %v635_v24 = vld [vmem:[%s2059_s8] sm:$0xff]  ;;  %vm641_vm8 = vcmp.gt.f32.partialorder %v638_v23, 0.5 }
  0xc8   :  { %391 = vadd.xlane.f32.xlu0 %v390_v26  ;;  %v410_v29 = vadd.f32 %v409_v28, %v402_v27  ;;  %v896_v25 = vsel %vm641_vm8, 1, %v1304_v30  ;;  %v640_v26 = vld [vmem:[%s2057_s9 + $0x10] sm:$0x1f] }
  0xc9   :  { %vm643_vm9 = vcmp.gt.f32.partialorder %v640_v26, 0.5  ;;  %v622_v28 = vld [vmem:[%s2056_s6 + $0x10] sm:$0x1f] }
  0xca   :  { %411 = vadd.xlane.f32.xlu1 %v410_v29  ;;  %v898_v27 = vsel %vm643_vm9, 1, %v1304_v30  ;;  %v637_v29 = vld [vmem:[%s2059_s8 + $0x10] sm:$0x1f] }
 0x133   :  { %v387_v31 = vpop.xlane.xlu0 %386 }
 0x134   :  { %v393_v32 = vmul.f32 0.001953125, %v387_v31 }
 0x135   :  { %v407_v33 = vpop.xlane.xlu1 %406 }
 0x136   :  { %v415_v34 = vmul.f32 %v393_v32, %v393_v32  ;;  %v413_v35 = vmul.f32 0.001953125, %v407_v33 }
 0x138   :  { %v417_v36 = vsub.f32 %v413_v35, %v415_v34 }
 0x13a   :  { %v419_v37 = vmax.f32 %v417_v36, 0.0 }
 0x13b   :  { %v392_v38 = vpop.xlane.xlu0 %391 }
 0x13c   :  { %v421_v39 = vadd.f32 1e-05, %v419_v37  ;;  %v394_v40 = vmul.f32 0.001953125, %v392_v38 }
 0x13d   :  { %v412_v41 = vpop.xlane.xlu1 %411 }
 0x13e   :  { %1228 = vrsqrt.f32 %v421_v39  ;;  %v416_v42 = vmul.f32 %v394_v40, %v394_v40  ;;  %v414_v43 = vmul.f32 0.001953125, %v412_v41  ;;  %vm429_vm2 = vweird.f32 %v421_v39 }
 0x140   :  { %v418_v44 = vsub.f32 %v414_v43, %v416_v42 }
 0x142   :  { %v420_v45 = vmax.f32 %v418_v44, 0.0 }
 0x144   :  { %v1229_v46 = vpop.eup %1228  ;;  %v422_v47 = vadd.f32 1e-05, %v420_v45 }
 0x145   :  { %v424_v48 = vmul.f32 %v1229_v46, %v421_v39  ;;  %vm430_vm1 = vweird.f32 %v1229_v46 }
 0x146   :  { %1230 = vrsqrt.f32 %v422_v47  ;;  %vm431_vm3 = vmor %vm429_vm2, %vm430_vm1  ;;  %vm439_vm5 = vweird.f32 %v422_v47 }
 0x147   :  { %v425_v49 = vmul.f32 %v1229_v46, %v424_v48 }
 0x149   :  { %v426_v50 = vmul.f32 0.5, %v425_v49 }
 0x14b   :  { %v427_v51 = vsub.f32 1.5, %v426_v50 }
 0x14c   :  { %v1231_v52 = vpop.eup %1230 }
 0x14d   :  { %v434_v53 = vmul.f32 %v1231_v52, %v422_v47  ;;  %v428_v56 = vmul.f32 %v1229_v46, %v427_v51  ;;  %vm440_vm4 = vweird.f32 %v1231_v52 }
 0x14e   :  { %vm441_vm6 = vmor %vm439_vm5, %vm440_vm4 }
 0x14f   :  { %v435_v57 = vmul.f32 %v1231_v52, %v434_v53  ;;  %v432_v58 = vsel %vm431_vm3, %v1229_v46, %v428_v56 }
 0x150   :  { %v443_v59 = vmul.f32 %v432_v58, %v379_v55 }
 0x151   :  { %v436_v60 = vmul.f32 0.5, %v435_v57 }
 0x152   :  { %451 = vperm.xlu2 %1225, %v443_v59   ;;  %v445_v63 = vmul.f32 %v443_v59, %v393_v32 }
 0x153   :  { %v437_v54 = vsub.f32 1.5, %v436_v60 }
 0x154   :  { %v447_v3 = vsub.f32 %v381_v61, %v445_v63 }
 0x155   :  { %v438_v5 = vmul.f32 %v1231_v52, %v437_v54  ;;  %v1223_v54 = vld [vmem:[%s2060_s4] sm:$0xff] }
 0x156   :  { %469 = vperm.xlu0 %1226, %v447_v3   ;;  %v511_v3 = vld [vmem:[%s2060_s4 + $0x8] sm:$0x7] }
 0x157   :  { %v442_v6 = vsel %vm441_vm6, %v1231_v52, %v438_v5 }
 0x158   :  { %v444_v7 = vmul.f32 %v442_v6, %v380_v4  ;;  %v539_v4 = vunpack.c.l.b16 %v511_v3 }
 0x15a   :  { %456 = vperm.xlu2 %1225, %v444_v7   ;;  %v446_v9 = vmul.f32 %v444_v7, %v394_v40  ;;  %v541_v5 = vpack.c.b16 %v539_v4, %v539_v4 }
 0x15c   :  { %v448_v12 = vsub.f32 %v382_v8, %v446_v9 }
 0x15e   :  { %930 = vperm.xlu0 %1226, %v621_v11   ;;  %474 = vperm.xlu1 %1227, %v448_v12  }
 0x162   :  { %521 = vperm.xlu2 %1225, %v516_v14  }
 0x166   :  { %969 = vperm.xlu0 %1226, %v636_v15   ;;  %903 = vperm.xlu1 %1227, %v897_v18  }
 0x16a   :  { %526 = vperm.xlu2 %1225, %v517_v19  }
 0x16e   :  { %925 = vperm.xlu1 %1227, %v620_v21  }
 0x172   :  { %531 = vperm.xlu2 %1225, %v518_v22  }
 0x176   :  { %964 = vperm.xlu1 %1227, %v635_v24  }
 0x17a   :  { %900 = vperm.xlu2 %1225, %v896_v25  }
 0x182   :  { %906 = vperm.xlu2 %1225, %v898_v27  }
 0x18a   :  { %935 = vperm.xlu2 %1225, %v622_v28  }
 0x192   :  { %974 = vperm.xlu2 %1225, %v637_v29  }
 0x1ac   :  { %v452_v31 = vpop.permute.xlu2 %451 }
 0x1ad   :  { %v459_v33 = vmul.f32 %v452_v31, %v1598_v62  ;;  %v460_v34 = vmul.f32 %v452_v31, %v1604_v2  ;;  %v461_v35 = vmul.f32 %v452_v31, %v1600_v0  ;;  %v462_v37 = vmul.f32 %v452_v31, %v1602_v1 }
 0x1b4   :  { %v457_v30 = vpop.permute.xlu2 %456 }
 0x1b5   :  { %v463_v40 = vmul.f32 %v457_v30, %v1617_v10  ;;  %v464_v42 = vmul.f32 %v457_v30, %v1622_v17  ;;  %v465_v43 = vmul.f32 %v457_v30, %v1620_v16  ;;  %v466_v44 = vmul.f32 %v457_v30, %v1626_v20 }
 0x1bc   :  { %v522_v6 = vpop.permute.xlu2 %521 }
 0x1c4   :  { %v1717_v7 = vpop.permute.xlu2 %526 }
 0x1c8   :  { %v470_v32 = vpop.permute.xlu0 %469 }
 0x1c9   :  { %v477_v36 = vadd.f32 %v470_v32, %v459_v33  ;;  %v478_v38 = vadd.f32 %v470_v32, %v460_v34  ;;  %v479_v39 = vadd.f32 %v470_v32, %v461_v35  ;;  %v480_v41 = vadd.f32 %v470_v32, %v462_v37 }
 0x1cb   :  { %vm485_vm10 = vcmp.gt.f32.partialorder %v477_v36, 0.0  ;;  %v493_v62 = vmul.f32 0.1, %v477_v36  ;;  %v494_v2 = vmul.f32 0.1, %v478_v38  ;;  %vm486_vm11 = vcmp.gt.f32.partialorder %v478_v38, 0.0 }
 0x1cc   :  { %v495_v45 = vmul.f32 0.1, %v479_v39  ;;  %vm487_vm12 = vcmp.gt.f32.partialorder %v479_v39, 0.0  ;;  %vm488_vm13 = vcmp.gt.f32.partialorder %v480_v41, 0.0  ;;  %v496_v10 = vmul.f32 0.1, %v480_v41  ;;  %v1720_v29 = vpop.permute.xlu2 %531 }
 0x1cd   :  { %v501_v50 = vsel %vm485_vm10, %v477_v36, %v493_v62  ;;  %v502_v51 = vsel %vm486_vm11, %v478_v38, %v494_v2 }
 0x1ce   :  { %v503_v52 = vsel %vm487_vm12, %v479_v39, %v495_v45  ;;  %v504_v57 = vsel %vm488_vm13, %v480_v41, %v496_v10 }
 0x1d0   :  { %v475_v0 = vpop.permute.xlu1 %474 }
 0x1d1   :  { %v481_v46 = vadd.f32 %v475_v0, %v463_v40  ;;  %v482_v47 = vadd.f32 %v475_v0, %v464_v42  ;;  %v483_v48 = vadd.f32 %v475_v0, %v465_v43  ;;  %v484_v1 = vadd.f32 %v475_v0, %v466_v44 }
 0x1d3   :  { %vm489_vm14 = vcmp.gt.f32.partialorder %v481_v46, 0.0  ;;  %vm490_vm15 = vcmp.gt.f32.partialorder %v482_v47, 0.0  ;;  %vm491_vm1 = vcmp.gt.f32.partialorder %v483_v48, 0.0  ;;  %vm492_vm2 = vcmp.gt.f32.partialorder %v484_v1, 0.0 }
 0x1d4   :  { %v497_v16 = vmul.f32 0.1, %v481_v46  ;;  %v498_v17 = vmul.f32 0.1, %v482_v47  ;;  %v499_v20 = vmul.f32 0.1, %v483_v48 }
 0x1d5   :  { %v500_v49 = vmul.f32 0.1, %v484_v1 }
 0x1d6   :  { %v505_v53 = vsel %vm489_vm14, %v481_v46, %v497_v16  ;;  %v506_v55 = vsel %vm490_vm15, %v482_v47, %v498_v17  ;;  %v507_v56 = vsel %vm491_vm1, %v483_v48, %v499_v20  ;;  %v1748_v17 = vpop.permute.xlu2 %900 }
 0x1d7   :  { %v512_v58 = vpack.c.bf16 %v505_v53, %v501_v50  ;;  %v513_v59 = vpack.c.bf16 %v506_v55, %v502_v51  ;;  %v514_v60 = vpack.c.bf16 %v507_v56, %v503_v52  ;;  %v508_v61 = vsel %vm492_vm2, %v484_v1, %v500_v49 }
 0x1d8   :  { %v515_v63 = vpack.c.bf16 %v508_v61, %v504_v57  ;;  %v1728_v41 = vpop.permute.xlu1 %903  ;;  %vm908_vm3 = vcmp.eq.s32.totalorder %v1748_v17, 1 }
 0x1d9   :  { %555 = vmatpush.bf16.msra.mxu2 %v512_v58  ;;  %573 = vmatpush.bf16.msra.mxu1 %v513_v59  ;;  %vm909_vm2 = vcmp.eq.s32.totalorder %v1728_v41, 1 }
 0x1da   :  { %591 = vmatpush.bf16.msra.mxu0 %v514_v60  ;;  %609 = vmatpush.bf16.msra.mxu3 %v515_v63 }
 0x1dc   :  { %1165 = vmatmul.msk.bf16.vlgmr.msra.gmra.mxu2 %vm263_vm0, %v1223_v54  ;;  %1167 = vmatmul.msk.bf16.vlgmr.msra.gmra.mxu1 %vm263_vm0, %v1223_v54 }
 0x1dd   :  { %1169 = vmatmul.msk.bf16.vlgmr.msra.gmra.mxu0 %vm263_vm0, %v1223_v54  ;;  %1171 = vmatmul.msk.bf16.vlgmr.msra.gmra.mxu3 %vm263_vm0, %v1223_v54 }
 0x1ec   :  { %1166 = vmatmul.msk.bf16.gmra.mxu2 %vm263_vm0, %v541_v5  ;;  %1168 = vmatmul.msk.bf16.gmra.mxu1 %vm263_vm0, %v541_v5 }
 0x1ed   :  { %1170 = vmatmul.msk.bf16.gmra.mxu0 %vm263_vm0, %v541_v5  ;;  %1172 = vmatmul.msk.bf16.gmra.mxu3 %vm263_vm0, %v541_v5 }
 0x259   :  { %v575_v8 = vpop.f32.mrf.mxu1 }
 0x25a   :  { %v576_v9 = vadd.f32 %v575_v8, %v522_v6  ;;  %v593_v11 = vpop.f32.mrf.mxu0 }
 0x25b   :  { %v594_v12 = vadd.f32 %v593_v11, %v522_v6 }
 0x25c   :  { %v1174_v13 = vmul.f32 -1.442695, %v576_v9  ;;  %v646_v15 = vmul.f32 1.442695, %v576_v9 }
 0x25d   :  { %v1175_v14 = vmul.f32 -1.442695, %v594_v12  ;;  %v648_v19 = vmul.f32 1.442695, %v594_v12 }
 0x25e   :  { %1232 = vpow2.f32 %v1174_v13 }
 0x25f   :  { %v557_v18 = vpop.f32.mrf.mxu2  ;;  %1234 = vpow2.f32 %v1175_v14  ;;  %v1788_v14 = vpop.permute.xlu1 %925 }
 0x260   :  { %v558_v21 = vadd.f32 %v557_v18, %v522_v6  ;;  %v611_v22 = vpop.f32.mrf.mxu3  ;;  %1236 = vpow2.f32 %v646_v15 }
 0x261   :  { %v612_v23 = vadd.f32 %v611_v22, %v522_v6  ;;  %v577_v24 = vpop.f32.mrf.mxu1  ;;  %1238 = vpow2.f32 %v648_v19 }
 0x262   :  { %v644_v25 = vmul.f32 1.442695, %v558_v21  ;;  %v1173_v26 = vmul.f32 -1.442695, %v558_v21  ;;  %v578_v27 = vadd.f32 %v577_v24, %v1717_v7  ;;  %v595_v28 = vpop.f32.mrf.mxu0 }
 0x263   :  { %v1176_v31 = vmul.f32 -1.442695, %v612_v23  ;;  %v650_v33 = vmul.f32 1.442695, %v612_v23  ;;  %v596_v34 = vadd.f32 %v595_v28, %v1717_v7 }
 0x264   :  { %v1233_v32 = vpop.eup %1232  ;;  %1240 = vpow2.f32 %v1173_v26  ;;  %v1178_v30 = vmul.f32 -1.442695, %v578_v27  ;;  %v654_v38 = vmul.f32 1.442695, %v578_v27 }
 0x265   :  { %v1723_v35 = vadd.f32 1.0, %v1233_v32  ;;  %1242 = vpow2.f32 %v644_v25  ;;  %v1235_v36 = vpop.eup %1234  ;;  %v1179_v43 = vmul.f32 -1.442695, %v596_v34  ;;  %v656_v0 = vmul.f32 1.442695, %v596_v34 }
 0x266   :  { %1244 = vpow2.f32 %v1176_v31  ;;  %v1726_v40 = vpop.eup %1236  ;;  %v1730_v42 = vadd.f32 1.0, %v1235_v36 }
 0x267   :  { %v559_v37 = vpop.f32.mrf.mxu2  ;;  %1246 = vrcp.f32 %v1723_v35  ;;  %v1734_v62 = vpop.eup %1238  ;;  %v740_v48 = vand.u32 2147483647, %v1723_v35  ;;  %v742_v1 = vand.u32 2147483648, %v1723_v35  ;;  %vm736_vm0 = vweird.f32 %v1723_v35 }
 0x268   :  { %v613_v39 = vpop.f32.mrf.mxu3  ;;  %1248 = vpow2.f32 %v650_v33  ;;  %v1740_v46 = vadd.f32 %v559_v37, %v1717_v7  ;;  %v755_v49 = vand.u32 2147483647, %v1730_v42  ;;  %v757_v50 = vand.u32 2147483648, %v1730_v42 }
 0x269   :  { %v1732_v44 = vpop.f32.mrf.mxu1  ;;  %1250 = vpow2.f32 %v1178_v30  ;;  %v1761_v56 = vadd.f32 %v613_v39, %v1717_v7  ;;  %vm1764_vm4 = vcmp.eq.f32.partialorder %v740_v48, 8.507059e+37  ;;  %v743_v59 = vor.u32 1.1754944e-38, %v742_v1 }
 0x26a   :  { %v1736_v2 = vpop.f32.mrf.mxu0  ;;  %v1241_v45 = vpop.eup %1240  ;;  %1252 = vrcp.f32 %v1730_v42  ;;  %v1177_v55 = vmul.f32 -1.442695, %v1740_v46  ;;  %vm751_vm5 = vweird.f32 %v1730_v42  ;;  %vm1782_vm6 = vcmp.eq.f32.partialorder %v755_v49, 8.507059e+37 }
 0x26b   :  { %v1742_v47 = vpop.eup %1242  ;;  %v1746_v10 = vadd.f32 1.0, %v1241_v45  ;;  %1254 = vpow2.f32 %v654_v38  ;;  %v758_v8 = vor.u32 1.1754944e-38, %v757_v50  ;;  %v1180_v32 = vmul.f32 -1.442695, %v1761_v56  ;;  %v624_v45 = vld [vmem:[%s2061_s7 + $0x8] sm:$0xff] }
 0x26c   :  { %v1245_v16 = vpop.eup %1244  ;;  %1256 = vpow2.f32 %v1179_v43 }
 0x26d   :  { %v1247_v20 = vpop.eup %1246  ;;  %1258 = vrcp.f32 %v1746_v10  ;;  %v1757_v53 = vadd.f32 1.0, %v1245_v16  ;;  %v725_v63 = vand.u32 2147483647, %v1746_v10  ;;  %v727_v54 = vand.u32 2147483648, %v1746_v10 }
 0x26e   :  { %v1754_v51 = vpop.eup %1248  ;;  %v732_v52 = vmul.f32 %v1247_v20, %v1723_v35  ;;  %1260 = vpow2.f32 %v656_v0  ;;  %vm737_vm7 = vweird.f32 %v1247_v20  ;;  %vm721_vm8 = vweird.f32 %v1746_v10 }
 0x26f   :  { %v1251_v57 = vpop.eup %1250  ;;  %1262 = vrcp.f32 %v1757_v53  ;;  %v1774_v3 = vpop.f32.mrf.mxu2  ;;  %v772_v18 = vand.u32 2147483648, %v1757_v53  ;;  %v770_v22 = vand.u32 2147483647, %v1757_v53  ;;  %vm1795_vm9 = vcmp.eq.f32.partialorder %v725_v63, 8.507059e+37  ;;  %vm738_vm10 = vmor %vm736_vm0, %vm737_vm7 }
 0x270   :  { %v1769_v60 = vpop.eup %1252  ;;  %v733_v61 = vsub.f32 1.0, %v732_v52  ;;  %v1776_v4 = vpop.f32.mrf.mxu3  ;;  %v1786_v9 = vadd.f32 1.0, %v1251_v57  ;;  %1264 = vpow2.f32 %v1177_v55  ;;  %v728_v26 = vor.u32 1.1754944e-38, %v727_v54 }
 0x271   :  { %v1778_v5 = vpop.eup %1254  ;;  %v747_v6 = vmul.f32 %v1769_v60, %v1730_v42  ;;  %v582_v11 = vpop.f32.mrf.mxu1  ;;  %vm752_vm11 = vweird.f32 %v1769_v60  ;;  %vm766_vm12 = vweird.f32 %v1757_v53  ;;  %v773_v36 = vor.u32 1.1754944e-38, %v772_v18 }
 0x272   :  { %v600_v12 = vpop.f32.mrf.mxu0  ;;  %v1257_v13 = vpop.eup %1256  ;;  %v734_v15 = vmul.f32 %v1247_v20, %v733_v61  ;;  %1266 = vrcp.f32 %v1786_v9  ;;  %vm1816_vm14 = vcmp.eq.f32.partialorder %v770_v22, 8.507059e+37  ;;  %vm753_vm15 = vmor %vm751_vm5, %vm752_vm11  ;;  %vm796_vm1 = vweird.f32 %v1786_v9  ;;  %v625_v61 = vld [vmem:[%s2061_s7 + $0x10] sm:$0xff] }
 0x273   :  { %v1259_v19 = vpop.eup %1258  ;;  %v748_v21 = vsub.f32 1.0, %v747_v6  ;;  %v1805_v31 = vadd.f32 1.0, %v1257_v13  ;;  %v800_v1 = vand.u32 2147483647, %v1786_v9  ;;  %v802_v55 = vand.u32 2147483648, %v1786_v9  ;;  %v965_v54 = vpop.permute.xlu1 %964 }
 0x274   :  { %v735_v23 = vadd.f32 %v1247_v20, %v734_v15  ;;  %v717_v24 = vmul.f32 %v1259_v19, %v1746_v10  ;;  %v1799_v27 = vpop.eup %1260  ;;  %vm722_vm13 = vweird.f32 %v1259_v19  ;;  %v1861_v18 = vpop.permute.xlu0 %930 }
 0x275   :  { %v749_v28 = vmul.f32 %v1769_v60, %v748_v21  ;;  %v1808_v33 = vpop.eup %1262  ;;  %1268 = vrcp.f32 %v1805_v31  ;;  %vm723_vm0 = vmor %vm721_vm8, %vm722_vm13  ;;  %vm1857_vm5 = vcmp.eq.f32.partialorder %v800_v1, 8.507059e+37  ;;  %v652_v1 = vmul.f32 1.442695, %v1740_v46 }
 0x276   :  { %v739_v34 = vsel %vm738_vm10, %v1247_v20, %v735_v23  ;;  %v718_v30 = vsub.f32 1.0, %v717_v24  ;;  %v762_v38 = vmul.f32 %v1808_v33, %v1757_v53  ;;  %v1265_v43 = vpop.eup %1264  ;;  %1270 = vpow2.f32 %v1180_v32 }
 0x277   :  { %v744_v37 = vsel %vm1764_vm4, %v743_v59, %v739_v34  ;;  %v750_v35 = vadd.f32 %v1769_v60, %v749_v28  ;;  %v564_v16 = vpop.f32.mrf.mxu2  ;;  %vm767_vm4 = vweird.f32 %v1808_v33  ;;  %v1852_v11 = vadd.f32 1.0, %v1265_v43 }
 0x278   :  { %v912_v0 = vsel %vm908_vm3, %v1726_v40, %v744_v37  ;;  %v719_v48 = vmul.f32 %v1259_v19, %v718_v30  ;;  %v618_v20 = vpop.f32.mrf.mxu3  ;;  %v1267_v49 = vpop.eup %1266  ;;  %v763_v40 = vsub.f32 1.0, %v762_v38  ;;  %v626_v37 = vld [vmem:[%s2061_s7 + $0x18] sm:$0xff]  ;;  %v815_v38 = vand.u32 2147483647, %v1805_v31 }
 0x279   :  { %v939_v50 = vmul.f32 %v1788_v14, %v912_v0  ;;  %v754_v52 = vsel %vm753_vm15, %v1769_v60, %v750_v35  ;;  %v792_v58 = vmul.f32 %v1267_v49, %v1786_v9  ;;  %vm797_vm7 = vweird.f32 %v1267_v49 }
 0x27a   :  { %v759_v42 = vsel %vm1782_vm6, %v758_v8, %v754_v52  ;;  %v720_v57 = vadd.f32 %v1259_v19, %v719_v48  ;;  %v764_v63 = vmul.f32 %v1808_v33, %v763_v40  ;;  %vm768_vm6 = vmor %vm766_vm12, %vm767_vm4  ;;  %1272 = vrcp.f32 %v1852_v11  ;;  %v628_v48 = vld [vmem:[%s2061_s7 + $0x28] sm:$0xff] }
 0x27b   :  { %v951_v59 = vadd.f32 %v939_v50, %v624_v45  ;;  %v913_v60 = vsel %vm908_vm3, %v1734_v62, %v759_v42  ;;  %v793_v8 = vsub.f32 1.0, %v792_v58  ;;  %v1269_v15 = vpop.eup %1268  ;;  %vm798_vm8 = vmor %vm796_vm1, %vm797_vm7  ;;  %v817_v43 = vand.u32 2147483648, %v1805_v31 }
 0x27c   :  { %v940_v6 = vmul.f32 %v1788_v14, %v913_v60  ;;  %v724_v7 = vsel %vm723_vm0, %v1259_v19, %v720_v57  ;;  %v765_v62 = vadd.f32 %v1808_v33, %v764_v63  ;;  %v623_v19 = vld [vmem:[%s2061_s7] sm:$0xff]  ;;  %v807_v28 = vmul.f32 %v1269_v15, %v1805_v31  ;;  %v1271_v32 = vpop.eup %1270  ;;  %v1920_v42 = vpop.permute.xlu0 %969 }
 0x27d   :  { %v978_v12 = vmul.f32 %v965_v54, %v951_v59  ;;  %v729_v13 = vsel %vm1795_vm9, %v728_v26, %v724_v7  ;;  %v794_v23 = vmul.f32 %v1267_v49, %v793_v8  ;;  %v803_v26 = vor.u32 1.1754944e-38, %v802_v55 }
 0x27e   :  { %v952_v21 = vadd.f32 %v940_v6, %v625_v61  ;;  %v911_v22 = vsel %vm908_vm3, %v1742_v47, %v729_v13  ;;  %v769_v25 = vsel %vm768_vm6, %v1808_v33, %v765_v62  ;;  %v808_v35 = vsub.f32 1.0, %v807_v28  ;;  %v627_v28 = vld [vmem:[%s2061_s7 + $0x20] sm:$0xff] }
 0x27f   :  { %990 = vst [vmem:[%s2062_s10 + $0x8] sm:$0xff] %v978_v12  ;;  %v938_v24 = vmul.f32 %v1788_v14, %v911_v22  ;;  %v774_v34 = vsel %vm1816_vm14, %v773_v36, %v769_v25  ;;  %v795_v53 = vadd.f32 %v1267_v49, %v794_v23  ;;  %vm812_vm9 = vweird.f32 %v1269_v15 }
 0x280   :  { %v979_v47 = vmul.f32 %v965_v54, %v952_v21  ;;  %v914_v33 = vsel %vm908_vm3, %v1754_v51, %v774_v34  ;;  %v809_v51 = vmul.f32 %v1269_v15, %v808_v35  ;;  %v1898_v9 = vadd.f32 1.0, %v1271_v32  ;;  %v1273_v50 = vpop.eup %1272  ;;  %v1963_v35 = vpop.permute.xlu2 %906 }
 0x281   :  { %v950_v30 = vadd.f32 %v938_v24, %v623_v19  ;;  %v941_v36 = vmul.f32 %v1788_v14, %v914_v33  ;;  %v799_v39 = vsel %vm798_vm8, %v1267_v49, %v795_v53  ;;  %v1909_v16 = vadd.f32 %v1732_v44, %v1720_v29 }
 0x282   :  { %991 = vst [vmem:[%s2062_s10 + $0x10] sm:$0xff] %v979_v47  ;;  %v804_v17 = vsel %vm1857_vm5, %v803_v26, %v799_v39  ;;  %v810_v49 = vadd.f32 %v1269_v15, %v809_v51  ;;  %vm811_vm3 = vweird.f32 %v1805_v31  ;;  %1274 = vrcp.f32 %v1898_v9 }
 0x283   :  { %v977_v45 = vmul.f32 %v965_v54, %v950_v30  ;;  %v953_v0 = vadd.f32 %v941_v36, %v626_v37  ;;  %v916_v14 = vsel %vm909_vm2, %v1778_v5, %v804_v17  ;;  %vm813_vm10 = vmor %vm811_vm3, %vm812_vm9  ;;  %v818_v46 = vor.u32 1.1754944e-38, %v817_v43 }
 0x284   :  { %v943_v20 = vmul.f32 %v1861_v18, %v916_v14  ;;  %v658_v5 = vmul.f32 1.442695, %v1761_v56  ;;  %v814_v40 = vsel %vm813_vm10, %v1269_v15, %v810_v49  ;;  %vm816_vm11 = vcmp.eq.f32.partialorder %v815_v38, 8.507059e+37  ;;  %v629_v56 = vld [vmem:[%s2061_s7 + $0x30] sm:$0xff] }
 0x285   :  { %989 = vst [vmem:[%s2062_s10] sm:$0xff] %v977_v45  ;;  %v980_v52 = vmul.f32 %v965_v54, %v953_v0  ;;  %v777_v55 = vmul.f32 %v1273_v50, %v1852_v11  ;;  %v819_v31 = vsel %vm816_vm11, %v818_v46, %v814_v40  ;;  %1276 = vpow2.f32 %v652_v1 }
 0x286   :  { %v955_v44 = vadd.f32 %v943_v20, %v628_v48  ;;  %v787_v57 = vand.u32 2147483648, %v1852_v11  ;;  %v1182_v58 = vmul.f32 -1.442695, %v1909_v16  ;;  %v917_v61 = vsel %vm909_vm2, %v1799_v27, %v819_v31 }
 0x287   :  { %992 = vst [vmem:[%s2062_s10 + $0x18] sm:$0xff] %v980_v52  ;;  %v778_v60 = vsub.f32 1.0, %v777_v55  ;;  %v599_v63 = vadd.f32 %v1736_v2, %v1720_v29  ;;  %v944_v54 = vmul.f32 %v1861_v18, %v917_v61  ;;  %v563_v6 = vadd.f32 %v1774_v3, %v1720_v29 }
 0x288   :  { %v982_v59 = vmul.f32 %v1920_v42, %v955_v44  ;;  %1278 = vpow2.f32 %v1182_v58  ;;  %v1941_v7 = vadd.f32 %v1776_v4, %v1720_v29  ;;  %v1275_v8 = vpop.eup %1274  ;;  %vm782_vm12 = vweird.f32 %v1273_v50 }
 0x289   :  { %v779_v27 = vmul.f32 %v1273_v50, %v778_v60  ;;  %v785_v12 = vand.u32 2147483647, %v1852_v11  ;;  %v1183_v2 = vmul.f32 -1.442695, %v599_v63  ;;  %v956_v13 = vadd.f32 %v944_v54, %v629_v56 }
 0x28a   :  { %994 = vst [vmem:[%s2062_s10 + $0x28] sm:$0xff] %v982_v59  ;;  %1280 = vpow2.f32 %v658_v5  ;;  %v822_v62 = vmul.f32 %v1275_v8, %v1898_v9  ;;  %vm781_vm13 = vweird.f32 %v1852_v11  ;;  %v788_v3 = vor.u32 1.1754944e-38, %v787_v57  ;;  %v1991_v57 = vpop.permute.xlu2 %935 }
 0x28b   :  { %v780_v10 = vadd.f32 %v1273_v50, %v779_v27  ;;  %v1181_v29 = vmul.f32 -1.442695, %v563_v6  ;;  %v1277_v4 = vpop.eup %1276  ;;  %v983_v15 = vmul.f32 %v1920_v42, %v956_v13  ;;  %vm783_vm14 = vmor %vm781_vm13, %vm782_vm12  ;;  %1282 = vpow2.f32 %v1183_v2 }
 0x28c   :  { %v823_v21 = vsub.f32 1.0, %v822_v62  ;;  %v1184_v19 = vmul.f32 -1.442695, %v1941_v7  ;;  %vm786_vm15 = vcmp.eq.f32.partialorder %v785_v12, 8.507059e+37  ;;  %v830_v23 = vand.u32 2147483647, %v1898_v9 }
 0x28d   :  { %v784_v22 = vsel %vm783_vm14, %v1273_v50, %v780_v10  ;;  %v832_v24 = vand.u32 2147483648, %v1898_v9  ;;  %995 = vst [vmem:[%s2062_s10 + $0x30] sm:$0xff] %v983_v15  ;;  %vm827_vm1 = vweird.f32 %v1275_v8  ;;  %1284 = vpow2.f32 %v1181_v29 }
 0x28e   :  { %v1279_v25 = vpop.eup %1278  ;;  %v789_v11 = vsel %vm786_vm15, %v788_v3, %v784_v22  ;;  %v824_v26 = vmul.f32 %v1275_v8, %v823_v21  ;;  %vm826_vm0 = vweird.f32 %v1898_v9  ;;  %1286 = vpow2.f32 %v1184_v19  ;;  %v630_v9 = vld [vmem:[%s2061_s7 + $0x38] sm:$0xff] }
 0x28f   :  { %v915_v32 = vsel %vm909_vm2, %v1277_v4, %v789_v11  ;;  %v713_v47 = vadd.f32 1.0, %v1279_v25  ;;  %vm828_vm4 = vmor %vm826_vm0, %vm827_vm1  ;;  %v833_v37 = vor.u32 1.1754944e-38, %v832_v24  ;;  %vm831_vm5 = vcmp.eq.f32.partialorder %v830_v23, 8.507059e+37  ;;  %v632_v4 = vld [vmem:[%s2061_s7 + $0x48] sm:$0x1f] }
 0x290   :  { %v1281_v34 = vpop.eup %1280  ;;  %v942_v53 = vmul.f32 %v1861_v18, %v915_v32  ;;  %v825_v30 = vadd.f32 %v1275_v8, %v824_v26  ;;  %v662_v43 = vmul.f32 1.442695, %v1909_v16  ;;  %v664_v14 = vmul.f32 1.442695, %v599_v63 }
 0x291   :  { %1288 = vrcp.f32 %v713_v47  ;;  %v1283_v33 = vpop.eup %1282  ;;  %v660_v50 = vmul.f32 1.442695, %v563_v6  ;;  %v666_v46 = vmul.f32 1.442695, %v1941_v7  ;;  %v860_v44 = vand.u32 2147483647, %v713_v47 }
 0x292   :  { %v954_v38 = vadd.f32 %v942_v53, %v627_v28  ;;  %v829_v36 = vsel %vm828_vm4, %v1275_v8, %v825_v30  ;;  %v1966_v45 = vadd.f32 1.0, %v1283_v33  ;;  %v862_v55 = vand.u32 2147483648, %v713_v47  ;;  %v633_v33 = vld [vmem:[%s2061_s7 + $0x50] sm:$0x1f] }
 0x293   :  { %v834_v39 = vsel %vm831_vm5, %v833_v37, %v829_v36  ;;  %v1285_v17 = vpop.eup %1284  ;;  %vm910_vm6 = vcmp.eq.s32.totalorder %v1963_v35, 1  ;;  %vm856_vm7 = vweird.f32 %v713_v47  ;;  %vm861_vm8 = vcmp.eq.f32.partialorder %v860_v44, 8.507059e+37  ;;  %v975_v37 = vpop.permute.xlu2 %974 }
 0x294   :  { %v981_v51 = vmul.f32 %v1920_v42, %v954_v38  ;;  %v918_v0 = vsel %vm909_vm2, %v1281_v34, %v834_v39  ;;  %1290 = vrcp.f32 %v1966_v45  ;;  %v1287_v1 = vpop.eup %1286  ;;  %v1979_v16 = vadd.f32 1.0, %v1285_v17 }
 0x295   :  { %v945_v48 = vmul.f32 %v1861_v18, %v918_v0  ;;  %1292 = vpow2.f32 %v662_v43  ;;  %v1981_v52 = vadd.f32 1.0, %v1287_v1  ;;  %v875_v31 = vand.u32 2147483647, %v1966_v45 }
 0x296   :  { %993 = vst [vmem:[%s2062_s10 + $0x20] sm:$0xff] %v981_v51  ;;  %1294 = vrcp.f32 %v1979_v16  ;;  %v877_v59 = vand.u32 2147483648, %v1966_v45  ;;  %v863_v6 = vor.u32 1.1754944e-38, %v862_v55  ;;  %vm871_vm3 = vweird.f32 %v1966_v45 }
 0x297   :  { %v1289_v20 = vpop.eup %1288  ;;  %v957_v49 = vadd.f32 %v945_v48, %v630_v9  ;;  %1296 = vpow2.f32 %v664_v14  ;;  %vm1997_vm10 = vcmp.eq.f32.partialorder %v875_v31, 8.507059e+37  ;;  %vm841_vm12 = vweird.f32 %v1979_v16  ;;  %v631_v48 = vld [vmem:[%s2061_s7 + $0x40] sm:$0x1f] }
 0x298   :  { %v852_v41 = vmul.f32 %v1289_v20, %v713_v47  ;;  %1298 = vrcp.f32 %v1981_v52  ;;  %vm857_vm2 = vweird.f32 %v1289_v20  ;;  %v878_v13 = vor.u32 1.1754944e-38, %v877_v59 }
 0x299   :  { %v984_v18 = vmul.f32 %v1920_v42, %v957_v49  ;;  %1300 = vpow2.f32 %v660_v50  ;;  %vm858_vm9 = vmor %vm856_vm7, %vm857_vm2  ;;  %v845_v19 = vand.u32 2147483647, %v1979_v16  ;;  %v847_v22 = vand.u32 2147483648, %v1979_v16  ;;  %v634_v50 = vld [vmem:[%s2061_s7 + $0x58] sm:$0x1f] }
 0x29a   :  { %v853_v5 = vsub.f32 1.0, %v852_v41  ;;  %v1291_v40 = vpop.eup %1290  ;;  %1302 = vpow2.f32 %v666_v46  ;;  %v890_v28 = vand.u32 2147483647, %v1981_v52  ;;  %v892_v32 = vand.u32 2147483648, %v1981_v52 }
 0x29b   :  { %996 = vst [vmem:[%s2062_s10 + $0x38] sm:$0xff] %v984_v18  ;;  %v867_v42 = vmul.f32 %v1291_v40, %v1966_v45  ;;  %v1293_v56 = vpop.eup %1292  ;;  %vm872_vm11 = vweird.f32 %v1291_v40  ;;  %vm846_vm0 = vcmp.eq.f32.partialorder %v845_v19, 8.507059e+37  ;;  %v848_v36 = vor.u32 1.1754944e-38, %v847_v22 }
 0x29c   :  { %v854_v58 = vmul.f32 %v1289_v20, %v853_v5  ;;  %v1295_v61 = vpop.eup %1294  ;;  %vm873_vm13 = vmor %vm871_vm3, %vm872_vm11  ;;  %vm886_vm4 = vweird.f32 %v1981_v52  ;;  %v893_v9 = vor.u32 1.1754944e-38, %v892_v32  ;;  %vm891_vm2 = vcmp.eq.f32.partialorder %v890_v28, 8.507059e+37 }
 0x29d   :  { %v868_v63 = vsub.f32 1.0, %v867_v42  ;;  %v1297_v54 = vpop.eup %1296  ;;  %v837_v8 = vmul.f32 %v1295_v61, %v1979_v16  ;;  %vm842_vm14 = vweird.f32 %v1295_v61 }
 0x29e   :  { %v855_v60 = vadd.f32 %v1289_v20, %v854_v58  ;;  %v1299_v27 = vpop.eup %1298  ;;  %vm843_vm1 = vmor %vm841_vm12, %vm842_vm14 }
 0x29f   :  { %v869_v2 = vmul.f32 %v1291_v40, %v868_v63  ;;  %v1301_v62 = vpop.eup %1300  ;;  %v838_v3 = vsub.f32 1.0, %v837_v8  ;;  %v882_v29 = vmul.f32 %v1299_v27, %v1981_v52  ;;  %vm887_vm15 = vweird.f32 %v1299_v27 }
 0x2a0   :  { %v859_v12 = vsel %vm858_vm9, %v1289_v20, %v855_v60  ;;  %v1303_v23 = vpop.eup %1302  ;;  %vm888_vm5 = vmor %vm886_vm4, %vm887_vm15 }
 0x2a1   :  { %v864_v10 = vsel %vm861_vm8, %v863_v6, %v859_v12  ;;  %v870_v21 = vadd.f32 %v1291_v40, %v869_v2  ;;  %v839_v25 = vmul.f32 %v1295_v61, %v838_v3  ;;  %v883_v11 = vsub.f32 1.0, %v882_v29 }
 0x2a2   :  { %v920_v15 = vsel %vm910_vm6, %v1293_v56, %v864_v10 }
 0x2a3   :  { %v947_v24 = vmul.f32 %v1991_v57, %v920_v15  ;;  %v874_v26 = vsel %vm873_vm13, %v1291_v40, %v870_v21  ;;  %v840_v53 = vadd.f32 %v1295_v61, %v839_v25  ;;  %v884_v30 = vmul.f32 %v1299_v27, %v883_v11 }
 0x2a4   :  { %v879_v34 = vsel %vm1997_vm10, %v878_v13, %v874_v26 }
 0x2a5   :  { %v959_v47 = vadd.f32 %v947_v24, %v632_v4  ;;  %v921_v38 = vsel %vm910_vm6, %v1297_v54, %v879_v34  ;;  %v844_v45 = vsel %vm843_vm1, %v1295_v61, %v840_v53  ;;  %v885_v17 = vadd.f32 %v1299_v27, %v884_v30 }
 0x2a6   :  { %v948_v43 = vmul.f32 %v1991_v57, %v921_v38  ;;  %v849_v51 = vsel %vm846_vm0, %v848_v36, %v844_v45 }
 0x2a7   :  { %v986_v39 = vmul.f32 %v975_v37, %v959_v47  ;;  %v919_v14 = vsel %vm910_vm6, %v1301_v62, %v849_v51  ;;  %v889_v1 = vsel %vm888_vm5, %v1299_v27, %v885_v17 }
 0x2a8   :  { %v960_v0 = vadd.f32 %v948_v43, %v633_v33  ;;  %v946_v16 = vmul.f32 %v1991_v57, %v919_v14  ;;  %v894_v20 = vsel %vm891_vm2, %v893_v9, %v889_v1 }
 0x2a9   :  { %998 = vst [vmem:[%s2062_s10 + $0x48] sm:$0x1f] %v986_v39  ;;  %v922_v52 = vsel %vm910_vm6, %v1303_v23, %v894_v20 }
 0x2aa   :  { %v987_v49 = vmul.f32 %v975_v37, %v960_v0  ;;  %v958_v41 = vadd.f32 %v946_v16, %v631_v48  ;;  %v949_v18 = vmul.f32 %v1991_v57, %v922_v52 }
 0x2ac   :  { %999 = vst [vmem:[%s2062_s10 + $0x50] sm:$0x1f] %v987_v49  ;;  %v985_v46 = vmul.f32 %v975_v37, %v958_v41  ;;  %v961_v5 = vadd.f32 %v949_v18, %v634_v50 }
 0x2ae   :  { %997 = vst [vmem:[%s2062_s10 + $0x40] sm:$0x1f] %v985_v46  ;;  %v988_v44 = vmul.f32 %v975_v37, %v961_v5 }
 0x2b0   :  { %1000 = vst [vmem:[%s2062_s10 + $0x58] sm:$0x1f] %v988_v44 }

// kernel: darknet_forward.7
= control target key start
LH: loop header
LB: loop body
LE: loop exit
PB: predicated region body
PF: predicated region fallthrough
CT: control target
= control target key end

     0   :  { %vm119_vm0 = vcmask 130048   ;;  %vm155_vm1 = vcmask 261120   ;;  %v527_v27 = vmov 0   ;;  %s724_s0 = inlined_call_operand.vmem [shape: bf16[144,32], index: 0, kind: input, shape index: {}]   ;;  %s725_s1 = inlined_call_operand.vmem [shape: bf16[16,144], index: 1, kind: input, shape index: {}]   ;;  %s726_s2 = inlined_call_operand.vmem [shape: f32[16,1], index: 2, kind: input, shape index: {}]   ;;  %s727_s3 = inlined_call_operand.vmem [shape: f32[16,1], index: 3, kind: input, shape index: {}]   ;;  %s728_s6 = inlined_call_operand.vmem [shape: f32[21,1], index: 6, kind: input, shape index: {}]   ;;  %s729_s9 = inlined_call_operand.vmem [shape: f32[21,1], index: 9, kind: input, shape index: {}]   ;;  %s730_s5 = inlined_call_operand.vmem [shape: f32[21,1], index: 5, kind: input, shape index: {}]   ;;  %s731_s8 = inlined_call_operand.vmem [shape: f32[21,1], index: 8, kind: input, shape index: {}]   ;;  %s732_s4 = inlined_call_operand.vmem [shape: bf16[21,16], index: 4, kind: input, shape index: {}]   ;;  %s733_s7 = inlined_call_operand.vmem [shape: f32[21,32], index: 7, kind: input, shape index: {}]   ;;  %s734_s10 = inlined_call_operand.vmem [shape: f32[21,32], index: 10, kind: output, shape index: {}]  }
   0x1   :  { %v498_v0 = vld [vmem:[%s724_s0 + $0x38] sm:$0xff]  ;;  %v497_v1 = vld [vmem:[%s724_s0 + $0x30] sm:$0xff]  ;;  %v499_v2 = vld [vmem:[%s724_s0 + $0x40] sm:$0xff]  ;;  %502 = vset.pattern.permute.xlu2 %v527_v27  ;;  %503 = vset.pattern.permute.xlu0 %v527_v27 }
   0x2   :  { %123 = vmatpush.bf16.msra.mxu0 %v498_v0  ;;  %v489_v3 = vld [vmem:[%s725_s1 + $0x4] sm:$0xf]  ;;  %v439_v4 = vld [vmem:[%s725_s1 + $0x8] sm:$0xf0]  ;;  %144 = vmatpush.bf16.msra.mxu1 %v499_v2  ;;  %v494_v8 = vld [vmem:[%s724_s0 + $0x18] sm:$0xff] }
   0x3   :  { %v442_v5 = vor.u32 %v489_v3, %v439_v4  ;;  %v496_v6 = vld [vmem:[%s724_s0 + $0x28] sm:$0xff]  ;;  %v495_v7 = vld [vmem:[%s724_s0 + $0x20] sm:$0xff]  ;;  %v493_v9 = vld [vmem:[%s724_s0 + $0x10] sm:$0xff]  ;;  %504 = vset.pattern.permute.xlu1 %v527_v27 }
   0x4   :  { %v492_v10 = vld [vmem:[%s724_s0 + $0x8] sm:$0xff]  ;;  %v491_v11 = vld [vmem:[%s724_s0] sm:$0xff] }
   0x5   :  { %479 = vmatmul.msk.bf16.vlgmr.msra.gmra.mxu1 %vm119_vm0, %v442_v5  ;;  %v437_v12 = vld [vmem:[%s725_s1] sm:$0xf]  ;;  %v490_v13 = vld [vmem:[%s725_s1 + $0x4] sm:$0xf0] }
   0x6   :  { %124 = vmatpush.bf16.msra.mxu0 %v497_v1  ;;  %v438_v14 = vor.u32 %v490_v13, %v437_v12  ;;  %v151_v51 = vld [vmem:[%s726_s2] sm:$0xff]  ;;  %v152_v61 = vld [vmem:[%s726_s2 + $0x8] sm:$0xff] }
   0x7   :  { %v153_v57 = vld [vmem:[%s727_s3] sm:$0xff]  ;;  %v154_v1 = vld [vmem:[%s727_s3 + $0x8] sm:$0xff] }
   0x8   :  { %v293_v3 = vld [vmem:[%s728_s6 + $0x8] sm:$0xff]  ;;  %v301_v12 = vld [vmem:[%s729_s9] sm:$0xff] }
   0x9   :  { %v302_v5 = vld [vmem:[%s729_s9 + $0x8] sm:$0xff]  ;;  %v298_v13 = vld [vmem:[%s731_s8] sm:$0xff]  ;;  %vm304_vm9 = vcmp.gt.f32.partialorder %v301_v12, 0.5 }
   0xa   :  { %125 = vmatpush.bf16.msra.mxu0 %v496_v6  ;;  %v242_v6 = vld [vmem:[%s730_s5] sm:$0xff]  ;;  %vm305_vm8 = vcmp.gt.f32.partialorder %v302_v5, 0.5 }
   0xe   :  { %126 = vmatpush.bf16.msra.mxu0 %v495_v7  ;;  %v299_v7 = vld [vmem:[%s731_s8 + $0x8] sm:$0xff] }
  0x12   :  { %127 = vmatpush.bf16.msra.mxu0 %v494_v8  ;;  %v371_v8 = vsel %vm305_vm8, 1, %v527_v27 }
  0x16   :  { %128 = vmatpush.bf16.msra.mxu0 %v493_v9  ;;  %v243_v9 = vld [vmem:[%s730_s5 + $0x8] sm:$0xff] }
  0x1a   :  { %129 = vmatpush.bf16.msra.mxu0 %v492_v10  ;;  %v292_v10 = vld [vmem:[%s728_s6] sm:$0xff] }
  0x1e   :  { %130 = vmatpush.bf16.msra.mxu0 %v491_v11  ;;  %v244_v11 = vld [vmem:[%s730_s5 + $0x10] sm:$0x1f] }
  0x21   :  { %131 = vmatmul.bf16.vlgmr.msra.gmra.mxu0 %v438_v14  ;;  %v370_v14 = vsel %vm304_vm9, 1, %v527_v27 }
  0x82   :  { %v146_v15 = vpop.f32.mrf.mxu1 }
  0x8a   :  { %v148_v21 = vpop.f32.mrf.mxu1 }
  0x9e   :  { %v132_v16 = vpop.f32.mrf.mxu0 }
  0x9f   :  { %v623_v17 = vadd.f32 %v146_v15, %v132_v16  ;;  %v303_v15 = vld [vmem:[%s729_s9 + $0x10] sm:$0x1f] }
  0xa0   :  { %vm306_vm10 = vcmp.gt.f32.partialorder %v303_v15, 0.5 }
  0xa1   :  { %v156_v18 = vsel %vm155_vm1, %v623_v17, 0.0  ;;  %v164_v19 = vmul.f32 %v623_v17, %v623_v17  ;;  %v372_v16 = vsel %vm306_vm10, 1, %v527_v27 }
  0xa2   :  { %157 = vadd.xlane.f32.xlu0 %v156_v18  ;;  %v294_v18 = vld [vmem:[%s728_s6 + $0x10] sm:$0x1f] }
  0xa3   :  { %v166_v20 = vsel %vm155_vm1, %v164_v19, 0.0  ;;  %v300_v19 = vld [vmem:[%s731_s8 + $0x10] sm:$0x1f] }
  0xa4   :  { %167 = vadd.xlane.f32.xlu1 %v166_v20 }
  0xa6   :  { %v134_v22 = vpop.f32.mrf.mxu0 }
  0xa7   :  { %v630_v23 = vadd.f32 %v148_v21, %v134_v22 }
  0xa9   :  { %v159_v24 = vsel %vm155_vm1, %v630_v23, 0.0  ;;  %v165_v25 = vmul.f32 %v630_v23, %v630_v23 }
  0xaa   :  { %160 = vadd.xlane.f32.xlu0 %v159_v24 }
  0xab   :  { %v169_v26 = vsel %vm155_vm1, %v165_v25, 0.0 }
  0xac   :  { %170 = vadd.xlane.f32.xlu1 %v169_v26 }
 0x115   :  { %v158_v28 = vpop.xlane.xlu0 %157 }
 0x116   :  { %v162_v29 = vmul.f32 0.03125, %v158_v28 }
 0x117   :  { %v168_v30 = vpop.xlane.xlu1 %167 }
 0x118   :  { %v174_v31 = vmul.f32 %v162_v29, %v162_v29  ;;  %v172_v32 = vmul.f32 0.03125, %v168_v30 }
 0x11a   :  { %v176_v33 = vsub.f32 %v172_v32, %v174_v31 }
 0x11c   :  { %v178_v34 = vmax.f32 %v176_v33, 0.0 }
 0x11d   :  { %v161_v35 = vpop.xlane.xlu0 %160 }
 0x11e   :  { %v180_v36 = vadd.f32 1e-05, %v178_v34  ;;  %v163_v37 = vmul.f32 0.03125, %v161_v35  ;;  %v500_v34 = vld [vmem:[%s732_s4] sm:$0xff] }
 0x11f   :  { %v171_v38 = vpop.xlane.xlu1 %170 }
 0x120   :  { %505 = vrsqrt.f32 %v180_v36  ;;  %v175_v39 = vmul.f32 %v163_v37, %v163_v37  ;;  %v173_v40 = vmul.f32 0.03125, %v171_v38  ;;  %vm188_vm3 = vweird.f32 %v180_v36 }
 0x122   :  { %v177_v41 = vsub.f32 %v173_v40, %v175_v39 }
 0x124   :  { %v179_v42 = vmax.f32 %v177_v41, 0.0 }
 0x126   :  { %v506_v43 = vpop.eup %505  ;;  %v181_v44 = vadd.f32 1e-05, %v179_v42 }
 0x127   :  { %v183_v45 = vmul.f32 %v506_v43, %v180_v36  ;;  %vm189_vm2 = vweird.f32 %v506_v43 }
 0x128   :  { %507 = vrsqrt.f32 %v181_v44  ;;  %vm190_vm4 = vmor %vm188_vm3, %vm189_vm2  ;;  %vm198_vm6 = vweird.f32 %v181_v44 }
 0x129   :  { %v184_v46 = vmul.f32 %v506_v43, %v183_v45 }
 0x12b   :  { %v185_v47 = vmul.f32 0.5, %v184_v46 }
 0x12d   :  { %v186_v48 = vsub.f32 1.5, %v185_v47 }
 0x12e   :  { %v508_v49 = vpop.eup %507 }
 0x12f   :  { %v193_v50 = vmul.f32 %v508_v49, %v181_v44  ;;  %v187_v52 = vmul.f32 %v506_v43, %v186_v48  ;;  %vm199_vm5 = vweird.f32 %v508_v49 }
 0x130   :  { %vm200_vm7 = vmor %vm198_vm6, %vm199_vm5 }
 0x131   :  { %v194_v53 = vmul.f32 %v508_v49, %v193_v50  ;;  %v191_v54 = vsel %vm190_vm4, %v506_v43, %v187_v52 }
 0x132   :  { %v202_v55 = vmul.f32 %v191_v54, %v151_v51 }
 0x133   :  { %v195_v56 = vmul.f32 0.5, %v194_v53 }
 0x134   :  { %210 = vperm.xlu2 %502, %v202_v55   ;;  %v204_v58 = vmul.f32 %v202_v55, %v162_v29 }
 0x135   :  { %v196_v59 = vsub.f32 1.5, %v195_v56 }
 0x136   :  { %v206_v60 = vsub.f32 %v153_v57, %v204_v58 }
 0x137   :  { %v197_v62 = vmul.f32 %v508_v49, %v196_v59 }
 0x138   :  { %222 = vperm.xlu0 %503, %v206_v60  }
 0x139   :  { %v201_v63 = vsel %vm200_vm7, %v508_v49, %v197_v62 }
 0x13a   :  { %v203_v0 = vmul.f32 %v201_v63, %v152_v61 }
 0x13c   :  { %215 = vperm.xlu2 %502, %v203_v0   ;;  %v205_v2 = vmul.f32 %v203_v0, %v163_v37 }
 0x13e   :  { %v207_v4 = vsub.f32 %v154_v1, %v205_v2 }
 0x140   :  { %395 = vperm.xlu0 %503, %v293_v3   ;;  %227 = vperm.xlu1 %504, %v207_v4  }
 0x144   :  { %247 = vperm.xlu2 %502, %v242_v6  }
 0x148   :  { %416 = vperm.xlu0 %503, %v299_v7   ;;  %377 = vperm.xlu1 %504, %v371_v8  }
 0x14c   :  { %252 = vperm.xlu2 %502, %v243_v9  }
 0x150   :  { %390 = vperm.xlu1 %504, %v292_v10   ;;  %v295_v10 = vld [vmem:[%s733_s7] sm:$0xff] }
 0x154   :  { %257 = vperm.xlu2 %502, %v244_v11  }
 0x158   :  { %411 = vperm.xlu1 %504, %v298_v13  }
 0x15c   :  { %374 = vperm.xlu2 %502, %v370_v14  }
 0x164   :  { %380 = vperm.xlu2 %502, %v372_v16  }
 0x16c   :  { %400 = vperm.xlu2 %502, %v294_v18  }
 0x174   :  { %421 = vperm.xlu2 %502, %v300_v19  }
 0x18e   :  { %v211_v20 = vpop.permute.xlu2 %210 }
 0x18f   :  { %v218_v22 = vmul.f32 %v211_v20, %v623_v17  ;;  %v240_v17 = vld [vmem:[%s732_s4 + $0x8] sm:$0x7] }
 0x196   :  { %v216_v24 = vpop.permute.xlu2 %215 }
 0x197   :  { %v219_v26 = vmul.f32 %v216_v24, %v630_v23  ;;  %v265_v23 = vunpack.c.l.b16 %v240_v17 }
 0x199   :  { %v267_v35 = vpack.c.b16 %v265_v23, %v265_v23 }
 0x19e   :  { %v248_v36 = vpop.permute.xlu2 %247 }
 0x1a6   :  { %v253_v39 = vpop.permute.xlu2 %252 }
 0x1aa   :  { %v223_v21 = vpop.permute.xlu0 %222 }
 0x1ab   :  { %v230_v25 = vadd.f32 %v223_v21, %v218_v22 }
 0x1ad   :  { %v234_v28 = vmul.f32 0.1, %v230_v25  ;;  %vm232_vm11 = vcmp.gt.f32.partialorder %v230_v25, 0.0 }
 0x1ae   :  { %v258_v45 = vpop.permute.xlu2 %257 }
 0x1af   :  { %v236_v31 = vsel %vm232_vm11, %v230_v25, %v234_v28 }
 0x1b2   :  { %v228_v27 = vpop.permute.xlu1 %227  ;;  %v396_v15 = vpop.permute.xlu0 %395 }
 0x1b3   :  { %v231_v29 = vadd.f32 %v228_v27, %v219_v26 }
 0x1b5   :  { %v235_v30 = vmul.f32 0.1, %v231_v29  ;;  %vm233_vm12 = vcmp.gt.f32.partialorder %v231_v29, 0.0 }
 0x1b6   :  { %v375_v55 = vpop.permute.xlu2 %374 }
 0x1b7   :  { %v237_v32 = vsel %vm233_vm12, %v231_v29, %v235_v30  ;;  %vm382_vm2 = vcmp.eq.s32.totalorder %v375_v55, 1 }
 0x1b8   :  { %v241_v33 = vpack.c.bf16 %v237_v32, %v236_v31  ;;  %v296_v31 = vld [vmem:[%s733_s7 + $0x8] sm:$0xff] }
 0x1ba   :  { %281 = vmatpush.bf16.msra.mxu2 %v241_v33  ;;  %v701_v47 = vpop.permute.xlu1 %377 }
 0x1bb   :  { %vm383_vm7 = vcmp.eq.s32.totalorder %v701_v47, 1 }
 0x1bd   :  { %484 = vmatmul.msk.bf16.vlgmr.msra.gmra.mxu2 %vm119_vm0, %v500_v34 }
 0x1be   :  { %v381_v9 = vpop.permute.xlu2 %380 }
 0x1bf   :  { %vm384_vm12 = vcmp.eq.s32.totalorder %v381_v9, 1 }
 0x1c2   :  { %v391_v60 = vpop.permute.xlu1 %390 }
 0x1c6   :  { %v401_v23 = vpop.permute.xlu2 %400 }
 0x1ca   :  { %v412_v20 = vpop.permute.xlu1 %411 }
 0x1cd   :  { %485 = vmatmul.msk.bf16.gmra.mxu2 %vm119_vm0, %v267_v35 }
 0x240   :  { %v283_v37 = vpop.f32.mrf.mxu2 }
 0x241   :  { %v284_v38 = vadd.f32 %v283_v37, %v248_v36 }
 0x243   :  { %v486_v40 = vmul.f32 -1.442695, %v284_v38  ;;  %v307_v53 = vmul.f32 1.442695, %v284_v38  ;;  %v417_v38 = vpop.permute.xlu0 %416 }
 0x245   :  { %509 = vpow2.f32 %v486_v40 }
 0x248   :  { %v285_v41 = vpop.f32.mrf.mxu2 }
 0x249   :  { %v286_v42 = vadd.f32 %v285_v41, %v253_v39 }
 0x24b   :  { %v487_v43 = vmul.f32 -1.442695, %v286_v42  ;;  %v510_v44 = vpop.eup %509  ;;  %v309_v3 = vmul.f32 1.442695, %v286_v42 }
 0x24c   :  { %v322_v46 = vadd.f32 1.0, %v510_v44 }
 0x24d   :  { %511 = vpow2.f32 %v487_v43 }
 0x24e   :  { %513 = vrcp.f32 %v322_v46  ;;  %v336_v59 = vand.u32 2147483648, %v322_v46  ;;  %v334_v62 = vand.u32 2147483647, %v322_v46  ;;  %vm330_vm14 = vweird.f32 %v322_v46 }
 0x250   :  { %v288_v48 = vpop.f32.mrf.mxu2  ;;  %v337_v2 = vor.u32 1.1754944e-38, %v336_v59  ;;  %vm335_vm0 = vcmp.eq.f32.partialorder %v334_v62, 8.507059e+37 }
 0x251   :  { %v289_v49 = vadd.f32 %v288_v48, %v258_v45  ;;  %v297_v45 = vld [vmem:[%s733_s7 + $0x10] sm:$0x1f] }
 0x253   :  { %v488_v50 = vmul.f32 -1.442695, %v289_v49  ;;  %v512_v51 = vpop.eup %511  ;;  %v311_v26 = vmul.f32 1.442695, %v289_v49  ;;  %v422_v49 = vpop.permute.xlu2 %421 }
 0x254   :  { %v514_v52 = vpop.eup %513  ;;  %v323_v54 = vadd.f32 1.0, %v512_v51 }
 0x255   :  { %v326_v56 = vmul.f32 %v514_v52, %v322_v46  ;;  %515 = vpow2.f32 %v488_v50  ;;  %vm331_vm13 = vweird.f32 %v514_v52 }
 0x256   :  { %517 = vrcp.f32 %v323_v54  ;;  %vm332_vm15 = vmor %vm330_vm14, %vm331_vm13  ;;  %v351_v14 = vand.u32 2147483648, %v323_v54  ;;  %v349_v18 = vand.u32 2147483647, %v323_v54  ;;  %vm345_vm4 = vweird.f32 %v323_v54 }
 0x257   :  { %v327_v57 = vsub.f32 1.0, %v326_v56  ;;  %519 = vpow2.f32 %v307_v53  ;;  %vm429_vm13 = vcmask 258048  }
 0x258   :  { %v290_v58 = vpop.f32.mrf.mxu2  ;;  %v352_v25 = vor.u32 1.1754944e-38, %v351_v14  ;;  %vm350_vm6 = vcmp.eq.f32.partialorder %v349_v18, 8.507059e+37 }
 0x259   :  { %v328_v61 = vmul.f32 %v514_v52, %v327_v57 }
 0x25b   :  { %v516_v63 = vpop.eup %515  ;;  %v329_v0 = vadd.f32 %v514_v52, %v328_v61 }
 0x25c   :  { %v518_v1 = vpop.eup %517  ;;  %v324_v4 = vadd.f32 1.0, %v516_v63 }
 0x25d   :  { %v333_v5 = vsel %vm332_vm15, %v514_v52, %v329_v0  ;;  %v341_v6 = vmul.f32 %v518_v1, %v323_v54  ;;  %v520_v7 = vpop.eup %519  ;;  %vm346_vm3 = vweird.f32 %v518_v1 }
 0x25e   :  { %v338_v8 = vsel %vm335_vm0, %v337_v2, %v333_v5  ;;  %521 = vrcp.f32 %v324_v4  ;;  %vm347_vm5 = vmor %vm345_vm4, %vm346_vm3  ;;  %v366_v17 = vand.u32 2147483648, %v324_v4  ;;  %v364_v36 = vand.u32 2147483647, %v324_v4 }
 0x25f   :  { %v385_v11 = vsel %vm382_vm2, %v520_v7, %v338_v8  ;;  %v342_v12 = vsub.f32 1.0, %v341_v6  ;;  %523 = vpow2.f32 %v309_v3  ;;  %vm360_vm9 = vweird.f32 %v324_v4 }
 0x260   :  { %v403_v13 = vmul.f32 %v391_v60, %v385_v11  ;;  %525 = vpow2.f32 %v311_v26  ;;  %v367_v41 = vor.u32 1.1754944e-38, %v366_v17  ;;  %vm365_vm11 = vcmp.eq.f32.partialorder %v364_v36, 8.507059e+37 }
 0x261   :  { %v343_v16 = vmul.f32 %v518_v1, %v342_v12 }
 0x262   :  { %v406_v19 = vadd.f32 %v403_v13, %v295_v10 }
 0x263   :  { %v344_v21 = vadd.f32 %v518_v1, %v343_v16 }
 0x264   :  { %v522_v22 = vpop.eup %521  ;;  %v424_v24 = vmul.f32 %v412_v20, %v406_v19 }
 0x265   :  { %v348_v27 = vsel %vm347_vm5, %v518_v1, %v344_v21  ;;  %v356_v28 = vmul.f32 %v522_v22, %v324_v4  ;;  %v524_v29 = vpop.eup %523  ;;  %vm361_vm8 = vweird.f32 %v522_v22 }
 0x266   :  { %427 = vst.msk [vmem:[%s734_s10] sm:$0xff] %vm155_vm1, %v424_v24  ;;  %v353_v30 = vsel %vm350_vm6, %v352_v25, %v348_v27  ;;  %vm362_vm10 = vmor %vm360_vm9, %vm361_vm8  ;;  %v526_v43 = vpop.eup %525 }
 0x267   :  { %v386_v32 = vsel %vm383_vm7, %v524_v29, %v353_v30  ;;  %v357_v33 = vsub.f32 1.0, %v356_v28 }
 0x268   :  { %v404_v34 = vmul.f32 %v396_v15, %v386_v32 }
 0x269   :  { %v358_v35 = vmul.f32 %v522_v22, %v357_v33 }
 0x26a   :  { %v407_v37 = vadd.f32 %v404_v34, %v296_v31 }
 0x26b   :  { %v359_v39 = vadd.f32 %v522_v22, %v358_v35 }
 0x26c   :  { %v425_v40 = vmul.f32 %v417_v38, %v407_v37 }
 0x26d   :  { %v363_v42 = vsel %vm362_vm10, %v522_v22, %v359_v39 }
 0x26e   :  { %428 = vst.msk [vmem:[%s734_s10 + $0x8] sm:$0xff] %vm155_vm1, %v425_v40  ;;  %v368_v44 = vsel %vm365_vm11, %v367_v41, %v363_v42 }
 0x26f   :  { %v387_v46 = vsel %vm384_vm12, %v526_v43, %v368_v44 }
 0x270   :  { %v405_v47 = vmul.f32 %v401_v23, %v387_v46 }
 0x272   :  { %v408_v48 = vadd.f32 %v405_v47, %v297_v45 }
 0x274   :  { %v426_v50 = vmul.f32 %v422_v49, %v408_v48 }
 0x276   :  { %430 = vst.msk [vmem:[%s734_s10 + $0x10] sm:$0x1f] %vm429_vm13, %v426_v50 }

</bundles_post_ra>
